<compile_context>
chip_gen: v7x
topology: tpu7x:2x2x1
jax: 0.10.0
libtpu: 0.0.40
codegen_flags: <defaults>
</compile_context>

<pallas_src>
import functools

import jax
import jax.numpy as jnp
from jax.experimental import pallas as pl
from jax.experimental.pallas import tpu as pltpu

BN_EPS = 1e-5


def _pool_fc_kernel(feat_ref, w_ref, bias_ref, fc_ref, pooled_ref, *,
                    hw_total: int):
    """One grid step: (batch tile, spatial tile).

    feat_ref  : (b_blk, hw_blk, C) feature-map chunk, native dtype
    w_ref     : (C, E)             fc weight (pre-transposed for x @ W), resident
    bias_ref  : (1, E)             fc bias, f32, resident
    fc_ref    : (b_blk, E)         f32 fc output block (written on last hw step)
    pooled_ref: (b_blk, C)         f32 pooled-sum accumulator (scratch)
    """
    hw_step = pl.program_id(1)

    @pl.when(hw_step == 0)
    def _init():
        pooled_ref[...] = jnp.zeros_like(pooled_ref)

    # Spatial (sublane) reduction of this chunk with f32 accumulation — no
    # separate materialized astype of the whole block.
    pooled_ref[...] += jnp.sum(feat_ref[...], axis=1, dtype=jnp.float32)

    @pl.when(hw_step == pl.num_programs(1) - 1)
    def _finalize():
        # AdaptiveAvgPool2d((1,1)) + view(B, -1): mean over all spatial
        # positions, then Linear(2048, E) with f32 accumulation.
        pooled = pooled_ref[...] * (1.0 / float(hw_total))            # (b, C)
        fc = jnp.dot(pooled.astype(w_ref.dtype), w_ref[...],
                     preferred_element_type=jnp.float32)              # (b, E)
        fc_ref[...] = (fc + bias_ref[...]).astype(fc_ref.dtype)


def _bn_kernel(fc_ref, gamma_ref, beta_ref, out_ref):
    """BatchNorm1d, training mode: biased batch statistics over axis 0."""
    fc = fc_ref[...]
    mu = jnp.mean(fc, axis=0, keepdims=True)
    d = fc - mu
    var = jnp.mean(d * d, axis=0, keepdims=True)
    inv_std = jax.lax.rsqrt(var + BN_EPS)
    out_ref[...] = (d * inv_std * gamma_ref[...]
                    + beta_ref[...]).astype(out_ref.dtype)


def _largest_batch_tile(B: int, max_b: int) -> int:
    """Largest batch tile <= max_b dividing B; prefer B itself or a multiple
    of 8 so the (b_blk, E) output block stays sublane-aligned."""
    if max_b >= B:
        return B
    b = (max_b // 8) * 8
    while b >= 8:
        if B % b == 0:
            return b
        b -= 8
    b = max(1, max_b)
    while B % b != 0:
        b -= 1
    return max(b, 1)


def _pick_tiles(B: int, HW: int, C: int, itemsize: int,
                feat_budget_bytes: int) -> tuple[int, int]:
    """Pick (b_blk, hw_blk) so the streamed block is ~feat_budget_bytes."""
    per_sample = HW * C * itemsize
    if per_sample <= feat_budget_bytes:
        # Full-HW blocks (always layout-legal, no HW%8 requirement); tile batch.
        max_b = max(1, feat_budget_bytes // per_sample)
        return _largest_batch_tile(B, max_b), HW
    # A single sample's feature map exceeds the budget: tile the spatial axis.
    mult = 16 if itemsize == 2 else 8           # bf16 packs two rows / sublane
    if HW % mult != 0:
        # TODO(synk): mask partial spatial blocks for huge non-aligned HW;
        # until then fall back to the (legal) full spatial extent.
        return 1, HW
    hw_blk = min(HW, max(mult, (feat_budget_bytes // (C * itemsize)) // mult * mult))
    while HW % hw_blk != 0:
        hw_blk -= mult
    return 1, hw_blk


def encoder_cnn_tail(feat_nhwc, w_fc_t, fc_bias, bn_gamma, bn_beta, *,
                     b_block=None, hw_block=None):
    """Fused pool + fc + BatchNorm1d tail of EncoderCNN.

    feat_nhwc : (B, H, W, C) backbone feature map, channels-last, native dtype
                (streamed as-is: no extra HBM cast pass in the wrapper).
    w_fc_t    : (C, E) fc weight, already transposed from PyTorch's (E, C).
    fc_bias   : (E,)   fc bias.
    bn_gamma, bn_beta : (E,) BatchNorm1d affine parameters.
    Returns   : (B, E) f32 encoded features (training-mode BN forward).
    """
    B, H, W, C = feat_nhwc.shape
    C2, E = w_fc_t.shape
    if C != C2:
        raise ValueError("fc in_features must match backbone channels")
    if B < 2:
        raise ValueError("BatchNorm1d training-mode statistics need batch > 1")
    HW = H * W

    # Free reshape (merging contiguous dims); NO dtype cast here.
    feats = feat_nhwc.reshape(B, HW, C)
    itemsize = feats.dtype.itemsize

    gamma = bn_gamma.reshape(1, E).astype(jnp.float32)
    beta = bn_beta.reshape(1, E).astype(jnp.float32)
    bias = fc_bias.reshape(1, E).astype(jnp.float32)

    # Generation-aware VMEM capacity (64 MiB/TC on v7x, 128 MiB on v5e/v6e).
    try:
        vmem_cap = int(pltpu.get_tpu_info().vmem_capacity_bytes)
    except Exception:
        vmem_cap = 64 << 20  # conservative default (v7x)

    w_bytes = C * E * w_fc_t.dtype.itemsize
    resident_bytes = 2 * w_bytes + 8 * E * 4  # double-buffered weight + params
    # ~8-16 MiB streamed blocks amortize per-step overhead; bounded so
    # double-buffered blocks + residents stay well inside VMEM on every gen.
    feat_budget = max(2 << 20,
                      min(16 << 20, (vmem_cap - resident_bytes) // 4 - (2 << 20)))

    auto_b, auto_hw = _pick_tiles(B, HW, C, itemsize, feat_budget)
    b_blk = auto_b if b_block is None else int(b_block)
    hw_blk = auto_hw if hw_block is None else int(hw_block)
    if B % b_blk != 0:
        raise ValueError("batch tile must divide batch")
    if hw_blk != HW and HW % hw_blk != 0:
        raise ValueError("spatial tile must divide H*W (or equal it)")

    grid = (B // b_blk, HW // hw_blk)

    feat_block_bytes = b_blk * hw_blk * C * itemsize
    need = (3 * feat_block_bytes              # double-buffered stream + margin
            + 2 * w_bytes                     # resident fc weight (2 buffers)
            + b_blk * C * 4                   # pooled f32 scratch
            + 4 * b_blk * E * 4 + 8 * E * 4   # fc output block + params
            + (4 << 20))                      # compiler scratch margin
    vmem_limit = int(min(max(need, 16 << 20), vmem_cap))

    kernel = functools.partial(_pool_fc_kernel, hw_total=HW)

    # Stage 1: streaming pool + fc.  Batch axis "parallel" (both v7x cores),
    # spatial axis "arbitrary" (pooled sum carried in scratch across steps).
    # NOTE: resident operands could use pipeline_mode=pl.Buffered(1) to shave
    # ~w_bytes of VMEM; omitted here since headroom is already ample.
    fc_out = pl.pallas_call(
        kernel,
        out_shape=jax.ShapeDtypeStruct((B, E), jnp.float32),
        grid_spec=pltpu.PrefetchScalarGridSpec(
            num_scalar_prefetch=0,
            grid=grid,
            in_specs=[
                pl.BlockSpec((b_blk, hw_blk, C), lambda b, h: (b, h, 0)),
                pl.BlockSpec((C, E), lambda b, h: (0, 0)),   # resident weight
                pl.BlockSpec((1, E), lambda b, h: (0, 0)),   # fc bias
            ],
            out_specs=pl.BlockSpec((b_blk, E), lambda b, h: (b, 0)),
            scratch_shapes=[pltpu.VMEM((b_blk, C), jnp.float32)],
        ),
        compiler_params=pltpu.CompilerParams(
            dimension_semantics=("parallel", "arbitrary"),
            vmem_limit_bytes=vmem_limit,
        ),
    )(feats, w_fc_t, bias)

    # Stage 2: tiny full-batch BatchNorm1d epilogue (whole (B, E) fits VMEM).
    return pl.pallas_call(
        _bn_kernel,
        out_shape=jax.ShapeDtypeStruct((B, E), jnp.float32),
    )(fc_out, gamma, beta)


if __name__ == "__main__":
    # Small deterministic shapes consistent with the module: the fc fixes
    # C=2048 in_features and encoded_size defaults to 256; keep batch/spatial
    # small (the real ResNet-50 backbone gives HW = 7x7).
    B, C, H, W, E = 16, 2048, 4, 4, 256

    key = jax.random.PRNGKey(0)
    k_feat, k_w, k_b, k_g, k_bb = jax.random.split(key, 5)

    # Stand-in for self.resnet(images): NHWC feature map, native f32
    # (streamed as-is — no wrapper-side cast pass).
    feat_nhwc = jax.random.normal(k_feat, (B, H, W, C), dtype=jnp.float32)

    # nn.Linear(2048, 256): PyTorch weight is (out, in); pass it transposed
    # (in, out) once, outside the per-call path.  Bias included.
    w_fc = jax.random.normal(k_w, (E, C), dtype=jnp.float32) * 0.02
    w_fc_t = jnp.asarray(w_fc.T)
    fc_bias = 0.05 * jax.random.normal(k_b, (E,), dtype=jnp.float32)

    bn_gamma = 1.0 + 0.1 * jax.random.normal(k_g, (E,), dtype=jnp.float32)
    bn_beta = 0.1 * jax.random.normal(k_bb, (E,), dtype=jnp.float32)

    # Explicit small tiles to exercise both grid axes (batch-parallel x
    # spatial accumulation); the auto-picker would use one big block here.
    out = encoder_cnn_tail(feat_nhwc, w_fc_t, fc_bias, bn_gamma, bn_beta,
                           b_block=8, hw_block=8)
    out = jax.block_until_ready(out)
    assert out.shape == (B, E) and out.dtype == jnp.float32

    # Pure-JAX reference of the same trainable tail (pool -> fc -> BN train).
    pooled = jnp.mean(feat_nhwc.reshape(B, H * W, C), axis=1)
    fc = pooled @ w_fc_t + fc_bias[None, :]
    mu = jnp.mean(fc, axis=0, keepdims=True)
    var = jnp.mean((fc - mu) ** 2, axis=0, keepdims=True)
    ref = (fc - mu) / jnp.sqrt(var + BN_EPS) * bn_gamma[None, :] + bn_beta[None, :]
    max_err = float(jnp.max(jnp.abs(out - ref)))
    assert max_err < 1e-2, f"max abs error {max_err}"

    # Auto-tiled (generation-aware) path.
    out2 = jax.block_until_ready(
        encoder_cnn_tail(feat_nhwc, w_fc_t, fc_bias, bn_gamma, bn_beta))
    assert float(jnp.max(jnp.abs(out2 - ref))) < 1e-2

    print("KERNEL_OK")
</pallas_src>

<mosaic_0001>
module attributes {stable_mosaic.version = 11 : i64} {
  func.func @_pool_fc_kernel(%arg0: i32, %arg1: i32, %arg2: memref<8x8x2048xf32, #tpu.memory_space<vmem>>, %arg3: memref<2048x256xf32, #tpu.memory_space<vmem>>, %arg4: memref<1x256xf32, #tpu.memory_space<vmem>>, %arg5: memref<8x256xf32, #tpu.memory_space<vmem>>, %arg6: memref<8x2048xf32, #tpu.memory_space<vmem>>) attributes {dimension_semantics = [#tpu.dimension_semantics<parallel>, #tpu.dimension_semantics<arbitrary>], iteration_bounds = array<i64: 2, 2>, scalar_prefetch = 0 : i64, scratch_operands = 1 : i64, tpu.core_type = #tpu.core_type<tc>, window_params = [{transform_indices = @transform_0, window_bounds = array<i64: 8, 8, 2048>}, {pipeline_mode = #tpu.pipeline_mode<synchronous>, transform_indices = @transform_1, window_bounds = array<i64: 2048, 256>}, {pipeline_mode = #tpu.pipeline_mode<synchronous>, transform_indices = @transform_2, window_bounds = array<i64: 1, 256>}, {transform_indices = @transform_3, window_bounds = array<i64: 8, 256>}]} {
    %c0_i32 = arith.constant 0 : i32
    %0 = arith.cmpi eq, %arg1, %c0_i32 : i32
    %1 = arith.extui %0 : i1 to i32
    %c0_i32_0 = arith.constant 0 : i32
    %2 = arith.cmpi ne, %1, %c0_i32_0 : i32
    scf.if %2 {
      %cst_8 = arith.constant 0.000000e+00 : f32
      %11 = vector.broadcast %cst_8 : f32 to vector<8x2048xf32>
      %c0_9 = arith.constant 0 : index
      %c0_10 = arith.constant 0 : index
      %12 = vector.load %arg6[%c0_9, %c0_10] : memref<8x2048xf32, #tpu.memory_space<vmem>>, vector<8x2048xf32>
      tpu.vector_store %arg6[%c0_9, %c0_10], %11 {strides = array<i32>} : memref<8x2048xf32, #tpu.memory_space<vmem>>, vector<8x2048xf32>,
    } else {
    }
    %c0 = arith.constant 0 : index
    %c0_1 = arith.constant 0 : index
    %3 = vector.load %arg6[%c0, %c0_1] : memref<8x2048xf32, #tpu.memory_space<vmem>>, vector<8x2048xf32>
    %c0_2 = arith.constant 0 : index
    %c0_3 = arith.constant 0 : index
    %c0_4 = arith.constant 0 : index
    %4 = vector.load %arg2[%c0_2, %c0_3, %c0_4] : memref<8x8x2048xf32, #tpu.memory_space<vmem>>, vector<8x8x2048xf32>
    %cst = arith.constant dense<0.000000e+00> : vector<8x2048xf32>
    %5 = vector.multi_reduction <add>, %4, %cst [1] : vector<8x8x2048xf32> to vector<8x2048xf32>
    %6 = arith.addf %3, %5 : vector<8x2048xf32>
    %c0_5 = arith.constant 0 : index
    %c0_6 = arith.constant 0 : index
    %7 = vector.load %arg6[%c0_5, %c0_6] : memref<8x2048xf32, #tpu.memory_space<vmem>>, vector<8x2048xf32>
    tpu.vector_store %arg6[%c0_5, %c0_6], %6 {strides = array<i32>} : memref<8x2048xf32, #tpu.memory_space<vmem>>, vector<8x2048xf32>,
    %c1_i32 = arith.constant 1 : i32
    %8 = arith.cmpi eq, %arg1, %c1_i32 : i32
    %9 = arith.extui %8 : i1 to i32
    %c0_i32_7 = arith.constant 0 : i32
    %10 = arith.cmpi ne, %9, %c0_i32_7 : i32
    scf.if %10 {
      %c0_8 = arith.constant 0 : index
      %c0_9 = arith.constant 0 : index
      %11 = vector.load %arg6[%c0_8, %c0_9] : memref<8x2048xf32, #tpu.memory_space<vmem>>, vector<8x2048xf32>
      %cst_10 = arith.constant 6.250000e-02 : f32
      %12 = vector.broadcast %cst_10 : f32 to vector<8x2048xf32>
      %13 = arith.mulf %11, %12 : vector<8x2048xf32>
      %c0_11 = arith.constant 0 : index
      %c0_12 = arith.constant 0 : index
      %14 = vector.load %arg3[%c0_11, %c0_12] : memref<2048x256xf32, #tpu.memory_space<vmem>>, vector<2048x256xf32>
      %cst_13 = arith.constant dense<0.000000e+00> : vector<8x256xf32>
      %15 = tpu.matmul %13, %14, %cst_13 {dimension_numbers = #tpu.dot_dimension_numbers<[1], [0], [0], [1], [0, 0, 1, 1], [], []>} : vector<8x2048xf32>, vector<2048x256xf32>, vector<8x256xf32> -> vector<8x256xf32>
      %c0_14 = arith.constant 0 : index
      %c0_15 = arith.constant 0 : index
      %16 = vector.load %arg4[%c0_14, %c0_15] : memref<1x256xf32, #tpu.memory_space<vmem>>, vector<1x256xf32>
      %17 = vector.broadcast %16 : vector<1x256xf32> to vector<8x256xf32>
      %18 = arith.addf %15, %17 : vector<8x256xf32>
      %c0_16 = arith.constant 0 : index
      %c0_17 = arith.constant 0 : index
      %19 = vector.load %arg5[%c0_16, %c0_17] : memref<8x256xf32, #tpu.memory_space<vmem>>, vector<8x256xf32>
      tpu.vector_store %arg5[%c0_16, %c0_17], %18 {strides = array<i32>} : memref<8x256xf32, #tpu.memory_space<vmem>>, vector<8x256xf32>,
    } else {
    }
    return
  }
  func.func @transform_0(%arg0: i32, %arg1: i32) -> (i32, i32, i32) {
    %c0_i32 = arith.constant 0 : i32
    %c0_i32_0 = arith.constant 0 : i32
    return %arg0, %arg1, %c0_i32 : i32, i32, i32
  }
  func.func @transform_1(%arg0: i32, %arg1: i32) -> (i32, i32) {
    %c0_i32 = arith.constant 0 : i32
    %c0_i32_0 = arith.constant 0 : i32
    %c0_i32_1 = arith.constant 0 : i32
    return %c0_i32, %c0_i32_0 : i32, i32
  }
  func.func @transform_2(%arg0: i32, %arg1: i32) -> (i32, i32) {
    %c0_i32 = arith.constant 0 : i32
    %c0_i32_0 = arith.constant 0 : i32
    %c0_i32_1 = arith.constant 0 : i32
    return %c0_i32, %c0_i32_0 : i32, i32
  }
  func.func @transform_3(%arg0: i32, %arg1: i32) -> (i32, i32) {
    %c0_i32 = arith.constant 0 : i32
    %c0_i32_0 = arith.constant 0 : i32
    return %arg0, %c0_i32 : i32, i32
  }
}

</mosaic_0001>

<bundles_post_ra>
// kernel: tpu_custom_call.1
= control target key start
LH: loop header
LB: loop body
LE: loop exit
PB: predicated region body
PF: predicated region fallthrough
CT: control target
= control target key end

     0   :  { %s4594_s0 = inlined_call_operand.hbm [shape: f32[16,16,2048], index: 0, kind: input, shape index: {}]   ;;  %s4595_s1 = inlined_call_operand.hbm [shape: f32[2048,256], index: 1, kind: input, shape index: {}]   ;;  %s4596_s2 = inlined_call_operand.hbm [shape: f32[1,256], index: 2, kind: input, shape index: {}]   ;;  %s4597_s3 = inlined_call_operand.hbm [shape: f32[16,256], index: 3, kind: output, shape index: {}]  }
   0x1   :  { %4608 = sst [smem:[#allocation107_spill]] %s4595_s1 }
   0x2   :  { %4609 = sst [smem:[#allocation108_spill]] %s4596_s2 }
   0x3   :  { %8 = vsyncpa [#allocation4], 0 }
   0x4   :  { %10 = vsyncpa [#allocation4 + $0x1], 0 }
   0x5   :  { %11 = vsyncpa [#allocation7], 0 }
   0x6   :  { %12 = vsyncpa [#allocation5], 0 }
   0x7   :  { %14 = vsyncpa [#allocation5 + $0x1], 0  ;;  %s3635_s12 = smov 0   ;;  %s3637_s13 = smov 0  }
   0x8   :  { %s3639_s14 = smov 0   ;;  %s3641_s15 = smov 0  }
   0x9   :  { %s3643_s16 = smov 0   ;;  %s3645_s17 = smov 0  }
   0xa   :  { %s3647_s18 = smov 0   ;;  %s3649_s19 = smov 0  }
   0xb   :  { %s3651_s20 = smov 0   ;;  %s3653_s21 = smov 0  }
   0xc   :  { %s3655_s22 = smov 0  }
   0xd LB: > { %4610 = sst [smem:[#allocation13_spill]] %s3563_s12  ;;  %s2709_s23 = sadd.s32 4294967295, %s3603_s22   ;;  %s3603_s22 = sphi %s3655_s22, %s20_s22   ;;  %s3599_s21 = sphi %s3653_s21, %s4822_s21   ;;  %s3595_s20 = sphi %s3651_s20, %s4821_s20   ;;  %s3591_s19 = sphi %s3649_s19, %s4820_s19   ;;  %s3587_s18 = sphi %s3647_s18, %s4812_s18   ;;  %s3583_s17 = sphi %s3645_s17, %s4819_s17   ;;  %s3579_s16 = sphi %s3643_s16, %s4818_s16   ;;  %s3575_s15 = sphi %s3641_s15, %s4817_s15   ;;  %s3571_s14 = sphi %s3639_s14, %s4816_s14   ;;  %s3567_s13 = sphi %s3637_s13, %s4815_s13   ;;  %s3563_s12 = sphi %s3635_s12, %s4814_s12  }
   0xe   : > { %4611 = sst [smem:[#allocation14_spill]] %s3595_s20  ;;  %s2710_s24 = sadd.s32 4294967294, %s3603_s22  }
   0xf   : > { %4612 = sst [smem:[#allocation15_spill]] %s3603_s22  ;;  %p48_p0 = scmp.ne.s32.totalorder %s3583_s17, %s3579_s16 }
  0x10   : > { %p49_p1 = scmp.eq.s32.totalorder %s3603_s22, 0  ;;  %p54_p2 = scmp.ne.s32.totalorder %s3579_s16, %s3575_s15 }
  0x11   : > { %p3695_p3 = scmp.eq.s32.totalorder %s2709_s23, 0  ;;  %p119_p5 = scmp.ne.s32.totalorder %s3571_s14, %s3567_s13 }
  0x12   : > { %p3700_p4 = por %p49_p1, %p48_p0  ;;  %p120_p7 = scmp.eq.s32.totalorder %s2709_s23, 3 }
  0x13   : > { %s4613_s26 = scalar_select %p3695_p3, 1, 0 }
  0x14   : > { %p3708_p6 = por %p3695_p3, %p54_p2  ;;  %p125_p8 = scmp.ne.s32.totalorder %s3567_s13, %s3563_s12 }
  0x15   : > { %p126_p9 = scmp.eq.s32.totalorder %s2710_s24, 3  ;;  %p3714_p10 = por %p120_p7, %p119_p5 }
  0x16   : > { %s4615_s29 = scalar_select %p3708_p6, 1, 0 }
  0x17   : > { %s4616_s30 = scalar_select %p3714_p10, 1, 0 }
  0x18   : > { %p2711_p11 = scmp.ge.s32.totalorder %s3603_s22, 1  ;;  %p3719_p12 = por %p126_p9, %p125_p8 }
  0x19   : > { %p133_p13 = scmp.lt.s32.totalorder %s3603_s22, 5  ;;  %s3605_s6 = smov [#allocation6]  }
  0x1a   : > { %s4617_s4 = scalar_select %p3719_p12, 1, 0 }
  0x1b   : > { %p3724_p0 = pnand %p2711_p11, %p133_p13  ;;  %s145_s7 = sshll.u32 %s3605_s6, 4  ;;  %s3728_s7 = int_to_ptr.vmem [resolvable:$true] %s145_s7 }
  0x1c   : > { %4618 = sst [smem:[#allocation16_spill]] %s4617_s4  ;;  %p3291_p2 = scmp.lt.s32.totalorder %s3603_s22, 4 }
  0x1d   : > { %p3274_p1 = pneg %p3724_p0  ;;  %s3606_s10 = smov [#allocation8]  }
  0x1e   : > { %p3741_p7 = pnand %p3291_p2, %p3700_p4  ;;  %s159_s11 = sshll.u32 %s3606_s10, 4  ;;  %s3745_s11 = int_to_ptr.vmem [resolvable:$true] %s159_s11 }
  0x1f   : > { %p3735_p5 = pnand %p3274_p1, %p3695_p3  ;;  %s4622_s1 = sld [smem:[#allocation107_spill]] }
  0x21   : > { %p3393_p9 = pneg %p3735_p5 }
  0x25   : > { %s3391_s24 = scalar_lea.hbm %s4622_s1, 65536 }
  0x26   : > { %p3392_p8 = scmp.ne.s32.totalorder %s4622_s1, %s3391_s24  ;;  %p3398_p13 = scmp.lt.u32.totalorder %s3391_s24, %s4622_s1 }
  0x28   : > { %p3394_p4 = pnand %p3393_p9, %p3392_p8 }
  0x2a   : > { %p3395_p11 = pneg %p3394_p4 }
  0x2c   : > { %p3400_p1 = pnand %p3398_p13, %p3395_p11 }
  0x2e   : > { %3403 = shalt.err (!%p3400_p1)
}
  0x2f   : > { %s3404_s10 = scalar_lea.vmem %s3728_s7, 65536  ;;  %p3412_p3 = scmp.lt.s32.totalorder %s3728_s7, %s3728_s7 }
  0x30   : > { %p3405_p2 = scmp.ne.s32.totalorder %s3728_s7, %s3404_s10  ;;  %p3413_p8 = scmp.lt.s32.totalorder %s3404_s10, %s3404_s10 }
  0x32   : > { %p3407_p12 = pnand %p3405_p2, %p3393_p9  ;;  %p3414_p4 = por %p3413_p8, %p3412_p3 }
  0x34   : > { %p3408_p10 = pneg %p3407_p12 }
  0x36   : > { %p3415_p6 = pnand %p3414_p4, %p3408_p10 }
  0x38   : > { %3418 = shalt.err (!%p3415_p6)
}
  0x39   : > { %s3607_s25 = smov 256   ;;  %s3608_s27 = smov 16  }
  0x3a   : > { %3277 = dma.hbm_to_vmem [thread:$0]  (!%p3735_p5), %s4622_s1, 65536, %s3728_s7, [#allocation7], %s3607_s25, %s3607_s25, %s3608_s27  }
  0x3b   : > { %s4623_s2 = sld [smem:[#allocation108_spill]] }
  0x41   : > { %s3419_s28 = scalar_lea.hbm %s4623_s2, 32 }
  0x42   : > { %p3420_p3 = scmp.ne.s32.totalorder %s4623_s2, %s3419_s28  ;;  %p3426_p12 = scmp.lt.u32.totalorder %s3419_s28, %s4623_s2 }
  0x44   : > { %p3422_p6 = pnand %p3420_p3, %p3393_p9 }
  0x46   : > { %p3423_p10 = pneg %p3422_p6 }
  0x48   : > { %p3428_p11 = pnand %p3426_p12, %p3423_p10 }
  0x4a   : > { %3431 = shalt.err (!%p3428_p11)
}
  0x4b   : > { %s3432_s7 = scalar_lea.vmem %s3745_s11, 32  ;;  %p3440_p8 = scmp.lt.s32.totalorder %s3745_s11, %s3745_s11 }
  0x4c   : > { %p3433_p13 = scmp.ne.s32.totalorder %s3745_s11, %s3432_s7  ;;  %p3441_p4 = scmp.lt.s32.totalorder %s3432_s7, %s3432_s7 }
  0x4e   : > { %p3435_p1 = pnand %p3433_p13, %p3393_p9  ;;  %p3442_p3 = por %p3441_p4, %p3440_p8 }
  0x50   : > { %p3436_p2 = pneg %p3435_p1 }
  0x52   : > { %p3443_p6 = pnand %p3442_p3, %p3436_p2 }
  0x54   : > { %3446 = shalt.err (!%p3443_p6)
}
  0x55   : > { %3280 = dma.hbm_to_vmem [thread:$0]  (!%p3735_p5), %s4623_s2, 32, %s3745_s11, [#allocation7]  }
  0x56   : > { %s29_s4 = sadd.s32 1, %s3595_s20  ;;  %s32_s25 = sadd.s32 1, %s3599_s21 }
  0x57   : > { %p30_p9 = scmp.ge.s32.totalorder %s29_s4, 2  ;;  %s170_s27 = sand.u32 1, %s3583_s17  }
  0x58   : > { %s2717_s15 = sshll.u32 %s3595_s20, 4  ;;  %s2715_s23 = sshll.u32 %s170_s27, 10 }
  0x59   : > { %s4824_s4 = smov (%p30_p9, %s29_s4), 0  ;;  %s4826_s25 = smov (!%p30_p9, %s32_s25), %s3599_s21 }
  0x5a   : > { %4624 = sst [smem:[#allocation17_spill]] %s4824_s4  ;;  %s37_s8 = ssub.s32 %s3595_s20, %s4824_s4 }
  0x5b   : > { %p34_p10 = scmp.ge.s32.totalorder %s4826_s25, 2  ;;  %s2732_s24 = sshll.u32 %s3599_s21, 8 }
  0x5c   : > { %s181_s11 = sadd.s32 %s2732_s24, %s2717_s15  ;;  %s174_s6 = scalar_lea.vmem [#allocation3], %s2715_s23 }
  0x5d   : > { %s4828_s25 = smov (%p34_p10, %s4826_s25), 0  ;;  %s184_s28 = sshll.u32 %s174_s6, 4  ;;  %s3828_s28 = int_to_ptr.vmem [resolvable:$true] %s184_s28 }
  0x5e   : > { %s36_s10 = ssub.s32 %s3599_s21, %s4828_s25  ;;  %s2719_s7 = sshll.u32 %s181_s11, 7 }
  0x5f   : > { %s38_s12 = sor.u32 %s37_s8, %s36_s10  ;;  %p107_p5 = scmp.eq.s32.totalorder %s36_s10, 0 }
  0x60   : > { %p39_p12 = scmp.eq.s32.totalorder %s38_s12, 0  ;;  %s3816_s2 = scalar_lea.hbm %s4594_s0, %s2719_s7 }
  0x61   : > { %s4625_s4 = sadd.s32 1, %s3571_s14  ;;  %s4626_s15 = sadd.s32 1, %s3583_s17 }
  0x62   : > { %s3821_s20 = scalar_select %p107_p5, %s3571_s14, %s4625_s4  }
  0x63   : > { %s3826_s23 = scalar_select %p39_p12, %s3583_s17, %s4626_s15  }
  0x64   : > { %s3830_s8 = scalar_lea.sflag [#allocation4], %s170_s27  ;;  %s3447_s24 = scalar_lea.hbm %s3816_s2, 16384 }
  0x65   : > { %p3448_p11 = scmp.ne.s32.totalorder %s3816_s2, %s3447_s24  ;;  %p3449_p13 = pneg %p3741_p7 }
  0x66   : > { %s3452_s4 = scalar_lea.hbm %s4594_s0, 65536  ;;  %p3453_p8 = scmp.lt.u32.totalorder %s3816_s2, %s4594_s0 }
  0x67   : > { %p3450_p1 = pnand %p3449_p13, %p3448_p11  ;;  %p3454_p4 = scmp.lt.u32.totalorder %s3452_s4, %s3447_s24 }
  0x68   : > { %p3456_p6 = scmp.lt.u32.totalorder %s3447_s24, %s3816_s2 }
  0x69   : > { %p3451_p2 = pneg %p3450_p1  ;;  %p3455_p3 = por %p3454_p4, %p3453_p8 }
  0x6b   : > { %p3457_p9 = por %p3456_p6, %p3455_p3 }
  0x6d   : > { %p3458_p10 = pnand %p3457_p9, %p3451_p2 }
  0x6f   : > { %3461 = shalt.err (!%p3458_p10)
}
  0x70   : > { %s3462_s27 = scalar_lea.vmem %s3828_s28, 16384  ;;  %s3609_s7 = smov [#allocation3]  }
  0x71   : > { %p3463_p5 = scmp.ne.s32.totalorder %s3828_s28, %s3462_s27  ;;  %s3467_s12 = sshll.u32 %s3609_s7, 4  ;;  %s3468_s12 = int_to_ptr.vmem [resolvable:$false] %s3467_s12 }
  0x72   : > { %s3469_s22 = scalar_lea.vmem %s3468_s12, 32768  ;;  %p3470_p1 = scmp.lt.s32.totalorder %s3828_s28, %s3468_s12 }
  0x73   : > { %p3465_p12 = pnand %p3463_p5, %p3449_p13  ;;  %p3471_p8 = scmp.lt.s32.totalorder %s3469_s22, %s3462_s27 }
  0x75   : > { %p3466_p11 = pneg %p3465_p12  ;;  %p3472_p4 = por %p3471_p8, %p3470_p1 }
  0x77   : > { %p3473_p3 = pnand %p3472_p4, %p3466_p11 }
  0x79   : > { %3476 = shalt.err (!%p3473_p3)
}
  0x7a   : > { %s3610_s15 = smov 4096   ;;  %s3611_s24 = smov 2048  }
  0x7b   : > { %s3612_s1 = smov 128   ;;  %196 = sbr.rel (%p3724_p0) target bundleno = 878 (0x36e), region = 32 }
  0x7c   : > { %3284 = dma.hbm_to_vmem [thread:$0]  (!%p3741_p7), %s3816_s2, 16384, %s3828_s28, %s3830_s8, %s3610_s15, %s3611_s24, %s3612_s1  }
  0x82   : > { %s198_s11 = sand.u32 1, %s3579_s16   ;;  %p4627_p13 = scmp.ne.s32.totalorder %s4615_s29, 0 }
  0x83   : > { %s2721_s4 = sshll.u32 %s198_s11, 10  ;;  %s199_s6 = scalar_lea.sflag [#allocation4], %s198_s11 }
  0x84   : > { %s3861_s10 = scalar_lea.vmem [#allocation3], %s2721_s4 }
  0x85   : > { %3550 = dma.done.wait (%p4627_p13), %s199_s6, 16384  }
  0x86   : > { %3552 = vsyncadd (%p4627_p13), %s199_s6, 4294950912  ;;  %p4628_p2 = scmp.ne.s32.totalorder %s4613_s26, 0 }
  0x88   : > { %3554 = dma.done.wait (%p4628_p2), [#allocation7], 65568  }
  0x89   : > { %3556 = vsyncadd (%p4628_p2), [#allocation7], 4294901728  ;;  %s230_s2 = sand.u32 1, %s3567_s13   ;;  %p2725_p0 = scmp.ne.s32.totalorder %s3587_s18, 0 }
  0x8a   : > { %s2724_s5 = sshll.u32 %s230_s2, 4  ;;  %v3613_v0 = vmov (!%p2725_p0), 0.0  }
  0x8b   : > { %s3874_s9 = scalar_lea.vmem [#allocation9], %s2724_s5  ;;  %237 = sbr.rel (%p2725_p0) target bundleno = 147 (0x93), region = 48  ;;  %238 = vst [vmem:[#allocation2] sm:$0xff] (!%p2725_p0), %v3613_v0  ;;  %239 = vst [vmem:[#allocation2 + $0x8] sm:$0xff] (!%p2725_p0), %v3613_v0 }
  0x8c   : > { %240 = vst [vmem:[#allocation2 + $0x10] sm:$0xff] (!%p2725_p0), %v3613_v0  ;;  %241 = vst [vmem:[#allocation2 + $0x18] sm:$0xff] (!%p2725_p0), %v3613_v0 }
  0x8d   : > { %242 = vst [vmem:[#allocation2 + $0x20] sm:$0xff] (!%p2725_p0), %v3613_v0  ;;  %243 = vst [vmem:[#allocation2 + $0x28] sm:$0xff] (!%p2725_p0), %v3613_v0 }
  0x8e   : > { %244 = vst [vmem:[#allocation2 + $0x30] sm:$0xff] (!%p2725_p0), %v3613_v0  ;;  %245 = vst [vmem:[#allocation2 + $0x38] sm:$0xff] (!%p2725_p0), %v3613_v0 }
  0x8f   : > { %246 = vst [vmem:[#allocation2 + $0x40] sm:$0xff] (!%p2725_p0), %v3613_v0  ;;  %247 = vst [vmem:[#allocation2 + $0x48] sm:$0xff] (!%p2725_p0), %v3613_v0 }
  0x90   : > { %248 = vst [vmem:[#allocation2 + $0x50] sm:$0xff] (!%p2725_p0), %v3613_v0  ;;  %249 = vst [vmem:[#allocation2 + $0x58] sm:$0xff] (!%p2725_p0), %v3613_v0 }
  0x91   : > { %250 = vst [vmem:[#allocation2 + $0x60] sm:$0xff] (!%p2725_p0), %v3613_v0  ;;  %251 = vst [vmem:[#allocation2 + $0x68] sm:$0xff] (!%p2725_p0), %v3613_v0 }
  0x92   : > { %252 = vst [vmem:[#allocation2 + $0x70] sm:$0xff] %v3613_v0  ;;  %253 = vst [vmem:[#allocation2 + $0x78] sm:$0xff] %v3613_v0 }
  0x93 PF: > { %v270_v1 = vld [vmem:[%s3861_s10] sm:$0xff]  ;;  %v271_v2 = vld [vmem:[%s3861_s10 + $0x8] sm:$0xff]  ;;  %v272_v3 = vld [vmem:[%s3861_s10 + $0x10] sm:$0xff]  ;;  %vm1294_vm0 = vcmask 1041409   ;;  %vm1296_vm1 = vcmask 1042434   ;;  %vm1298_vm2 = vcmask 1043459  }
  0x94   : > { %v273_v4 = vld [vmem:[%s3861_s10 + $0x18] sm:$0xff]  ;;  %v274_v5 = vld [vmem:[%s3861_s10 + $0x20] sm:$0xff]  ;;  %v398_v6 = vrot.slane %v270_v1, 4  ;;  %v404_v7 = vrot.slane %v271_v2, 4  ;;  %v275_v8 = vld [vmem:[%s3861_s10 + $0x28] sm:$0xff]  ;;  %v410_v11 = vrot.slane %v272_v3, 4 }
  0x95   : > { %v276_v9 = vld [vmem:[%s3861_s10 + $0x30] sm:$0xff]  ;;  %v277_v10 = vld [vmem:[%s3861_s10 + $0x38] sm:$0xff]  ;;  %v416_v12 = vrot.slane %v273_v4, 4  ;;  %v422_v13 = vrot.slane %v274_v5, 4  ;;  %v428_v16 = vrot.slane %v275_v8, 4  ;;  %v278_v42 = vld [vmem:[%s3861_s10 + $0x40] sm:$0xff] }
  0x96   : > { %v399_v14 = vadd.f32 %v398_v6, %v270_v1  ;;  %v405_v15 = vadd.f32 %v404_v7, %v271_v2  ;;  %v434_v17 = vrot.slane %v276_v9, 4  ;;  %v411_v18 = vadd.f32 %v410_v11, %v272_v3  ;;  %v279_v43 = vld [vmem:[%s3861_s10 + $0x48] sm:$0xff]  ;;  %v280_v48 = vld [vmem:[%s3861_s10 + $0x50] sm:$0xff]  ;;  %v281_v49 = vld [vmem:[%s3861_s10 + $0x58] sm:$0xff]  ;;  %p2726_p7 = scmp.ne.s32.totalorder %s3587_s18, 1 }
  0x97   : > { %v417_v19 = vadd.f32 %v416_v12, %v273_v4  ;;  %v423_v20 = vadd.f32 %v422_v13, %v274_v5  ;;  %v440_v21 = vrot.slane %v277_v10, 4  ;;  %v429_v24 = vadd.f32 %v428_v16, %v275_v8  ;;  %v282_v50 = vld [vmem:[%s3861_s10 + $0x60] sm:$0xff]  ;;  %v283_v55 = vld [vmem:[%s3861_s10 + $0x68] sm:$0xff]  ;;  %v284_v56 = vld [vmem:[%s3861_s10 + $0x70] sm:$0xff] }
  0x98   : > { %v400_v22 = vrot.slane %v399_v14, 2  ;;  %v406_v23 = vrot.slane %v405_v15, 2  ;;  %v435_v25 = vadd.f32 %v434_v17, %v276_v9  ;;  %v412_v26 = vrot.slane %v411_v18, 2  ;;  %v285_v61 = vld [vmem:[%s3861_s10 + $0x78] sm:$0xff] }
  0x99   : > { %v418_v27 = vrot.slane %v417_v19, 2  ;;  %v424_v28 = vrot.slane %v423_v20, 2  ;;  %v441_v29 = vadd.f32 %v440_v21, %v277_v10  ;;  %v430_v32 = vrot.slane %v429_v24, 2 }
  0x9a   : > { %v401_v30 = vadd.f32 %v400_v22, %v399_v14  ;;  %v407_v31 = vadd.f32 %v406_v23, %v405_v15  ;;  %v436_v33 = vrot.slane %v435_v25, 2  ;;  %v413_v34 = vadd.f32 %v412_v26, %v411_v18 }
  0x9b   : > { %v419_v35 = vadd.f32 %v418_v27, %v417_v19  ;;  %v425_v36 = vadd.f32 %v424_v28, %v423_v20  ;;  %v442_v37 = vrot.slane %v441_v29, 2  ;;  %v431_v40 = vadd.f32 %v430_v32, %v429_v24 }
  0x9c   : > { %v402_v38 = vrot.slane %v401_v30, 1  ;;  %v408_v39 = vrot.slane %v407_v31, 1  ;;  %v437_v41 = vadd.f32 %v436_v33, %v435_v25  ;;  %v414_v44 = vrot.slane %v413_v34, 1 }
  0x9d   : > { %v420_v45 = vrot.slane %v419_v35, 1  ;;  %v426_v46 = vrot.slane %v425_v36, 1  ;;  %v443_v47 = vadd.f32 %v442_v37, %v441_v29  ;;  %v432_v53 = vrot.slane %v431_v40, 1 }
  0x9e   : > { %v3890_v51 = vadd.f32 %v402_v38, %v401_v30  ;;  %v3892_v52 = vadd.f32 %v408_v39, %v407_v31  ;;  %v438_v54 = vrot.slane %v437_v41, 1  ;;  %v3896_v57 = vadd.f32 %v414_v44, %v413_v34  ;;  %v286_v34 = vld [vmem:[%s3861_s10 + $0x80] sm:$0xff] }
  0x9f   : > { %v3898_v58 = vadd.f32 %v420_v45, %v419_v35  ;;  %v3900_v59 = vadd.f32 %v426_v46, %v425_v36  ;;  %v444_v60 = vrot.slane %v443_v47, 1  ;;  %v3903_v62 = vadd.f32 %v432_v53, %v431_v40  ;;  %v287_v35 = vld [vmem:[%s3861_s10 + $0x88] sm:$0xff]  ;;  %v288_v40 = vld [vmem:[%s3861_s10 + $0x90] sm:$0xff] }
  0xa0   : > { %v3905_v63 = vadd.f32 %v438_v54, %v437_v41  ;;  %v446_v0 = vrot.slane %v278_v42, 4  ;;  %v452_v1 = vrot.slane %v279_v43, 4  ;;  %v458_v3 = vrot.slane %v280_v48, 4  ;;  %v289_v41 = vld [vmem:[%s3861_s10 + $0x98] sm:$0xff] }
  0xa1   : > { %4629 = vst [vmem:[#allocation18_spill] sm:$0xff] %v3903_v62  ;;  %v3907_v2 = vadd.f32 %v444_v60, %v443_v47  ;;  %v464_v4 = vrot.slane %v281_v49, 4  ;;  %v470_v5 = vrot.slane %v282_v50, 4  ;;  %v476_v8 = vrot.slane %v283_v55, 4  ;;  %v291_v47 = vld [vmem:[%s3861_s10 + $0xa8] sm:$0xff] }
  0xa2   : > { %4630 = vst [vmem:[#allocation19_spill] sm:$0xff] %v3905_v63  ;;  %v447_v6 = vadd.f32 %v446_v0, %v278_v42  ;;  %v453_v7 = vadd.f32 %v452_v1, %v279_v43  ;;  %v482_v9 = vrot.slane %v284_v56, 4  ;;  %v459_v10 = vadd.f32 %v458_v3, %v280_v48  ;;  %v290_v42 = vld [vmem:[%s3861_s10 + $0xa0] sm:$0xff]  ;;  %v292_v48 = vld [vmem:[%s3861_s10 + $0xb0] sm:$0xff] }
  0xa3   : > { %4631 = vst [vmem:[#allocation20_spill] sm:$0xff] %v3907_v2  ;;  %v465_v11 = vadd.f32 %v464_v4, %v281_v49  ;;  %v471_v12 = vadd.f32 %v470_v5, %v282_v50  ;;  %v488_v13 = vrot.slane %v285_v61, 4  ;;  %v477_v16 = vadd.f32 %v476_v8, %v283_v55  ;;  %v293_v55 = vld [vmem:[%s3861_s10 + $0xb8] sm:$0xff] }
  0xa4   : > { %v448_v14 = vrot.slane %v447_v6, 2  ;;  %v454_v15 = vrot.slane %v453_v7, 2  ;;  %v483_v17 = vadd.f32 %v482_v9, %v284_v56  ;;  %v460_v18 = vrot.slane %v459_v10, 2 }
  0xa5   : > { %v466_v19 = vrot.slane %v465_v11, 2  ;;  %v472_v20 = vrot.slane %v471_v12, 2  ;;  %v489_v21 = vadd.f32 %v488_v13, %v285_v61  ;;  %v478_v24 = vrot.slane %v477_v16, 2 }
  0xa6   : > { %v449_v22 = vadd.f32 %v448_v14, %v447_v6  ;;  %v455_v23 = vadd.f32 %v454_v15, %v453_v7  ;;  %v484_v25 = vrot.slane %v483_v17, 2  ;;  %v461_v26 = vadd.f32 %v460_v18, %v459_v10 }
  0xa7   : > { %v467_v27 = vadd.f32 %v466_v19, %v465_v11  ;;  %v473_v28 = vadd.f32 %v472_v20, %v471_v12  ;;  %v490_v29 = vrot.slane %v489_v21, 2  ;;  %v479_v32 = vadd.f32 %v478_v24, %v477_v16 }
  0xa8   : > { %v450_v30 = vrot.slane %v449_v22, 1  ;;  %v456_v31 = vrot.slane %v455_v23, 1  ;;  %v485_v33 = vadd.f32 %v484_v25, %v483_v17  ;;  %v462_v36 = vrot.slane %v461_v26, 1 }
  0xa9   : > { %v468_v37 = vrot.slane %v467_v27, 1  ;;  %v474_v38 = vrot.slane %v473_v28, 1  ;;  %v491_v39 = vadd.f32 %v490_v29, %v489_v21  ;;  %v480_v45 = vrot.slane %v479_v32, 1 }
  0xaa   : > { %v3914_v43 = vadd.f32 %v450_v30, %v449_v22  ;;  %v3916_v44 = vadd.f32 %v456_v31, %v455_v23  ;;  %v486_v46 = vrot.slane %v485_v33, 1  ;;  %v3920_v49 = vadd.f32 %v462_v36, %v461_v26 }
  0xab   : > { %v3922_v50 = vadd.f32 %v468_v37, %v467_v27  ;;  %v3924_v53 = vadd.f32 %v474_v38, %v473_v28  ;;  %v492_v54 = vrot.slane %v491_v39, 1  ;;  %v3927_v56 = vadd.f32 %v480_v45, %v479_v32 }
  0xac   : > { %4632 = vst [vmem:[#allocation21_spill] sm:$0xff] %v3914_v43  ;;  %4633 = vst [vmem:[#allocation22_spill] sm:$0xff] %v3916_v44  ;;  %v3929_v60 = vadd.f32 %v486_v46, %v485_v33  ;;  %v494_v61 = vrot.slane %v286_v34, 4  ;;  %v500_v0 = vrot.slane %v287_v35, 4  ;;  %v506_v3 = vrot.slane %v288_v40, 4 }
  0xad   : > { %4634 = vst [vmem:[#allocation23_spill] sm:$0xff] %v3920_v49  ;;  %4635 = vst [vmem:[#allocation24_spill] sm:$0xff] %v3922_v50  ;;  %v3931_v1 = vadd.f32 %v492_v54, %v491_v39  ;;  %v512_v4 = vrot.slane %v289_v41, 4  ;;  %v518_v5 = vrot.slane %v290_v42, 4  ;;  %v524_v8 = vrot.slane %v291_v47, 4  ;;  %v299_v54 = vld [vmem:[%s3861_s10 + $0xe8] sm:$0xff] }
  0xae   : > { %4636 = vst [vmem:[#allocation25_spill] sm:$0xff] %v3924_v53  ;;  %4637 = vst [vmem:[#allocation26_spill] sm:$0xff] %v3927_v56  ;;  %v495_v6 = vadd.f32 %v494_v61, %v286_v34  ;;  %v501_v7 = vadd.f32 %v500_v0, %v287_v35  ;;  %v530_v9 = vrot.slane %v292_v48, 4  ;;  %v507_v10 = vadd.f32 %v506_v3, %v288_v40  ;;  %v294_v34 = vld [vmem:[%s3861_s10 + $0xc0] sm:$0xff]  ;;  %v295_v35 = vld [vmem:[%s3861_s10 + $0xc8] sm:$0xff] }
  0xaf   : > { %4638 = vst [vmem:[#allocation27_spill] sm:$0xff] %v3929_v60  ;;  %4639 = vst [vmem:[#allocation28_spill] sm:$0xff] %v3931_v1  ;;  %v513_v11 = vadd.f32 %v512_v4, %v289_v41  ;;  %v519_v12 = vadd.f32 %v518_v5, %v290_v42  ;;  %v536_v13 = vrot.slane %v293_v55, 4  ;;  %v525_v16 = vadd.f32 %v524_v8, %v291_v47  ;;  %v296_v40 = vld [vmem:[%s3861_s10 + $0xd0] sm:$0xff]  ;;  %v297_v41 = vld [vmem:[%s3861_s10 + $0xd8] sm:$0xff] }
  0xb0   : > { %v496_v14 = vrot.slane %v495_v6, 2  ;;  %v502_v15 = vrot.slane %v501_v7, 2  ;;  %v531_v17 = vadd.f32 %v530_v9, %v292_v48  ;;  %v508_v18 = vrot.slane %v507_v10, 2  ;;  %v298_v42 = vld [vmem:[%s3861_s10 + $0xe0] sm:$0xff]  ;;  %v301_v5 = vld [vmem:[%s3861_s10 + $0xf8] sm:$0xff] }
  0xb1   : > { %v514_v19 = vrot.slane %v513_v11, 2  ;;  %v520_v20 = vrot.slane %v519_v12, 2  ;;  %v537_v21 = vadd.f32 %v536_v13, %v293_v55  ;;  %v526_v24 = vrot.slane %v525_v16, 2  ;;  %v300_v55 = vld [vmem:[%s3861_s10 + $0xf0] sm:$0xff] }
  0xb2   : > { %v497_v22 = vadd.f32 %v496_v14, %v495_v6  ;;  %v503_v23 = vadd.f32 %v502_v15, %v501_v7  ;;  %v532_v25 = vrot.slane %v531_v17, 2  ;;  %v509_v26 = vadd.f32 %v508_v18, %v507_v10 }
  0xb3   : > { %v515_v27 = vadd.f32 %v514_v19, %v513_v11  ;;  %v521_v28 = vadd.f32 %v520_v20, %v519_v12  ;;  %v538_v29 = vrot.slane %v537_v21, 2  ;;  %v527_v32 = vadd.f32 %v526_v24, %v525_v16 }
  0xb4   : > { %v498_v30 = vrot.slane %v497_v22, 1  ;;  %v504_v31 = vrot.slane %v503_v23, 1  ;;  %v533_v33 = vadd.f32 %v532_v25, %v531_v17  ;;  %v510_v36 = vrot.slane %v509_v26, 1 }
  0xb5   : > { %v516_v37 = vrot.slane %v515_v27, 1  ;;  %v522_v38 = vrot.slane %v521_v28, 1  ;;  %v539_v39 = vadd.f32 %v538_v29, %v537_v21  ;;  %v528_v47 = vrot.slane %v527_v32, 1 }
  0xb6   : > { %v3938_v45 = vadd.f32 %v498_v30, %v497_v22  ;;  %v3940_v46 = vadd.f32 %v504_v31, %v503_v23  ;;  %v534_v48 = vrot.slane %v533_v33, 1  ;;  %v3944_v61 = vadd.f32 %v510_v36, %v509_v26 }
  0xb7   : > { %v3946_v0 = vadd.f32 %v516_v37, %v515_v27  ;;  %v3948_v3 = vadd.f32 %v522_v38, %v521_v28  ;;  %v540_v4 = vrot.slane %v539_v39, 1  ;;  %v3951_v6 = vadd.f32 %v528_v47, %v527_v32  ;;  %v303_v47 = vld [vmem:[%s3861_s10 + $0x108] sm:$0xff] }
  0xb8   : > { %v3953_v7 = vadd.f32 %v534_v48, %v533_v33  ;;  %v542_v8 = vrot.slane %v294_v34, 4  ;;  %v548_v9 = vrot.slane %v295_v35, 4  ;;  %v554_v11 = vrot.slane %v296_v40, 4 }
  0xb9   : > { %4640 = vst [vmem:[#allocation29_spill] sm:$0xff] %v3951_v6  ;;  %v3955_v10 = vadd.f32 %v540_v4, %v539_v39  ;;  %v560_v12 = vrot.slane %v297_v41, 4  ;;  %v566_v13 = vrot.slane %v298_v42, 4  ;;  %v572_v16 = vrot.slane %v299_v54, 4 }
  0xba   : > { %4641 = vst [vmem:[#allocation30_spill] sm:$0xff] %v3953_v7  ;;  %v543_v14 = vadd.f32 %v542_v8, %v294_v34  ;;  %v549_v15 = vadd.f32 %v548_v9, %v295_v35  ;;  %v578_v17 = vrot.slane %v300_v55, 4  ;;  %v555_v18 = vadd.f32 %v554_v11, %v296_v40  ;;  %v305_v8 = vld [vmem:[%s3861_s10 + $0x118] sm:$0xff]  ;;  %v306_v9 = vld [vmem:[%s3861_s10 + $0x120] sm:$0xff] }
  0xbb   : > { %4642 = vst [vmem:[#allocation31_spill] sm:$0xff] %v3955_v10  ;;  %v561_v19 = vadd.f32 %v560_v12, %v297_v41  ;;  %v567_v20 = vadd.f32 %v566_v13, %v298_v42  ;;  %v584_v21 = vrot.slane %v301_v5, 4  ;;  %v573_v24 = vadd.f32 %v572_v16, %v299_v54  ;;  %v302_v42 = vld [vmem:[%s3861_s10 + $0x100] sm:$0xff]  ;;  %v308_v16 = vld [vmem:[%s3861_s10 + $0x130] sm:$0xff] }
  0xbc   : > { %v544_v22 = vrot.slane %v543_v14, 2  ;;  %v550_v23 = vrot.slane %v549_v15, 2  ;;  %v579_v25 = vadd.f32 %v578_v17, %v300_v55  ;;  %v556_v26 = vrot.slane %v555_v18, 2 }
  0xbd   : > { %v562_v27 = vrot.slane %v561_v19, 2  ;;  %v568_v28 = vrot.slane %v567_v20, 2  ;;  %v585_v29 = vadd.f32 %v584_v21, %v301_v5  ;;  %v574_v32 = vrot.slane %v573_v24, 2  ;;  %v304_v5 = vld [vmem:[%s3861_s10 + $0x110] sm:$0xff]  ;;  %v309_v21 = vld [vmem:[%s3861_s10 + $0x138] sm:$0xff] }
  0xbe   : > { %v545_v30 = vadd.f32 %v544_v22, %v543_v14  ;;  %v551_v31 = vadd.f32 %v550_v23, %v549_v15  ;;  %v580_v33 = vrot.slane %v579_v25, 2  ;;  %v557_v34 = vadd.f32 %v556_v26, %v555_v18  ;;  %v307_v15 = vld [vmem:[%s3861_s10 + $0x128] sm:$0xff] }
  0xbf   : > { %v563_v35 = vadd.f32 %v562_v27, %v561_v19  ;;  %v569_v36 = vadd.f32 %v568_v28, %v567_v20  ;;  %v586_v37 = vrot.slane %v585_v29, 2  ;;  %v575_v40 = vadd.f32 %v574_v32, %v573_v24 }
  0xc0   : > { %v546_v38 = vrot.slane %v545_v30, 1  ;;  %v552_v39 = vrot.slane %v551_v31, 1  ;;  %v581_v41 = vadd.f32 %v580_v33, %v579_v25  ;;  %v558_v48 = vrot.slane %v557_v34, 1 }
  0xc1   : > { %v564_v54 = vrot.slane %v563_v35, 1  ;;  %v570_v55 = vrot.slane %v569_v36, 1  ;;  %v587_v4 = vadd.f32 %v586_v37, %v585_v29  ;;  %v576_v13 = vrot.slane %v575_v40, 1 }
  0xc2   : > { %v3962_v11 = vadd.f32 %v546_v38, %v545_v30  ;;  %v3964_v12 = vadd.f32 %v552_v39, %v551_v31  ;;  %v582_v14 = vrot.slane %v581_v41, 1  ;;  %v3968_v17 = vadd.f32 %v558_v48, %v557_v34 }
  0xc3   : > { %v3970_v18 = vadd.f32 %v564_v54, %v563_v35  ;;  %v3972_v19 = vadd.f32 %v570_v55, %v569_v36  ;;  %v588_v20 = vrot.slane %v587_v4, 1  ;;  %v3975_v22 = vadd.f32 %v576_v13, %v575_v40 }
  0xc4   : > { %4643 = vst [vmem:[#allocation32_spill] sm:$0xff] %v3962_v11  ;;  %4644 = vst [vmem:[#allocation33_spill] sm:$0xff] %v3964_v12  ;;  %v3977_v23 = vadd.f32 %v582_v14, %v581_v41  ;;  %v590_v24 = vrot.slane %v302_v42, 4  ;;  %v596_v25 = vrot.slane %v303_v47, 4  ;;  %v602_v27 = vrot.slane %v304_v5, 4 }
  0xc5   : > { %4645 = vst [vmem:[#allocation34_spill] sm:$0xff] %v3968_v17  ;;  %4646 = vst [vmem:[#allocation35_spill] sm:$0xff] %v3970_v18  ;;  %v3979_v26 = vadd.f32 %v588_v20, %v587_v4  ;;  %v608_v28 = vrot.slane %v305_v8, 4  ;;  %v614_v29 = vrot.slane %v306_v9, 4  ;;  %v620_v32 = vrot.slane %v307_v15, 4 }
  0xc6   : > { %4647 = vst [vmem:[#allocation36_spill] sm:$0xff] %v3972_v19  ;;  %4648 = vst [vmem:[#allocation37_spill] sm:$0xff] %v3975_v22  ;;  %v591_v30 = vadd.f32 %v590_v24, %v302_v42  ;;  %v597_v31 = vadd.f32 %v596_v25, %v303_v47  ;;  %v626_v33 = vrot.slane %v308_v16, 4  ;;  %v603_v34 = vadd.f32 %v602_v27, %v304_v5  ;;  %v310_v27 = vld [vmem:[%s3861_s10 + $0x140] sm:$0xff] }
  0xc7   : > { %4649 = vst [vmem:[#allocation38_spill] sm:$0xff] %v3977_v23  ;;  %4650 = vst [vmem:[#allocation39_spill] sm:$0xff] %v3979_v26  ;;  %v609_v35 = vadd.f32 %v608_v28, %v305_v8  ;;  %v615_v36 = vadd.f32 %v614_v29, %v306_v9  ;;  %v632_v37 = vrot.slane %v309_v21, 4  ;;  %v621_v40 = vadd.f32 %v620_v32, %v307_v15  ;;  %v311_v28 = vld [vmem:[%s3861_s10 + $0x148] sm:$0xff]  ;;  %v312_v32 = vld [vmem:[%s3861_s10 + $0x150] sm:$0xff] }
  0xc8   : > { %v592_v38 = vrot.slane %v591_v30, 2  ;;  %v598_v39 = vrot.slane %v597_v31, 2  ;;  %v627_v41 = vadd.f32 %v626_v33, %v308_v16  ;;  %v604_v48 = vrot.slane %v603_v34, 2  ;;  %v313_v33 = vld [vmem:[%s3861_s10 + $0x158] sm:$0xff] }
  0xc9   : > { %v610_v54 = vrot.slane %v609_v35, 2  ;;  %v616_v55 = vrot.slane %v615_v36, 2  ;;  %v633_v4 = vadd.f32 %v632_v37, %v309_v21  ;;  %v622_v42 = vrot.slane %v621_v40, 2 }
  0xca   : > { %v593_v13 = vadd.f32 %v592_v38, %v591_v30  ;;  %v599_v14 = vadd.f32 %v598_v39, %v597_v31  ;;  %v628_v47 = vrot.slane %v627_v41, 2  ;;  %v605_v5 = vadd.f32 %v604_v48, %v603_v34  ;;  %v314_v34 = vld [vmem:[%s3861_s10 + $0x160] sm:$0xff]  ;;  %v315_v39 = vld [vmem:[%s3861_s10 + $0x168] sm:$0xff] }
  0xcb   : > { %v611_v8 = vadd.f32 %v610_v54, %v609_v35  ;;  %v617_v9 = vadd.f32 %v616_v55, %v615_v36  ;;  %v634_v20 = vrot.slane %v633_v4, 2  ;;  %v623_v16 = vadd.f32 %v622_v42, %v621_v40  ;;  %v316_v40 = vld [vmem:[%s3861_s10 + $0x170] sm:$0xff]  ;;  %v317_v42 = vld [vmem:[%s3861_s10 + $0x178] sm:$0xff] }
  0xcc   : > { %v594_v24 = vrot.slane %v593_v13, 1  ;;  %v600_v15 = vrot.slane %v599_v14, 1  ;;  %v629_v25 = vadd.f32 %v628_v47, %v627_v41  ;;  %v606_v21 = vrot.slane %v605_v5, 1 }
  0xcd   : > { %v612_v29 = vrot.slane %v611_v8, 1  ;;  %v618_v30 = vrot.slane %v617_v9, 1  ;;  %v635_v31 = vadd.f32 %v634_v20, %v633_v4  ;;  %v624_v36 = vrot.slane %v623_v16, 1 }
  0xce   : > { %v3986_v37 = vadd.f32 %v594_v24, %v593_v13  ;;  %v3988_v35 = vadd.f32 %v600_v15, %v599_v14  ;;  %v630_v38 = vrot.slane %v629_v25, 1  ;;  %v3992_v48 = vadd.f32 %v606_v21, %v605_v5 }
  0xcf   : > { %v3994_v41 = vadd.f32 %v612_v29, %v611_v8  ;;  %v3996_v54 = vadd.f32 %v618_v30, %v617_v9  ;;  %v636_v55 = vrot.slane %v635_v31, 1  ;;  %v3999_v4 = vadd.f32 %v624_v36, %v623_v16 }
  0xd0   : > { %v4001_v47 = vadd.f32 %v630_v38, %v629_v25  ;;  %v638_v13 = vrot.slane %v310_v27, 4  ;;  %v644_v20 = vrot.slane %v311_v28, 4  ;;  %v650_v24 = vrot.slane %v312_v32, 4 }
  0xd1   : > { %4651 = vst [vmem:[#allocation40_spill] sm:$0xff] %v3996_v54  ;;  %4652 = vst [vmem:[#allocation41_spill] sm:$0xff] %v3999_v4  ;;  %v4003_v14 = vadd.f32 %v636_v55, %v635_v31  ;;  %v656_v15 = vrot.slane %v313_v33, 4  ;;  %v662_v26 = vrot.slane %v314_v34, 4  ;;  %v668_v21 = vrot.slane %v315_v39, 4 }
  0xd2   : > { %4653 = vst [vmem:[#allocation42_spill] sm:$0xff] %v4001_v47  ;;  %v639_v1 = vadd.f32 %v638_v13, %v310_v27  ;;  %v645_v5 = vadd.f32 %v644_v20, %v311_v28  ;;  %v674_v8 = vrot.slane %v316_v40, 4  ;;  %v651_v29 = vadd.f32 %v650_v24, %v312_v32  ;;  %v318_v24 = vld [vmem:[%s3861_s10 + $0x180] sm:$0xff] }
  0xd3   : > { %4654 = vst [vmem:[#allocation43_spill] sm:$0xff] %v4003_v14  ;;  %v657_v9 = vadd.f32 %v656_v15, %v313_v33  ;;  %v663_v30 = vadd.f32 %v662_v26, %v314_v34  ;;  %v680_v23 = vrot.slane %v317_v42, 4  ;;  %v669_v36 = vadd.f32 %v668_v21, %v315_v39  ;;  %v319_v15 = vld [vmem:[%s3861_s10 + $0x188] sm:$0xff]  ;;  %v321_v21 = vld [vmem:[%s3861_s10 + $0x198] sm:$0xff] }
  0xd4   : > { %v640_v60 = vrot.slane %v639_v1, 2  ;;  %v646_v16 = vrot.slane %v645_v5, 2  ;;  %v675_v25 = vadd.f32 %v674_v8, %v316_v40  ;;  %v652_v38 = vrot.slane %v651_v29, 2  ;;  %v322_v8 = vld [vmem:[%s3861_s10 + $0x1a0] sm:$0xff] }
  0xd5   : > { %v658_v22 = vrot.slane %v657_v9, 2  ;;  %v664_v31 = vrot.slane %v663_v30, 2  ;;  %v681_v55 = vadd.f32 %v680_v23, %v317_v42  ;;  %v670_v27 = vrot.slane %v669_v36, 2 }
  0xd6   : > { %v641_v56 = vadd.f32 %v640_v60, %v639_v1  ;;  %v647_v19 = vadd.f32 %v646_v16, %v645_v5  ;;  %v676_v28 = vrot.slane %v675_v25, 2  ;;  %v653_v32 = vadd.f32 %v652_v38, %v651_v29  ;;  %v320_v5 = vld [vmem:[%s3861_s10 + $0x190] sm:$0xff]  ;;  %v323_v16 = vld [vmem:[%s3861_s10 + $0x1a8] sm:$0xff] }
  0xd7   : > { %v659_v26 = vadd.f32 %v658_v22, %v657_v9  ;;  %v665_v33 = vadd.f32 %v664_v31, %v663_v30  ;;  %v682_v34 = vrot.slane %v681_v55, 2  ;;  %v671_v40 = vadd.f32 %v670_v27, %v669_v36  ;;  %v324_v36 = vld [vmem:[%s3861_s10 + $0x1b0] sm:$0xff] }
  0xd8   : > { %v642_v13 = vrot.slane %v641_v56, 1  ;;  %v648_v39 = vrot.slane %v647_v19, 1  ;;  %v677_v20 = vadd.f32 %v676_v28, %v675_v25  ;;  %v654_v23 = vrot.slane %v653_v32, 1  ;;  %v325_v28 = vld [vmem:[%s3861_s10 + $0x1b8] sm:$0xff] }
  0xd9   : > { %v660_v60 = vrot.slane %v659_v26, 1  ;;  %v666_v1 = vrot.slane %v665_v33, 1  ;;  %v683_v42 = vadd.f32 %v682_v34, %v681_v55  ;;  %v672_v9 = vrot.slane %v671_v40, 1 }
  0xda   : > { %v4010_v29 = vadd.f32 %v642_v13, %v641_v56  ;;  %v4012_v22 = vadd.f32 %v648_v39, %v647_v19  ;;  %v678_v30 = vrot.slane %v677_v20, 1  ;;  %v4016_v38 = vadd.f32 %v654_v23, %v653_v32 }
  0xdb   : > { %v4018_v25 = vadd.f32 %v660_v60, %v659_v26  ;;  %v4020_v31 = vadd.f32 %v666_v1, %v665_v33  ;;  %v684_v27 = vrot.slane %v683_v42, 1  ;;  %v4023_v55 = vadd.f32 %v672_v9, %v671_v40 }
  0xdc   : > { %4655 = vst [vmem:[#allocation44_spill] sm:$0xff] %v4010_v29  ;;  %4656 = vst [vmem:[#allocation45_spill] sm:$0xff] %v4012_v22  ;;  %v4025_v34 = vadd.f32 %v678_v30, %v677_v20  ;;  %v686_v56 = vrot.slane %v318_v24, 4  ;;  %v692_v13 = vrot.slane %v319_v15, 4  ;;  %v698_v39 = vrot.slane %v320_v5, 4 }
  0xdd   : > { %4657 = vst [vmem:[#allocation46_spill] sm:$0xff] %v4016_v38  ;;  %4658 = vst [vmem:[#allocation47_spill] sm:$0xff] %v4018_v25  ;;  %v4027_v19 = vadd.f32 %v684_v27, %v683_v42  ;;  %v704_v53 = vrot.slane %v321_v21, 4  ;;  %v710_v22 = vrot.slane %v322_v8, 4  ;;  %v716_v23 = vrot.slane %v323_v16, 4 }
  0xde   : > { %4659 = vst [vmem:[#allocation48_spill] sm:$0xff] %v4020_v31  ;;  %4660 = vst [vmem:[#allocation49_spill] sm:$0xff] %v4023_v55  ;;  %v687_v18 = vadd.f32 %v686_v56, %v318_v24  ;;  %v693_v32 = vadd.f32 %v692_v13, %v319_v15  ;;  %v722_v26 = vrot.slane %v324_v36, 4  ;;  %v699_v60 = vadd.f32 %v698_v39, %v320_v5  ;;  %v326_v13 = vld [vmem:[%s3861_s10 + $0x1c0] sm:$0xff]  ;;  %v327_v39 = vld [vmem:[%s3861_s10 + $0x1c8] sm:$0xff] }
  0xdf   : > { %4661 = vst [vmem:[#allocation50_spill] sm:$0xff] %v4025_v34  ;;  %4662 = vst [vmem:[#allocation51_spill] sm:$0xff] %v4027_v19  ;;  %v705_v33 = vadd.f32 %v704_v53, %v321_v21  ;;  %v711_v1 = vadd.f32 %v710_v22, %v322_v8  ;;  %v728_v31 = vrot.slane %v325_v28, 4  ;;  %v717_v9 = vadd.f32 %v716_v23, %v323_v16  ;;  %v329_v23 = vld [vmem:[%s3861_s10 + $0x1d8] sm:$0xff] }
  0xe0   : > { %v688_v25 = vrot.slane %v687_v18, 2  ;;  %v694_v40 = vrot.slane %v693_v32, 2  ;;  %v723_v20 = vadd.f32 %v722_v26, %v324_v36  ;;  %v700_v30 = vrot.slane %v699_v60, 2  ;;  %v330_v26 = vld [vmem:[%s3861_s10 + $0x1e0] sm:$0xff] }
  0xe1   : > { %v706_v34 = vrot.slane %v705_v33, 2  ;;  %v712_v42 = vrot.slane %v711_v1, 2  ;;  %v729_v27 = vadd.f32 %v728_v31, %v325_v28  ;;  %v718_v24 = vrot.slane %v717_v9, 2 }
  0xe2   : > { %v689_v19 = vadd.f32 %v688_v25, %v687_v18  ;;  %v695_v55 = vadd.f32 %v694_v40, %v693_v32  ;;  %v724_v15 = vrot.slane %v723_v20, 2  ;;  %v701_v5 = vadd.f32 %v700_v30, %v699_v60  ;;  %v328_v32 = vld [vmem:[%s3861_s10 + $0x1d0] sm:$0xff]  ;;  %v331_v40 = vld [vmem:[%s3861_s10 + $0x1e8] sm:$0xff] }
  0xe3   : > { %v707_v53 = vadd.f32 %v706_v34, %v705_v33  ;;  %v713_v21 = vadd.f32 %v712_v42, %v711_v1  ;;  %v730_v8 = vrot.slane %v729_v27, 2  ;;  %v719_v36 = vadd.f32 %v718_v24, %v717_v9  ;;  %v332_v9 = vld [vmem:[%s3861_s10 + $0x1f0] sm:$0xff] }
  0xe4   : > { %v690_v22 = vrot.slane %v689_v19, 1  ;;  %v696_v16 = vrot.slane %v695_v55, 1  ;;  %v725_v56 = vadd.f32 %v724_v15, %v723_v20  ;;  %v702_v31 = vrot.slane %v701_v5, 1  ;;  %v333_v15 = vld [vmem:[%s3861_s10 + $0x1f8] sm:$0xff] }
  0xe5   : > { %v708_v18 = vrot.slane %v707_v53, 1  ;;  %v714_v25 = vrot.slane %v713_v21, 1  ;;  %v731_v28 = vadd.f32 %v730_v8, %v729_v27  ;;  %v720_v33 = vrot.slane %v719_v36, 1 }
  0xe6   : > { %v4034_v60 = vadd.f32 %v690_v22, %v689_v19  ;;  %v4036_v34 = vadd.f32 %v696_v16, %v695_v55  ;;  %v726_v1 = vrot.slane %v725_v56, 1  ;;  %v4040_v30 = vadd.f32 %v702_v31, %v701_v5 }
  0xe7   : > { %v4042_v20 = vadd.f32 %v708_v18, %v707_v53  ;;  %v4044_v42 = vadd.f32 %v714_v25, %v713_v21  ;;  %v732_v24 = vrot.slane %v731_v28, 1  ;;  %v4047_v27 = vadd.f32 %v720_v33, %v719_v36 }
  0xe8   : > { %v4049_v8 = vadd.f32 %v726_v1, %v725_v56  ;;  %v734_v19 = vrot.slane %v326_v13, 4  ;;  %v740_v22 = vrot.slane %v327_v39, 4  ;;  %v746_v16 = vrot.slane %v328_v32, 4 }
  0xe9   : > { %4663 = vst [vmem:[#allocation52_spill] sm:$0xff] %v4044_v42  ;;  %4664 = vst [vmem:[#allocation53_spill] sm:$0xff] %v4047_v27  ;;  %v4051_v55 = vadd.f32 %v732_v24, %v731_v28  ;;  %v752_v38 = vrot.slane %v329_v23, 4  ;;  %v758_v50 = vrot.slane %v330_v26, 4  ;;  %v764_v31 = vrot.slane %v331_v40, 4 }
  0xea   : > { %4665 = vst [vmem:[#allocation54_spill] sm:$0xff] %v4049_v8  ;;  %v735_v17 = vadd.f32 %v734_v19, %v326_v13  ;;  %v741_v5 = vadd.f32 %v740_v22, %v327_v39  ;;  %v770_v53 = vrot.slane %v332_v9, 4  ;;  %v747_v18 = vadd.f32 %v746_v16, %v328_v32  ;;  %v334_v22 = vld [vmem:[%s3861_s10 + $0x200] sm:$0xff]  ;;  %v335_v16 = vld [vmem:[%s3861_s10 + $0x208] sm:$0xff] }
  0xeb   : > { %4666 = vst [vmem:[#allocation55_spill] sm:$0xff] %v4051_v55  ;;  %v753_v21 = vadd.f32 %v752_v38, %v329_v23  ;;  %v759_v25 = vadd.f32 %v758_v50, %v330_v26  ;;  %v776_v49 = vrot.slane %v333_v15, 4  ;;  %v765_v33 = vadd.f32 %v764_v31, %v331_v40  ;;  %v337_v31 = vld [vmem:[%s3861_s10 + $0x218] sm:$0xff] }
  0xec   : > { %v736_v12 = vrot.slane %v735_v17, 2  ;;  %v742_v36 = vrot.slane %v741_v5, 2  ;;  %v771_v56 = vadd.f32 %v770_v53, %v332_v9  ;;  %v748_v1 = vrot.slane %v747_v18, 2  ;;  %v338_v53 = vld [vmem:[%s3861_s10 + $0x220] sm:$0xff] }
  0xed   : > { %v754_v44 = vrot.slane %v753_v21, 2  ;;  %v760_v28 = vrot.slane %v759_v25, 2  ;;  %v777_v24 = vadd.f32 %v776_v49, %v333_v15  ;;  %v766_v13 = vrot.slane %v765_v33, 2 }
  0xee   : > { %v737_v29 = vadd.f32 %v736_v12, %v735_v17  ;;  %v743_v11 = vadd.f32 %v742_v36, %v741_v5  ;;  %v772_v39 = vrot.slane %v771_v56, 2  ;;  %v749_v32 = vadd.f32 %v748_v1, %v747_v18  ;;  %v336_v5 = vld [vmem:[%s3861_s10 + $0x210] sm:$0xff]  ;;  %v339_v36 = vld [vmem:[%s3861_s10 + $0x228] sm:$0xff] }
  0xef   : > { %v755_v50 = vadd.f32 %v754_v44, %v753_v21  ;;  %v761_v38 = vadd.f32 %v760_v28, %v759_v25  ;;  %v778_v23 = vrot.slane %v777_v24, 2  ;;  %v767_v9 = vadd.f32 %v766_v13, %v765_v33  ;;  %v340_v33 = vld [vmem:[%s3861_s10 + $0x230] sm:$0xff] }
  0xf0   : > { %v738_v26 = vrot.slane %v737_v29, 1  ;;  %v744_v40 = vrot.slane %v743_v11, 1  ;;  %v773_v19 = vadd.f32 %v772_v39, %v771_v56  ;;  %v750_v49 = vrot.slane %v749_v32, 1  ;;  %v341_v39 = vld [vmem:[%s3861_s10 + $0x238] sm:$0xff] }
  0xf1   : > { %v756_v12 = vrot.slane %v755_v50, 1  ;;  %v762_v17 = vrot.slane %v761_v38, 1  ;;  %v779_v15 = vadd.f32 %v778_v23, %v777_v24  ;;  %v768_v21 = vrot.slane %v767_v9, 1 }
  0xf2   : > { %v4058_v18 = vadd.f32 %v738_v26, %v737_v29  ;;  %v4060_v44 = vadd.f32 %v744_v40, %v743_v11  ;;  %v774_v25 = vrot.slane %v773_v19, 1  ;;  %v4064_v1 = vadd.f32 %v750_v49, %v749_v32 }
  0xf3   : > { %v4066_v56 = vadd.f32 %v756_v12, %v755_v50  ;;  %v4068_v28 = vadd.f32 %v762_v17, %v761_v38  ;;  %v780_v13 = vrot.slane %v779_v15, 1  ;;  %v4071_v24 = vadd.f32 %v768_v21, %v767_v9 }
  0xf4   : > { %4667 = vst [vmem:[#allocation56_spill] sm:$0xff] %v4058_v18  ;;  %4668 = vst [vmem:[#allocation57_spill] sm:$0xff] %v4060_v44  ;;  %v4073_v23 = vadd.f32 %v774_v25, %v773_v19  ;;  %v782_v29 = vrot.slane %v334_v22, 4  ;;  %v788_v26 = vrot.slane %v335_v16, 4  ;;  %v794_v40 = vrot.slane %v336_v5, 4 }
  0xf5   : > { %4669 = vst [vmem:[#allocation58_spill] sm:$0xff] %v4064_v1  ;;  %4670 = vst [vmem:[#allocation59_spill] sm:$0xff] %v4066_v56  ;;  %v4075_v11 = vadd.f32 %v780_v13, %v779_v15  ;;  %v800_v44 = vrot.slane %v337_v31, 4  ;;  %v806_v18 = vrot.slane %v338_v53, 4  ;;  %v812_v49 = vrot.slane %v339_v36, 4 }
  0xf6   : > { %4671 = vst [vmem:[#allocation60_spill] sm:$0xff] %v4068_v28  ;;  %4672 = vst [vmem:[#allocation61_spill] sm:$0xff] %v4071_v24  ;;  %v783_v43 = vadd.f32 %v782_v29, %v334_v22  ;;  %v789_v32 = vadd.f32 %v788_v26, %v335_v16  ;;  %v818_v50 = vrot.slane %v340_v33, 4  ;;  %v795_v12 = vadd.f32 %v794_v40, %v336_v5  ;;  %v342_v26 = vld [vmem:[%s3861_s10 + $0x240] sm:$0xff]  ;;  %v343_v40 = vld [vmem:[%s3861_s10 + $0x248] sm:$0xff] }
  0xf7   : > { %4673 = vst [vmem:[#allocation62_spill] sm:$0xff] %v4073_v23  ;;  %4674 = vst [vmem:[#allocation63_spill] sm:$0xff] %v4075_v11  ;;  %v801_v38 = vadd.f32 %v800_v44, %v337_v31  ;;  %v807_v17 = vadd.f32 %v806_v18, %v338_v53  ;;  %v824_v28 = vrot.slane %v341_v39, 4  ;;  %v813_v21 = vadd.f32 %v812_v49, %v339_v36  ;;  %v345_v49 = vld [vmem:[%s3861_s10 + $0x258] sm:$0xff] }
  0xf8   : > { %v784_v56 = vrot.slane %v783_v43, 2  ;;  %v790_v9 = vrot.slane %v789_v32, 2  ;;  %v819_v19 = vadd.f32 %v818_v50, %v340_v33  ;;  %v796_v25 = vrot.slane %v795_v12, 2  ;;  %v346_v50 = vld [vmem:[%s3861_s10 + $0x260] sm:$0xff] }
  0xf9   : > { %v802_v23 = vrot.slane %v801_v38, 2  ;;  %v808_v15 = vrot.slane %v807_v17, 2  ;;  %v825_v13 = vadd.f32 %v824_v28, %v341_v39  ;;  %v814_v22 = vrot.slane %v813_v21, 2 }
  0xfa   : > { %v785_v11 = vadd.f32 %v784_v56, %v783_v43  ;;  %v791_v24 = vadd.f32 %v790_v9, %v789_v32  ;;  %v820_v16 = vrot.slane %v819_v19, 2  ;;  %v797_v5 = vadd.f32 %v796_v25, %v795_v12  ;;  %v344_v32 = vld [vmem:[%s3861_s10 + $0x250] sm:$0xff]  ;;  %v347_v9 = vld [vmem:[%s3861_s10 + $0x268] sm:$0xff] }
  0xfb   : > { %v803_v31 = vadd.f32 %v802_v23, %v801_v38  ;;  %v809_v53 = vadd.f32 %v808_v15, %v807_v17  ;;  %v826_v18 = vrot.slane %v825_v13, 2  ;;  %v815_v33 = vadd.f32 %v814_v22, %v813_v21  ;;  %v348_v21 = vld [vmem:[%s3861_s10 + $0x270] sm:$0xff] }
  0xfc   : > { %v786_v44 = vrot.slane %v785_v11, 1  ;;  %v792_v36 = vrot.slane %v791_v24, 1  ;;  %v821_v29 = vadd.f32 %v820_v16, %v819_v19  ;;  %v798_v28 = vrot.slane %v797_v5, 1  ;;  %v349_v16 = vld [vmem:[%s3861_s10 + $0x278] sm:$0xff] }
  0xfd   : > { %v804_v43 = vrot.slane %v803_v31, 1  ;;  %v810_v56 = vrot.slane %v809_v53, 1  ;;  %v827_v39 = vadd.f32 %v826_v18, %v825_v13  ;;  %v816_v38 = vrot.slane %v815_v33, 1 }
  0xfe   : > { %v4082_v12 = vadd.f32 %v786_v44, %v785_v11  ;;  %v4084_v23 = vadd.f32 %v792_v36, %v791_v24  ;;  %v822_v17 = vrot.slane %v821_v29, 1  ;;  %v4088_v25 = vadd.f32 %v798_v28, %v797_v5 }
  0xff   : > { %v4090_v19 = vadd.f32 %v804_v43, %v803_v31  ;;  %v4092_v15 = vadd.f32 %v810_v56, %v809_v53  ;;  %v828_v22 = vrot.slane %v827_v39, 1  ;;  %v4095_v13 = vadd.f32 %v816_v38, %v815_v33 }
 0x100   : > { %v4097_v18 = vadd.f32 %v822_v17, %v821_v29  ;;  %v830_v11 = vrot.slane %v342_v26, 4  ;;  %v836_v44 = vrot.slane %v343_v40, 4  ;;  %v842_v36 = vrot.slane %v344_v32, 4 }
 0x101   : > { %4675 = vst [vmem:[#allocation64_spill] sm:$0xff] %v4092_v15  ;;  %4676 = vst [vmem:[#allocation65_spill] sm:$0xff] %v4095_v13  ;;  %v4099_v24 = vadd.f32 %v828_v22, %v827_v39  ;;  %v848_v1 = vrot.slane %v345_v49, 4  ;;  %v854_v55 = vrot.slane %v346_v50, 4  ;;  %v860_v28 = vrot.slane %v347_v9, 4 }
 0x102   : > { %4677 = vst [vmem:[#allocation66_spill] sm:$0xff] %v4097_v18  ;;  %v831_v8 = vadd.f32 %v830_v11, %v342_v26  ;;  %v837_v5 = vadd.f32 %v836_v44, %v343_v40  ;;  %v866_v31 = vrot.slane %v348_v21, 4  ;;  %v843_v43 = vadd.f32 %v842_v36, %v344_v32  ;;  %v350_v44 = vld [vmem:[%s3861_s10 + $0x280] sm:$0xff]  ;;  %v351_v36 = vld [vmem:[%s3861_s10 + $0x288] sm:$0xff] }
 0x103   : > { %4678 = vst [vmem:[#allocation67_spill] sm:$0xff] %v4099_v24  ;;  %v849_v53 = vadd.f32 %v848_v1, %v345_v49  ;;  %v855_v56 = vadd.f32 %v854_v55, %v346_v50  ;;  %v872_v27 = vrot.slane %v349_v16, 4  ;;  %v861_v38 = vadd.f32 %v860_v28, %v347_v9  ;;  %v353_v28 = vld [vmem:[%s3861_s10 + $0x298] sm:$0xff] }
 0x104   : > { %v832_v14 = vrot.slane %v831_v8, 2  ;;  %v838_v33 = vrot.slane %v837_v5, 2  ;;  %v867_v29 = vadd.f32 %v866_v31, %v348_v21  ;;  %v844_v17 = vrot.slane %v843_v43, 2  ;;  %v354_v31 = vld [vmem:[%s3861_s10 + $0x2a0] sm:$0xff] }
 0x105   : > { %v850_v18 = vrot.slane %v849_v53, 2  ;;  %v856_v39 = vrot.slane %v855_v56, 2  ;;  %v873_v22 = vadd.f32 %v872_v27, %v349_v16  ;;  %v862_v26 = vrot.slane %v861_v38, 2 }
 0x106   : > { %v833_v24 = vadd.f32 %v832_v14, %v831_v8  ;;  %v839_v13 = vadd.f32 %v838_v33, %v837_v5  ;;  %v868_v40 = vrot.slane %v867_v29, 2  ;;  %v845_v32 = vadd.f32 %v844_v17, %v843_v43  ;;  %v352_v5 = vld [vmem:[%s3861_s10 + $0x290] sm:$0xff]  ;;  %v355_v33 = vld [vmem:[%s3861_s10 + $0x2a8] sm:$0xff] }
 0x107   : > { %v851_v55 = vadd.f32 %v850_v18, %v849_v53  ;;  %v857_v1 = vadd.f32 %v856_v39, %v855_v56  ;;  %v874_v49 = vrot.slane %v873_v22, 2  ;;  %v863_v21 = vadd.f32 %v862_v26, %v861_v38  ;;  %v356_v38 = vld [vmem:[%s3861_s10 + $0x2b0] sm:$0xff] }
 0x108   : > { %v834_v50 = vrot.slane %v833_v24, 1  ;;  %v840_v9 = vrot.slane %v839_v13, 1  ;;  %v869_v11 = vadd.f32 %v868_v40, %v867_v29  ;;  %v846_v27 = vrot.slane %v845_v32, 1  ;;  %v357_v40 = vld [vmem:[%s3861_s10 + $0x2b8] sm:$0xff] }
 0x109   : > { %v852_v14 = vrot.slane %v851_v55, 1  ;;  %v858_v8 = vrot.slane %v857_v1, 1  ;;  %v875_v16 = vadd.f32 %v874_v49, %v873_v22  ;;  %v864_v53 = vrot.slane %v863_v21, 1 }
 0x10a   : > { %v4106_v43 = vadd.f32 %v834_v50, %v833_v24  ;;  %v4108_v18 = vadd.f32 %v840_v9, %v839_v13  ;;  %v870_v56 = vrot.slane %v869_v11, 1  ;;  %v4112_v17 = vadd.f32 %v846_v27, %v845_v32 }
 0x10b   : > { %v4114_v29 = vadd.f32 %v852_v14, %v851_v55  ;;  %v4116_v39 = vadd.f32 %v858_v8, %v857_v1  ;;  %v876_v26 = vrot.slane %v875_v16, 1  ;;  %v4119_v22 = vadd.f32 %v864_v53, %v863_v21 }
 0x10c   : > { %4679 = vst [vmem:[#allocation68_spill] sm:$0xff] %v4106_v43  ;;  %4680 = vst [vmem:[#allocation69_spill] sm:$0xff] %v4108_v18  ;;  %v4121_v49 = vadd.f32 %v870_v56, %v869_v11  ;;  %v878_v24 = vrot.slane %v350_v44, 4  ;;  %v884_v50 = vrot.slane %v351_v36, 4  ;;  %v890_v9 = vrot.slane %v352_v5, 4 }
 0x10d   : > { %4681 = vst [vmem:[#allocation70_spill] sm:$0xff] %v4112_v17  ;;  %4682 = vst [vmem:[#allocation71_spill] sm:$0xff] %v4114_v29  ;;  %v4123_v13 = vadd.f32 %v876_v26, %v875_v16  ;;  %v896_v18 = vrot.slane %v353_v28, 4  ;;  %v902_v43 = vrot.slane %v354_v31, 4  ;;  %v908_v27 = vrot.slane %v355_v33, 4 }
 0x10e   : > { %4683 = vst [vmem:[#allocation72_spill] sm:$0xff] %v4116_v39  ;;  %4684 = vst [vmem:[#allocation73_spill] sm:$0xff] %v4119_v22  ;;  %v879_v47 = vadd.f32 %v878_v24, %v350_v44  ;;  %v885_v32 = vadd.f32 %v884_v50, %v351_v36  ;;  %v914_v55 = vrot.slane %v356_v38, 4  ;;  %v891_v14 = vadd.f32 %v890_v9, %v352_v5  ;;  %v358_v50 = vld [vmem:[%s3861_s10 + $0x2c0] sm:$0xff]  ;;  %v359_v9 = vld [vmem:[%s3861_s10 + $0x2c8] sm:$0xff] }
 0x10f   : > { %4685 = vst [vmem:[#allocation74_spill] sm:$0xff] %v4121_v49  ;;  %4686 = vst [vmem:[#allocation75_spill] sm:$0xff] %v4123_v13  ;;  %v897_v1 = vadd.f32 %v896_v18, %v353_v28  ;;  %v903_v8 = vadd.f32 %v902_v43, %v354_v31  ;;  %v920_v39 = vrot.slane %v357_v40, 4  ;;  %v909_v53 = vadd.f32 %v908_v27, %v355_v33  ;;  %v361_v27 = vld [vmem:[%s3861_s10 + $0x2d8] sm:$0xff] }
 0x110   : > { %v880_v29 = vrot.slane %v879_v47, 2  ;;  %v886_v21 = vrot.slane %v885_v32, 2  ;;  %v915_v11 = vadd.f32 %v914_v55, %v356_v38  ;;  %v892_v56 = vrot.slane %v891_v14, 2  ;;  %v362_v55 = vld [vmem:[%s3861_s10 + $0x2e0] sm:$0xff] }
 0x111   : > { %v898_v49 = vrot.slane %v897_v1, 2  ;;  %v904_v16 = vrot.slane %v903_v8, 2  ;;  %v921_v26 = vadd.f32 %v920_v39, %v357_v40  ;;  %v910_v44 = vrot.slane %v909_v53, 2 }
 0x112   : > { %v881_v13 = vadd.f32 %v880_v29, %v879_v47  ;;  %v887_v22 = vadd.f32 %v886_v21, %v885_v32  ;;  %v916_v36 = vrot.slane %v915_v11, 2  ;;  %v893_v5 = vadd.f32 %v892_v56, %v891_v14  ;;  %v360_v32 = vld [vmem:[%s3861_s10 + $0x2d0] sm:$0xff]  ;;  %v363_v21 = vld [vmem:[%s3861_s10 + $0x2e8] sm:$0xff] }
 0x113   : > { %v899_v28 = vadd.f32 %v898_v49, %v897_v1  ;;  %v905_v31 = vadd.f32 %v904_v16, %v903_v8  ;;  %v922_v43 = vrot.slane %v921_v26, 2  ;;  %v911_v38 = vadd.f32 %v910_v44, %v909_v53  ;;  %v364_v53 = vld [vmem:[%s3861_s10 + $0x2f0] sm:$0xff] }
 0x114   : > { %v882_v18 = vrot.slane %v881_v13, 1  ;;  %v888_v33 = vrot.slane %v887_v22, 1  ;;  %v917_v24 = vadd.f32 %v916_v36, %v915_v11  ;;  %v894_v39 = vrot.slane %v893_v5, 1  ;;  %v365_v36 = vld [vmem:[%s3861_s10 + $0x2f8] sm:$0xff] }
 0x115   : > { %v900_v47 = vrot.slane %v899_v28, 1  ;;  %v906_v29 = vrot.slane %v905_v31, 1  ;;  %v923_v40 = vadd.f32 %v922_v43, %v921_v26  ;;  %v912_v1 = vrot.slane %v911_v38, 1 }
 0x116   : > { %v4130_v14 = vadd.f32 %v882_v18, %v881_v13  ;;  %v4132_v49 = vadd.f32 %v888_v33, %v887_v22  ;;  %v918_v8 = vrot.slane %v917_v24, 1  ;;  %v4136_v56 = vadd.f32 %v894_v39, %v893_v5 }
 0x117   : > { %v4138_v11 = vadd.f32 %v900_v47, %v899_v28  ;;  %v4140_v16 = vadd.f32 %v906_v29, %v905_v31  ;;  %v924_v44 = vrot.slane %v923_v40, 1  ;;  %v4143_v26 = vadd.f32 %v912_v1, %v911_v38 }
 0x118   : > { %v4145_v43 = vadd.f32 %v918_v8, %v917_v24  ;;  %v926_v13 = vrot.slane %v358_v50, 4  ;;  %v932_v18 = vrot.slane %v359_v9, 4  ;;  %v938_v33 = vrot.slane %v360_v32, 4 }
 0x119   : > { %4687 = vst [vmem:[#allocation76_spill] sm:$0xff] %v4140_v16  ;;  %4688 = vst [vmem:[#allocation77_spill] sm:$0xff] %v4143_v26  ;;  %v4147_v22 = vadd.f32 %v924_v44, %v923_v40  ;;  %v944_v17 = vrot.slane %v361_v27, 4  ;;  %v950_v4 = vrot.slane %v362_v55, 4  ;;  %v956_v39 = vrot.slane %v363_v21, 4 }
 0x11a   : > { %4689 = vst [vmem:[#allocation78_spill] sm:$0xff] %v4145_v43  ;;  %v927_v15 = vadd.f32 %v926_v13, %v358_v50  ;;  %v933_v5 = vadd.f32 %v932_v18, %v359_v9  ;;  %v962_v28 = vrot.slane %v364_v53, 4  ;;  %v939_v47 = vadd.f32 %v938_v33, %v360_v32  ;;  %v366_v18 = vld [vmem:[%s3861_s10 + $0x300] sm:$0xff]  ;;  %v367_v33 = vld [vmem:[%s3861_s10 + $0x308] sm:$0xff] }
 0x11b   : > { %4690 = vst [vmem:[#allocation79_spill] sm:$0xff] %v4147_v22  ;;  %v945_v31 = vadd.f32 %v944_v17, %v361_v27  ;;  %v951_v29 = vadd.f32 %v950_v4, %v362_v55  ;;  %v968_v16 = vrot.slane %v365_v36, 4  ;;  %v957_v1 = vadd.f32 %v956_v39, %v363_v21  ;;  %v369_v39 = vld [vmem:[%s3861_s10 + $0x318] sm:$0xff] }
 0x11c   : > { %v928_v10 = vrot.slane %v927_v15, 2  ;;  %v934_v38 = vrot.slane %v933_v5, 2  ;;  %v963_v24 = vadd.f32 %v962_v28, %v364_v53  ;;  %v940_v8 = vrot.slane %v939_v47, 2  ;;  %v370_v28 = vld [vmem:[%s3861_s10 + $0x320] sm:$0xff] }
 0x11d   : > { %v946_v43 = vrot.slane %v945_v31, 2  ;;  %v952_v40 = vrot.slane %v951_v29, 2  ;;  %v969_v44 = vadd.f32 %v968_v16, %v365_v36  ;;  %v958_v50 = vrot.slane %v957_v1, 2 }
 0x11e   : > { %v929_v22 = vadd.f32 %v928_v10, %v927_v15  ;;  %v935_v26 = vadd.f32 %v934_v38, %v933_v5  ;;  %v964_v9 = vrot.slane %v963_v24, 2  ;;  %v941_v32 = vadd.f32 %v940_v8, %v939_v47  ;;  %v368_v5 = vld [vmem:[%s3861_s10 + $0x310] sm:$0xff]  ;;  %v371_v38 = vld [vmem:[%s3861_s10 + $0x328] sm:$0xff] }
 0x11f   : > { %v947_v4 = vadd.f32 %v946_v43, %v945_v31  ;;  %v953_v17 = vadd.f32 %v952_v40, %v951_v29  ;;  %v970_v27 = vrot.slane %v969_v44, 2  ;;  %v959_v53 = vadd.f32 %v958_v50, %v957_v1  ;;  %v372_v1 = vld [vmem:[%s3861_s10 + $0x330] sm:$0xff] }
 0x120   : > { %v930_v55 = vrot.slane %v929_v22, 1  ;;  %v936_v21 = vrot.slane %v935_v26, 1  ;;  %v965_v13 = vadd.f32 %v964_v9, %v963_v24  ;;  %v942_v16 = vrot.slane %v941_v32, 1  ;;  %v373_v9 = vld [vmem:[%s3861_s10 + $0x338] sm:$0xff] }
 0x121   : > { %v948_v10 = vrot.slane %v947_v4, 1  ;;  %v954_v15 = vrot.slane %v953_v17, 1  ;;  %v971_v36 = vadd.f32 %v970_v27, %v969_v44  ;;  %v960_v31 = vrot.slane %v959_v53, 1 }
 0x122   : > { %v4154_v47 = vadd.f32 %v930_v55, %v929_v22  ;;  %v4156_v43 = vadd.f32 %v936_v21, %v935_v26  ;;  %v966_v29 = vrot.slane %v965_v13, 1  ;;  %v4160_v8 = vadd.f32 %v942_v16, %v941_v32 }
 0x123   : > { %v4162_v24 = vadd.f32 %v948_v10, %v947_v4  ;;  %v4164_v40 = vadd.f32 %v954_v15, %v953_v17  ;;  %v972_v50 = vrot.slane %v971_v36, 1  ;;  %v4167_v44 = vadd.f32 %v960_v31, %v959_v53 }
 0x124   : > { %4691 = vst [vmem:[#allocation80_spill] sm:$0xff] %v4154_v47  ;;  %4692 = vst [vmem:[#allocation81_spill] sm:$0xff] %v4156_v43  ;;  %v4169_v27 = vadd.f32 %v966_v29, %v965_v13  ;;  %v974_v22 = vrot.slane %v366_v18, 4  ;;  %v980_v55 = vrot.slane %v367_v33, 4  ;;  %v986_v21 = vrot.slane %v368_v5, 4 }
 0x125   : > { %4693 = vst [vmem:[#allocation82_spill] sm:$0xff] %v4160_v8  ;;  %4694 = vst [vmem:[#allocation83_spill] sm:$0xff] %v4162_v24  ;;  %v4171_v26 = vadd.f32 %v972_v50, %v971_v36  ;;  %v992_v43 = vrot.slane %v369_v39, 4  ;;  %v998_v47 = vrot.slane %v370_v28, 4  ;;  %v1004_v16 = vrot.slane %v371_v38, 4 }
 0x126   : > { %4695 = vst [vmem:[#allocation84_spill] sm:$0xff] %v4164_v40  ;;  %4696 = vst [vmem:[#allocation85_spill] sm:$0xff] %v4167_v44  ;;  %v975_v2 = vadd.f32 %v974_v22, %v366_v18  ;;  %v981_v32 = vadd.f32 %v980_v55, %v367_v33  ;;  %v1010_v4 = vrot.slane %v372_v1, 4  ;;  %v987_v10 = vadd.f32 %v986_v21, %v368_v5  ;;  %v374_v55 = vld [vmem:[%s3861_s10 + $0x340] sm:$0xff]  ;;  %v375_v21 = vld [vmem:[%s3861_s10 + $0x348] sm:$0xff] }
 0x127   : > { %4697 = vst [vmem:[#allocation86_spill] sm:$0xff] %v4169_v27  ;;  %4698 = vst [vmem:[#allocation87_spill] sm:$0xff] %v4171_v26  ;;  %v993_v17 = vadd.f32 %v992_v43, %v369_v39  ;;  %v999_v15 = vadd.f32 %v998_v47, %v370_v28  ;;  %v1016_v40 = vrot.slane %v373_v9, 4  ;;  %v1005_v31 = vadd.f32 %v1004_v16, %v371_v38  ;;  %v377_v16 = vld [vmem:[%s3861_s10 + $0x358] sm:$0xff] }
 0x128   : > { %v976_v24 = vrot.slane %v975_v2, 2  ;;  %v982_v53 = vrot.slane %v981_v32, 2  ;;  %v1011_v13 = vadd.f32 %v1010_v4, %v372_v1  ;;  %v988_v29 = vrot.slane %v987_v10, 2  ;;  %v378_v4 = vld [vmem:[%s3861_s10 + $0x360] sm:$0xff] }
 0x129   : > { %v994_v27 = vrot.slane %v993_v17, 2  ;;  %v1000_v36 = vrot.slane %v999_v15, 2  ;;  %v1017_v50 = vadd.f32 %v1016_v40, %v373_v9  ;;  %v1006_v18 = vrot.slane %v1005_v31, 2 }
 0x12a   : > { %v977_v26 = vadd.f32 %v976_v24, %v975_v2  ;;  %v983_v44 = vadd.f32 %v982_v53, %v981_v32  ;;  %v1012_v33 = vrot.slane %v1011_v13, 2  ;;  %v989_v5 = vadd.f32 %v988_v29, %v987_v10  ;;  %v376_v32 = vld [vmem:[%s3861_s10 + $0x350] sm:$0xff]  ;;  %v379_v53 = vld [vmem:[%s3861_s10 + $0x368] sm:$0xff] }
 0x12b   : > { %v995_v39 = vadd.f32 %v994_v27, %v993_v17  ;;  %v1001_v28 = vadd.f32 %v1000_v36, %v999_v15  ;;  %v1018_v47 = vrot.slane %v1017_v50, 2  ;;  %v1007_v1 = vadd.f32 %v1006_v18, %v1005_v31  ;;  %v380_v31 = vld [vmem:[%s3861_s10 + $0x370] sm:$0xff] }
 0x12c   : > { %v978_v43 = vrot.slane %v977_v26, 1  ;;  %v984_v38 = vrot.slane %v983_v44, 1  ;;  %v1013_v22 = vadd.f32 %v1012_v33, %v1011_v13  ;;  %v990_v40 = vrot.slane %v989_v5, 1  ;;  %v381_v33 = vld [vmem:[%s3861_s10 + $0x378] sm:$0xff] }
 0x12d   : > { %v996_v2 = vrot.slane %v995_v39, 1  ;;  %v1002_v24 = vrot.slane %v1001_v28, 1  ;;  %v1019_v9 = vadd.f32 %v1018_v47, %v1017_v50  ;;  %v1008_v17 = vrot.slane %v1007_v1, 1 }
 0x12e   : > { %v4178_v10 = vadd.f32 %v978_v43, %v977_v26  ;;  %v4180_v27 = vadd.f32 %v984_v38, %v983_v44  ;;  %v1014_v15 = vrot.slane %v1013_v22, 1  ;;  %v4184_v29 = vadd.f32 %v990_v40, %v989_v5 }
 0x12f   : > { %v4186_v13 = vadd.f32 %v996_v2, %v995_v39  ;;  %v4188_v36 = vadd.f32 %v1002_v24, %v1001_v28  ;;  %v1020_v18 = vrot.slane %v1019_v9, 1  ;;  %v4191_v50 = vadd.f32 %v1008_v17, %v1007_v1 }
 0x130   : > { %v4193_v47 = vadd.f32 %v1014_v15, %v1013_v22  ;;  %v1022_v26 = vrot.slane %v374_v55, 4  ;;  %v1028_v43 = vrot.slane %v375_v21, 4  ;;  %v1034_v38 = vrot.slane %v376_v32, 4 }
 0x131   : > { %4699 = vst [vmem:[#allocation88_spill] sm:$0xff] %v4188_v36  ;;  %4700 = vst [vmem:[#allocation89_spill] sm:$0xff] %v4191_v50  ;;  %v4195_v44 = vadd.f32 %v1020_v18, %v1019_v9  ;;  %v1040_v8 = vrot.slane %v377_v16, 4  ;;  %v1046_v7 = vrot.slane %v378_v4, 4  ;;  %v1052_v40 = vrot.slane %v379_v53, 4 }
 0x132   : > { %4701 = vst [vmem:[#allocation90_spill] sm:$0xff] %v4193_v47  ;;  %v1023_v63 = vadd.f32 %v1022_v26, %v374_v55  ;;  %v1029_v5 = vadd.f32 %v1028_v43, %v375_v21  ;;  %v1058_v39 = vrot.slane %v380_v31, 4  ;;  %v1035_v2 = vadd.f32 %v1034_v38, %v376_v32  ;;  %v382_v43 = vld [vmem:[%s3861_s10 + $0x380] sm:$0xff]  ;;  %v383_v38 = vld [vmem:[%s3861_s10 + $0x388] sm:$0xff] }
 0x133   : > { %4702 = vst [vmem:[#allocation91_spill] sm:$0xff] %v4195_v44  ;;  %v1041_v28 = vadd.f32 %v1040_v8, %v377_v16  ;;  %v1047_v24 = vadd.f32 %v1046_v7, %v378_v4  ;;  %v1064_v36 = vrot.slane %v381_v33, 4  ;;  %v1053_v17 = vadd.f32 %v1052_v40, %v379_v53  ;;  %v385_v40 = vld [vmem:[%s3861_s10 + $0x398] sm:$0xff] }
 0x134   : > { %v1024_v6 = vrot.slane %v1023_v63, 2  ;;  %v1030_v1 = vrot.slane %v1029_v5, 2  ;;  %v1059_v22 = vadd.f32 %v1058_v39, %v380_v31  ;;  %v1036_v15 = vrot.slane %v1035_v2, 2  ;;  %v386_v39 = vld [vmem:[%s3861_s10 + $0x3a0] sm:$0xff] }
 0x135   : > { %v1042_v47 = vrot.slane %v1041_v28, 2  ;;  %v1048_v9 = vrot.slane %v1047_v24, 2  ;;  %v1065_v18 = vadd.f32 %v1064_v36, %v381_v33  ;;  %v1054_v55 = vrot.slane %v1053_v17, 2 }
 0x136   : > { %v1025_v44 = vadd.f32 %v1024_v6, %v1023_v63  ;;  %v1031_v50 = vadd.f32 %v1030_v1, %v1029_v5  ;;  %v1060_v21 = vrot.slane %v1059_v22, 2  ;;  %v1037_v32 = vadd.f32 %v1036_v15, %v1035_v2  ;;  %v384_v5 = vld [vmem:[%s3861_s10 + $0x390] sm:$0xff]  ;;  %v387_v1 = vld [vmem:[%s3861_s10 + $0x3a8] sm:$0xff] }
 0x137   : > { %v1043_v7 = vadd.f32 %v1042_v47, %v1041_v28  ;;  %v1049_v8 = vadd.f32 %v1048_v9, %v1047_v24  ;;  %v1066_v16 = vrot.slane %v1065_v18, 2  ;;  %v1055_v31 = vadd.f32 %v1054_v55, %v1053_v17  ;;  %v388_v17 = vld [vmem:[%s3861_s10 + $0x3b0] sm:$0xff] }
 0x138   : > { %v1026_v4 = vrot.slane %v1025_v44, 1  ;;  %v1032_v53 = vrot.slane %v1031_v50, 1  ;;  %v1061_v26 = vadd.f32 %v1060_v21, %v1059_v22  ;;  %v1038_v36 = vrot.slane %v1037_v32, 1  ;;  %v389_v21 = vld [vmem:[%s3861_s10 + $0x3b8] sm:$0xff] }
 0x139   : > { %v1044_v63 = vrot.slane %v1043_v7, 1  ;;  %v1050_v6 = vrot.slane %v1049_v8, 1  ;;  %v1067_v33 = vadd.f32 %v1066_v16, %v1065_v18  ;;  %v1056_v28 = vrot.slane %v1055_v31, 1 }
 0x13a   : > { %v4202_v2 = vadd.f32 %v1026_v4, %v1025_v44  ;;  %v4204_v47 = vadd.f32 %v1032_v53, %v1031_v50  ;;  %v1062_v24 = vrot.slane %v1061_v26, 1  ;;  %v4208_v15 = vadd.f32 %v1038_v36, %v1037_v32 }
 0x13b   : > { %v4210_v22 = vadd.f32 %v1044_v63, %v1043_v7  ;;  %v4212_v9 = vadd.f32 %v1050_v6, %v1049_v8  ;;  %v1068_v55 = vrot.slane %v1067_v33, 1  ;;  %v4215_v18 = vadd.f32 %v1056_v28, %v1055_v31 }
 0x13c   : > { %4703 = vst [vmem:[#allocation92_spill] sm:$0xff] %v4202_v2  ;;  %4704 = vst [vmem:[#allocation93_spill] sm:$0xff] %v4204_v47  ;;  %v4217_v16 = vadd.f32 %v1062_v24, %v1061_v26  ;;  %v1070_v44 = vrot.slane %v382_v43, 4  ;;  %v1076_v4 = vrot.slane %v383_v38, 4  ;;  %v1082_v53 = vrot.slane %v384_v5, 4 }
 0x13d   : > { %4705 = vst [vmem:[#allocation94_spill] sm:$0xff] %v4208_v15  ;;  %4706 = vst [vmem:[#allocation95_spill] sm:$0xff] %v4210_v22  ;;  %v4219_v50 = vadd.f32 %v1068_v55, %v1067_v33  ;;  %v1088_v47 = vrot.slane %v385_v40, 4  ;;  %v1094_v2 = vrot.slane %v386_v39, 4  ;;  %v1100_v36 = vrot.slane %v387_v1, 4 }
 0x13e   : > { %4707 = vst [vmem:[#allocation96_spill] sm:$0xff] %v4212_v9  ;;  %4708 = vst [vmem:[#allocation97_spill] sm:$0xff] %v4215_v18  ;;  %v1071_v62 = vadd.f32 %v1070_v44, %v382_v43  ;;  %v1077_v32 = vadd.f32 %v1076_v4, %v383_v38  ;;  %v1106_v7 = vrot.slane %v388_v17, 4  ;;  %v1083_v63 = vadd.f32 %v1082_v53, %v384_v5  ;;  %v390_v4 = vld [vmem:[%s3861_s10 + $0x3c0] sm:$0xff]  ;;  %v391_v53 = vld [vmem:[%s3861_s10 + $0x3c8] sm:$0xff] }
 0x13f   : > { %4709 = vst [vmem:[#allocation98_spill] sm:$0xff] %v4217_v16  ;;  %4710 = vst [vmem:[#allocation99_spill] sm:$0xff] %v4219_v50  ;;  %v1089_v8 = vadd.f32 %v1088_v47, %v385_v40  ;;  %v1095_v6 = vadd.f32 %v1094_v2, %v386_v39  ;;  %v1112_v9 = vrot.slane %v389_v21, 4  ;;  %v1101_v28 = vadd.f32 %v1100_v36, %v387_v1  ;;  %v393_v36 = vld [vmem:[%s3861_s10 + $0x3d8] sm:$0xff] }
 0x140   : > { %v1072_v22 = vrot.slane %v1071_v62, 2  ;;  %v1078_v31 = vrot.slane %v1077_v32, 2  ;;  %v1107_v26 = vadd.f32 %v1106_v7, %v388_v17  ;;  %v1084_v24 = vrot.slane %v1083_v63, 2  ;;  %v394_v7 = vld [vmem:[%s3861_s10 + $0x3e0] sm:$0xff] }
 0x141   : > { %v1090_v16 = vrot.slane %v1089_v8, 2  ;;  %v1096_v33 = vrot.slane %v1095_v6, 2  ;;  %v1113_v55 = vadd.f32 %v1112_v9, %v389_v21  ;;  %v1102_v43 = vrot.slane %v1101_v28, 2 }
 0x142   : > { %v1073_v50 = vadd.f32 %v1072_v22, %v1071_v62  ;;  %v1079_v18 = vadd.f32 %v1078_v31, %v1077_v32  ;;  %v1108_v38 = vrot.slane %v1107_v26, 2  ;;  %v1085_v5 = vadd.f32 %v1084_v24, %v1083_v63  ;;  %v392_v32 = vld [vmem:[%s3861_s10 + $0x3d0] sm:$0xff]  ;;  %v395_v31 = vld [vmem:[%s3861_s10 + $0x3e8] sm:$0xff] }
 0x143   : > { %v1091_v40 = vadd.f32 %v1090_v16, %v1089_v8  ;;  %v1097_v39 = vadd.f32 %v1096_v33, %v1095_v6  ;;  %v1114_v2 = vrot.slane %v1113_v55, 2  ;;  %v1103_v17 = vadd.f32 %v1102_v43, %v1101_v28  ;;  %v396_v28 = vld [vmem:[%s3861_s10 + $0x3f0] sm:$0xff] }
 0x144   : > { %v1074_v47 = vrot.slane %v1073_v50, 1  ;;  %v1080_v1 = vrot.slane %v1079_v18, 1  ;;  %v1109_v44 = vadd.f32 %v1108_v38, %v1107_v26  ;;  %v1086_v9 = vrot.slane %v1085_v5, 1  ;;  %v397_v38 = vld [vmem:[%s3861_s10 + $0x3f8] sm:$0xff] }
 0x145   : > { %v1092_v62 = vrot.slane %v1091_v40, 1  ;;  %v1098_v22 = vrot.slane %v1097_v39, 1  ;;  %v1115_v21 = vadd.f32 %v1114_v2, %v1113_v55  ;;  %v1104_v8 = vrot.slane %v1103_v17, 1 }
 0x146   : > { %v4226_v63 = vadd.f32 %v1074_v47, %v1073_v50  ;;  %v4228_v16 = vadd.f32 %v1080_v1, %v1079_v18  ;;  %v1110_v6 = vrot.slane %v1109_v44, 1  ;;  %v4232_v24 = vadd.f32 %v1086_v9, %v1085_v5 }
 0x147   : > { %v4234_v26 = vadd.f32 %v1092_v62, %v1091_v40  ;;  %v4236_v33 = vadd.f32 %v1098_v22, %v1097_v39  ;;  %v1116_v43 = vrot.slane %v1115_v21, 1  ;;  %v4239_v55 = vadd.f32 %v1104_v8, %v1103_v17 }
 0x148   : > { %4711 = vst [vmem:[#allocation100_spill] sm:$0xff] %v4228_v16  ;;  %4712 = vst [vmem:[#allocation101_spill] sm:$0xff] %v4232_v24  ;;  %v4241_v2 = vadd.f32 %v1110_v6, %v1109_v44  ;;  %v1118_v50 = vrot.slane %v390_v4, 4  ;;  %v1124_v47 = vrot.slane %v391_v53, 4  ;;  %v1130_v1 = vrot.slane %v392_v32, 4 }
 0x149   : > { %4713 = vst [vmem:[#allocation102_spill] sm:$0xff] %v4234_v26  ;;  %4714 = vst [vmem:[#allocation103_spill] sm:$0xff] %v4236_v33  ;;  %v4243_v18 = vadd.f32 %v1116_v43, %v1115_v21  ;;  %v1136_v15 = vrot.slane %v393_v36, 4  ;;  %v1142_v42 = vrot.slane %v394_v7, 4  ;;  %v1148_v9 = vrot.slane %v395_v31, 4 }
 0x14a   : > { %4715 = vst [vmem:[#allocation104_spill] sm:$0xff] %v4239_v55  ;;  %4716 = vst [vmem:[#allocation105_spill] sm:$0xff] %v4241_v2  ;;  %v1119_v54 = vadd.f32 %v1118_v50, %v390_v4  ;;  %v1125_v5 = vadd.f32 %v1124_v47, %v391_v53  ;;  %v1154_v40 = vrot.slane %v396_v28, 4  ;;  %v1131_v62 = vadd.f32 %v1130_v1, %v392_v32 }
 0x14b   : > { %4717 = vst [vmem:[#allocation106_spill] sm:$0xff] %v4243_v18  ;;  %v1137_v39 = vadd.f32 %v1136_v15, %v393_v36  ;;  %v1143_v22 = vadd.f32 %v1142_v42, %v394_v7  ;;  %v1160_v33 = vrot.slane %v397_v38, 4  ;;  %v1149_v8 = vadd.f32 %v1148_v9, %v395_v31 }
 0x14c   : > { %v1120_v26 = vrot.slane %v1119_v54, 2  ;;  %v1126_v17 = vrot.slane %v1125_v5, 2  ;;  %v1155_v44 = vadd.f32 %v1154_v40, %v396_v28  ;;  %v1132_v6 = vrot.slane %v1131_v62, 2 }
 0x14d   : > { %v1138_v2 = vrot.slane %v1137_v39, 2  ;;  %v1144_v55 = vrot.slane %v1143_v22, 2  ;;  %v1161_v21 = vadd.f32 %v1160_v33, %v397_v38  ;;  %v1150_v24 = vrot.slane %v1149_v8, 2 }
 0x14e   : > { %v1121_v43 = vadd.f32 %v1120_v26, %v1119_v54  ;;  %v1127_v18 = vadd.f32 %v1126_v17, %v1125_v5  ;;  %v1156_v16 = vrot.slane %v1155_v44, 2  ;;  %v1133_v4 = vadd.f32 %v1132_v6, %v1131_v62  ;;  %v4723_v6 = vld [vmem:[#allocation18_spill] sm:$0xff] }
 0x14f   : > { %v1139_v53 = vadd.f32 %v1138_v2, %v1137_v39  ;;  %v1145_v50 = vadd.f32 %v1144_v55, %v1143_v22  ;;  %v1162_v47 = vrot.slane %v1161_v21, 2  ;;  %v1151_v42 = vadd.f32 %v1150_v24, %v1149_v8 }
 0x150   : > { %v1122_v32 = vrot.slane %v1121_v43, 1  ;;  %v1128_v15 = vrot.slane %v1127_v18, 1  ;;  %v1157_v36 = vadd.f32 %v1156_v16, %v1155_v44  ;;  %v1134_v7 = vrot.slane %v1133_v4, 1 }
 0x151   : > { %v1140_v1 = vrot.slane %v1139_v53, 1  ;;  %v1146_v31 = vrot.slane %v1145_v50, 1  ;;  %v1163_v28 = vadd.f32 %v1162_v47, %v1161_v21  ;;  %v1152_v54 = vrot.slane %v1151_v42, 1  ;;  %v4725_v21 = vld [vmem:[#allocation19_spill] sm:$0xff] }
 0x152   : > { %v4245_v9 = vadd.f32 %v1122_v32, %v1121_v43  ;;  %v4247_v40 = vadd.f32 %v1128_v15, %v1127_v18  ;;  %v1158_v26 = vrot.slane %v1157_v36, 1  ;;  %v4249_v33 = vadd.f32 %v1134_v7, %v1133_v4  ;;  %v4726_v43 = vld [vmem:[#allocation30_spill] sm:$0xff]  ;;  %v4729_v32 = vld [vmem:[#allocation64_spill] sm:$0xff] }
 0x153   : > { %v4251_v38 = vadd.f32 %v1140_v1, %v1139_v53  ;;  %v4253_v55 = vadd.f32 %v1146_v31, %v1145_v50  ;;  %v1164_v2 = vrot.slane %v1163_v28, 1  ;;  %v4255_v5 = vadd.f32 %v1152_v54, %v1151_v42  ;;  %v4727_v53 = vld [vmem:[#allocation20_spill] sm:$0xff]  ;;  %v4728_v50 = vld [vmem:[#allocation31_spill] sm:$0xff]  ;;  %v4730_v42 = vld [vmem:[#allocation41_spill] sm:$0xff] }
 0x154   : > { %v4257_v16 = vadd.f32 %v1158_v26, %v1157_v36  ;;  %v1295_v18 = vsel %vm1294_vm0, %v3938_v45, %v3890_v51  ;;  %vm1300_vm3 = vcmask 1044484   ;;  %vm1302_vm4 = vcmask 1045509   ;;  %v4731_v7 = vld [vmem:[#allocation42_spill] sm:$0xff]  ;;  %v4732_v31 = vld [vmem:[#allocation43_spill] sm:$0xff]  ;;  %v4733_v54 = vld [vmem:[#allocation76_spill] sm:$0xff] }
 0x155   : > { %v4259_v24 = vadd.f32 %v1164_v2, %v1163_v28  ;;  %v1297_v62 = vsel %vm1296_vm1, %v3986_v37, %v1295_v18  ;;  %vm1304_vm5 = vcmask 1046534   ;;  %vm1306_vm6 = vcmask 1047559   ;;  %v4734_v2 = vld [vmem:[#allocation53_spill] sm:$0xff] }
 0x156   : > { %v1299_v39 = vsel %vm1298_vm2, %v4034_v60, %v1297_v62  ;;  %v1308_v22 = vsel %vm1294_vm0, %v3940_v46, %v3892_v52  ;;  %v1315_v17 = vsel %vm1294_vm0, %v3944_v61, %v3896_v57  ;;  %v1322_v51 = vsel %vm1294_vm0, %v3946_v0, %v3898_v58  ;;  %v4735_v62 = vld [vmem:[#allocation54_spill] sm:$0xff] }
 0x157   : > { %v1301_v45 = vsel %vm1300_vm3, %v4082_v12, %v1299_v39  ;;  %v1309_v37 = vsel %vm1296_vm1, %v3988_v35, %v1308_v22  ;;  %v1316_v60 = vsel %vm1296_vm1, %v3992_v48, %v1315_v17  ;;  %v1323_v52 = vsel %vm1296_vm1, %v3994_v41, %v1322_v51  ;;  %v4736_v22 = vld [vmem:[#allocation55_spill] sm:$0xff]  ;;  %v4737_v51 = vld [vmem:[#allocation88_spill] sm:$0xff] }
 0x158   : > { %v1303_v46 = vsel %vm1302_vm4, %v4130_v14, %v1301_v45  ;;  %v1310_v57 = vsel %vm1298_vm2, %v4036_v34, %v1309_v37  ;;  %v1317_v58 = vsel %vm1298_vm2, %v4040_v30, %v1316_v60  ;;  %v1324_v61 = vsel %vm1298_vm2, %v4042_v20, %v1323_v52  ;;  %v4738_v37 = vld [vmem:[#allocation65_spill] sm:$0xff]  ;;  %v4739_v52 = vld [vmem:[#allocation66_spill] sm:$0xff] }
 0x159   : > { %v1305_v0 = vsel %vm1304_vm5, %v4178_v10, %v1303_v46  ;;  %v1311_v35 = vsel %vm1300_vm3, %v4084_v23, %v1310_v57  ;;  %v1318_v48 = vsel %vm1300_vm3, %v4088_v25, %v1317_v58  ;;  %v1325_v41 = vsel %vm1300_vm3, %v4090_v19, %v1324_v61  ;;  %v4740_v57 = vld [vmem:[#allocation67_spill] sm:$0xff] }
 0x15a   : > { %v4303_v34 = vsel %vm1306_vm6, %v4226_v63, %v1305_v0  ;;  %v1312_v30 = vsel %vm1302_vm4, %v4132_v49, %v1311_v35  ;;  %v1319_v20 = vsel %vm1302_vm4, %v4136_v56, %v1318_v48  ;;  %v1326_v12 = vsel %vm1302_vm4, %v4138_v11, %v1325_v41  ;;  %v4718_v49 = vld [vmem:[#allocation100_spill] sm:$0xff]  ;;  %v4719_v56 = vld [vmem:[#allocation101_spill] sm:$0xff]  ;;  %v4720_v63 = vld [vmem:[#allocation102_spill] sm:$0xff] }
 0x15b   : > { %v1313_v23 = vsel %vm1304_vm5, %v4180_v27, %v1312_v30  ;;  %v1320_v25 = vsel %vm1304_vm5, %v4184_v29, %v1319_v20  ;;  %v1327_v19 = vsel %vm1304_vm5, %v4186_v13, %v1326_v12  ;;  %v1329_v14 = vsel %vm1294_vm0, %v3948_v3, %v3900_v59  ;;  %v4721_v29 = vld [vmem:[#allocation40_spill] sm:$0xff]  ;;  %v4724_v59 = vld [vmem:[#allocation29_spill] sm:$0xff]  ;;  %v4741_v61 = vld [vmem:[#allocation103_spill] sm:$0xff] }
 0x15c   : > { %v4322_v10 = vsel %vm1306_vm6, %v4718_v49, %v1313_v23  ;;  %v4326_v11 = vsel %vm1306_vm6, %v4719_v56, %v1320_v25  ;;  %v4330_v27 = vsel %vm1306_vm6, %v4720_v63, %v1327_v19  ;;  %v1330_v8 = vsel %vm1296_vm1, %v4721_v29, %v1329_v14  ;;  %v4722_v13 = vld [vmem:[#allocation52_spill] sm:$0xff]  ;;  %v4742_v35 = vld [vmem:[#allocation77_spill] sm:$0xff]  ;;  %v4743_v41 = vld [vmem:[#allocation78_spill] sm:$0xff] }
 0x15d   : > { %v1331_v44 = vsel %vm1298_vm2, %v4722_v13, %v1330_v8  ;;  %v1336_v3 = vsel %vm1294_vm0, %v4724_v59, %v4723_v6  ;;  %v1343_v4 = vsel %vm1294_vm0, %v4726_v43, %v4725_v21  ;;  %v1350_v47 = vsel %vm1294_vm0, %v4728_v50, %v4727_v53  ;;  %v4744_v20 = vld [vmem:[#allocation79_spill] sm:$0xff]  ;;  %v4745_v23 = vld [vmem:[#allocation89_spill] sm:$0xff]  ;;  %v4746_v19 = vld [vmem:[#allocation90_spill] sm:$0xff] }
 0x15e   : > { %v1332_v15 = vsel %vm1300_vm3, %v4729_v32, %v1331_v44  ;;  %v1337_v36 = vsel %vm1296_vm1, %v4730_v42, %v1336_v3  ;;  %v1344_v1 = vsel %vm1296_vm1, %v4731_v7, %v1343_v4  ;;  %v1351_v28 = vsel %vm1296_vm1, %v4732_v31, %v1350_v47  ;;  %v4747_v49 = vld [vmem:[#allocation91_spill] sm:$0xff]  ;;  %v4748_v63 = vld [vmem:[#allocation21_spill] sm:$0xff]  ;;  %v4749_v29 = vld [vmem:[#allocation32_spill] sm:$0xff] }
 0x15f   : > { %v1333_v26 = vsel %vm1302_vm4, %v4733_v54, %v1332_v15  ;;  %v1338_v18 = vsel %vm1298_vm2, %v4734_v2, %v1337_v36  ;;  %v1345_v39 = vsel %vm1298_vm2, %v4735_v62, %v1344_v1  ;;  %v1352_v17 = vsel %vm1298_vm2, %v4736_v22, %v1351_v28  ;;  %v4750_v13 = vld [vmem:[#allocation104_spill] sm:$0xff]  ;;  %v4751_v6 = vld [vmem:[#allocation105_spill] sm:$0xff]  ;;  %v4752_v3 = vld [vmem:[#allocation106_spill] sm:$0xff] }
 0x160   : > { %v1334_v45 = vsel %vm1304_vm5, %v4737_v51, %v1333_v26  ;;  %v1339_v60 = vsel %vm1300_vm3, %v4738_v37, %v1338_v18  ;;  %v1346_v46 = vsel %vm1300_vm3, %v4739_v52, %v1345_v39  ;;  %v1353_v58 = vsel %vm1300_vm3, %v4740_v57, %v1352_v17  ;;  %v4753_v43 = vld [vmem:[#allocation44_spill] sm:$0xff]  ;;  %v4755_v47 = vld [vmem:[#allocation22_spill] sm:$0xff]  ;;  %v4756_v32 = vld [vmem:[#allocation33_spill] sm:$0xff] }
 0x161   : > { %v4371_v0 = vsel %vm1306_vm6, %v4741_v61, %v1334_v45  ;;  %v1340_v48 = vsel %vm1302_vm4, %v4742_v35, %v1339_v60  ;;  %v1347_v30 = vsel %vm1302_vm4, %v4743_v41, %v1346_v46  ;;  %v1354_v12 = vsel %vm1302_vm4, %v4744_v20, %v1353_v58  ;;  %v4754_v53 = vld [vmem:[#allocation56_spill] sm:$0xff]  ;;  %v4757_v42 = vld [vmem:[#allocation23_spill] sm:$0xff]  ;;  %v4758_v36 = vld [vmem:[#allocation34_spill] sm:$0xff] }
 0x162   : > { %v1341_v25 = vsel %vm1304_vm5, %v4745_v23, %v1340_v48  ;;  %v1348_v14 = vsel %vm1304_vm5, %v4746_v19, %v1347_v30  ;;  %v1355_v56 = vsel %vm1304_vm5, %v4747_v49, %v1354_v12  ;;  %v1357_v8 = vsel %vm1294_vm0, %v4749_v29, %v4748_v63  ;;  %v4759_v1 = vld [vmem:[#allocation24_spill] sm:$0xff]  ;;  %v4760_v31 = vld [vmem:[#allocation35_spill] sm:$0xff]  ;;  %v4762_v2 = vld [vmem:[#allocation45_spill] sm:$0xff] }
 0x163   : > { %v4390_v44 = vsel %vm1306_vm6, %v4750_v13, %v1341_v25  ;;  %v4394_v59 = vsel %vm1306_vm6, %v4751_v6, %v1348_v14  ;;  %v4398_v21 = vsel %vm1306_vm6, %v4752_v3, %v1355_v56  ;;  %v1358_v4 = vsel %vm1296_vm1, %v4753_v43, %v1357_v8  ;;  %v4761_v54 = vld [vmem:[#allocation68_spill] sm:$0xff]  ;;  %v4763_v62 = vld [vmem:[#allocation46_spill] sm:$0xff]  ;;  %v4764_v22 = vld [vmem:[#allocation47_spill] sm:$0xff] }
 0x164   : > { %v1359_v50 = vsel %vm1298_vm2, %v4754_v53, %v1358_v4  ;;  %v1364_v15 = vsel %vm1294_vm0, %v4756_v32, %v4755_v47  ;;  %v1371_v7 = vsel %vm1294_vm0, %v4758_v36, %v4757_v42  ;;  %v1378_v28 = vsel %vm1294_vm0, %v4760_v31, %v4759_v1  ;;  %v4765_v51 = vld [vmem:[#allocation80_spill] sm:$0xff]  ;;  %v4766_v37 = vld [vmem:[#allocation57_spill] sm:$0xff]  ;;  %v4767_v52 = vld [vmem:[#allocation58_spill] sm:$0xff] }
 0x165   : > { %v1360_v26 = vsel %vm1300_vm3, %v4761_v54, %v1359_v50  ;;  %v1365_v18 = vsel %vm1296_vm1, %v4762_v2, %v1364_v15  ;;  %v1372_v39 = vsel %vm1296_vm1, %v4763_v62, %v1371_v7  ;;  %v1379_v17 = vsel %vm1296_vm1, %v4764_v22, %v1378_v28  ;;  %v4768_v57 = vld [vmem:[#allocation59_spill] sm:$0xff]  ;;  %v4769_v61 = vld [vmem:[#allocation92_spill] sm:$0xff]  ;;  %v4770_v48 = vld [vmem:[#allocation69_spill] sm:$0xff] }
 0x166   : > { %v1361_v45 = vsel %vm1302_vm4, %v4765_v51, %v1360_v26  ;;  %v1366_v60 = vsel %vm1298_vm2, %v4766_v37, %v1365_v18  ;;  %v1373_v46 = vsel %vm1298_vm2, %v4767_v52, %v1372_v39  ;;  %v1380_v58 = vsel %vm1298_vm2, %v4768_v57, %v1379_v17  ;;  %v4771_v30 = vld [vmem:[#allocation70_spill] sm:$0xff]  ;;  %v4772_v12 = vld [vmem:[#allocation71_spill] sm:$0xff]  ;;  %v4773_v19 = vld [vmem:[#allocation81_spill] sm:$0xff] }
 0x167   : > { %v1362_v35 = vsel %vm1304_vm5, %v4769_v61, %v1361_v45  ;;  %v1367_v41 = vsel %vm1300_vm3, %v4770_v48, %v1366_v60  ;;  %v1374_v20 = vsel %vm1300_vm3, %v4771_v30, %v1373_v46  ;;  %v1381_v23 = vsel %vm1300_vm3, %v4772_v12, %v1380_v58  ;;  %v4774_v49 = vld [vmem:[#allocation82_spill] sm:$0xff]  ;;  %v4775_v63 = vld [vmem:[#allocation83_spill] sm:$0xff]  ;;  %v4776_v8 = vld [vmem:[#allocation93_spill] sm:$0xff] }
 0x168   : > { %v4439_v25 = vsel %vm1306_vm6, %v4245_v9, %v1362_v35  ;;  %v1368_v14 = vsel %vm1302_vm4, %v4773_v19, %v1367_v41  ;;  %v1375_v56 = vsel %vm1302_vm4, %v4774_v49, %v1374_v20  ;;  %v1382_v29 = vsel %vm1302_vm4, %v4775_v63, %v1381_v23  ;;  %v4777_v6 = vld [vmem:[#allocation94_spill] sm:$0xff]  ;;  %v4778_v43 = vld [vmem:[#allocation95_spill] sm:$0xff]  ;;  %v4779_v9 = vld [vmem:[#allocation25_spill] sm:$0xff] }
 0x169   : > { %v1369_v13 = vsel %vm1304_vm5, %v4776_v8, %v1368_v14  ;;  %v1376_v3 = vsel %vm1304_vm5, %v4777_v6, %v1375_v56  ;;  %v1383_v4 = vsel %vm1304_vm5, %v4778_v43, %v1382_v29  ;;  %v4780_v53 = vld [vmem:[#allocation36_spill] sm:$0xff]  ;;  %v4783_v31 = vld [vmem:[#allocation26_spill] sm:$0xff]  ;;  %v4784_v28 = vld [vmem:[#allocation37_spill] sm:$0xff] }
 0x16a   : > { %v1385_v50 = vsel %vm1294_vm0, %v4780_v53, %v4779_v9  ;;  %v1370_v47 = vsel %vm1306_vm6, %v4247_v40, %v1369_v13  ;;  %v1377_v32 = vsel %vm1306_vm6, %v4249_v33, %v1376_v3  ;;  %v1384_v15 = vsel %vm1306_vm6, %v4251_v38, %v1383_v4  ;;  %v4781_v42 = vld [vmem:[#allocation48_spill] sm:$0xff]  ;;  %v4785_v26 = vld [vmem:[#allocation27_spill] sm:$0xff]  ;;  %v4786_v2 = vld [vmem:[#allocation38_spill] sm:$0xff] }
 0x16b   : > { %v1386_v36 = vsel %vm1296_vm1, %v4781_v42, %v1385_v50  ;;  %v4782_v7 = vld [vmem:[#allocation60_spill] sm:$0xff]  ;;  %v1392_v54 = vsel %vm1294_vm0, %v4784_v28, %v4783_v31  ;;  %v1399_v40 = vsel %vm1294_vm0, %v4786_v2, %v4785_v26  ;;  %v4788_v62 = vld [vmem:[#allocation39_spill] sm:$0xff]  ;;  %v4790_v22 = vld [vmem:[#allocation49_spill] sm:$0xff] }
 0x16c   : > { %v1387_v1 = vsel %vm1298_vm2, %v4782_v7, %v1386_v36  ;;  %v4787_v18 = vld [vmem:[#allocation28_spill] sm:$0xff]  ;;  %v1393_v17 = vsel %vm1296_vm1, %v4790_v22, %v1392_v54  ;;  %v4791_v51 = vld [vmem:[#allocation50_spill] sm:$0xff]  ;;  %v4792_v37 = vld [vmem:[#allocation51_spill] sm:$0xff] }
 0x16d   : > { %v1406_v33 = vsel %vm1294_vm0, %v4788_v62, %v4787_v18  ;;  %v4789_v39 = vld [vmem:[#allocation72_spill] sm:$0xff]  ;;  %v1400_v45 = vsel %vm1296_vm1, %v4791_v51, %v1399_v40  ;;  %v254_v52 = vld [vmem:[#allocation2] sm:$0xff]  ;;  %v255_v46 = vld [vmem:[#allocation2 + $0x8] sm:$0xff] }
 0x16e   : > { %v1388_v38 = vsel %vm1300_vm3, %v4789_v39, %v1387_v1  ;;  %v1407_v60 = vsel %vm1296_vm1, %v4792_v37, %v1406_v33  ;;  %v4793_v57 = vld [vmem:[#allocation84_spill] sm:$0xff]  ;;  %v4794_v61 = vld [vmem:[#allocation61_spill] sm:$0xff]  ;;  %v4795_v48 = vld [vmem:[#allocation62_spill] sm:$0xff]  ;;  %v1429_v33 = vadd.f32 %v4303_v34, %v254_v52  ;;  %v1430_v37 = vadd.f32 %v4322_v10, %v255_v46 }
 0x16f   : > { %v1389_v58 = vsel %vm1302_vm4, %v4793_v57, %v1388_v38  ;;  %v1394_v35 = vsel %vm1298_vm2, %v4794_v61, %v1393_v17  ;;  %v1401_v41 = vsel %vm1298_vm2, %v4795_v48, %v1400_v45  ;;  %v4796_v30 = vld [vmem:[#allocation63_spill] sm:$0xff]  ;;  %v257_v23 = vld [vmem:[#allocation2 + $0x18] sm:$0xff]  ;;  %v258_v19 = vld [vmem:[#allocation2 + $0x20] sm:$0xff] }
 0x170   : > { %v1408_v20 = vsel %vm1298_vm2, %v4796_v30, %v1407_v60  ;;  %v256_v12 = vld [vmem:[#allocation2 + $0x10] sm:$0xff]  ;;  %v4798_v56 = vld [vmem:[#allocation73_spill] sm:$0xff]  ;;  %v4799_v29 = vld [vmem:[#allocation74_spill] sm:$0xff]  ;;  %v1432_v34 = vadd.f32 %v4330_v27, %v257_v23  ;;  %v1433_v52 = vadd.f32 %v4371_v0, %v258_v19  ;;  %1445 = vst [vmem:[#allocation2] sm:$0xff] %v1429_v33 }
 0x171   : > { %v4797_v14 = vld [vmem:[#allocation96_spill] sm:$0xff]  ;;  %v1395_v63 = vsel %vm1300_vm3, %v4798_v56, %v1394_v35  ;;  %v1402_v8 = vsel %vm1300_vm3, %v4799_v29, %v1401_v41  ;;  %v4800_v13 = vld [vmem:[#allocation75_spill] sm:$0xff]  ;;  %v4801_v53 = vld [vmem:[#allocation85_spill] sm:$0xff]  ;;  %1446 = vst [vmem:[#allocation2 + $0x8] sm:$0xff] %v1430_v37 }
 0x172   : > { %v1390_v49 = vsel %vm1304_vm5, %v4797_v14, %v1389_v58  ;;  %v1409_v6 = vsel %vm1300_vm3, %v4800_v13, %v1408_v20  ;;  %v259_v3 = vld [vmem:[#allocation2 + $0x28] sm:$0xff]  ;;  %v260_v43 = vld [vmem:[#allocation2 + $0x30] sm:$0xff]  ;;  %v261_v4 = vld [vmem:[#allocation2 + $0x38] sm:$0xff]  ;;  %v1396_v50 = vsel %vm1302_vm4, %v4801_v53, %v1395_v63  ;;  %v1431_v58 = vadd.f32 %v4326_v11, %v256_v12  ;;  %1448 = vst [vmem:[#allocation2 + $0x18] sm:$0xff] %v1432_v34 }
 0x173   : > { %v1391_v9 = vsel %vm1306_vm6, %v4253_v55, %v1390_v49  ;;  %v4802_v42 = vld [vmem:[#allocation86_spill] sm:$0xff]  ;;  %v4803_v7 = vld [vmem:[#allocation87_spill] sm:$0xff]  ;;  %v4804_v26 = vld [vmem:[#allocation97_spill] sm:$0xff]  ;;  %v1434_v61 = vadd.f32 %v4390_v44, %v259_v3  ;;  %1449 = vst [vmem:[#allocation2 + $0x20] sm:$0xff] %v1433_v52 }
 0x174   : > { %v1403_v36 = vsel %vm1302_vm4, %v4802_v42, %v1402_v8  ;;  %v1410_v1 = vsel %vm1302_vm4, %v4803_v7, %v1409_v6  ;;  %v262_v31 = vld [vmem:[#allocation2 + $0x40] sm:$0xff]  ;;  %v263_v28 = vld [vmem:[#allocation2 + $0x48] sm:$0xff]  ;;  %v264_v54 = vld [vmem:[#allocation2 + $0x50] sm:$0xff]  ;;  %v1397_v2 = vsel %vm1304_vm5, %v4804_v26, %v1396_v50  ;;  %1447 = vst [vmem:[#allocation2 + $0x10] sm:$0xff] %v1431_v58 }
 0x175   : > { %v4805_v40 = vld [vmem:[#allocation98_spill] sm:$0xff]  ;;  %v4806_v62 = vld [vmem:[#allocation99_spill] sm:$0xff]  ;;  %v265_v39 = vld [vmem:[#allocation2 + $0x58] sm:$0xff]  ;;  %v1398_v17 = vsel %vm1306_vm6, %v4255_v5, %v1397_v2  ;;  %v1435_v5 = vadd.f32 %v4394_v59, %v260_v43  ;;  %v1437_v35 = vadd.f32 %v4439_v25, %v262_v31  ;;  %v1439_v10 = vadd.f32 %v1377_v32, %v264_v54  ;;  %1450 = vst [vmem:[#allocation2 + $0x28] sm:$0xff] %v1434_v61 }
 0x176   : > { %v1404_v18 = vsel %vm1304_vm5, %v4805_v40, %v1403_v36  ;;  %v1411_v55 = vsel %vm1304_vm5, %v4806_v62, %v1410_v1  ;;  %v266_v38 = vld [vmem:[#allocation2 + $0x60] sm:$0xff]  ;;  %v267_v22 = vld [vmem:[#allocation2 + $0x68] sm:$0xff]  ;;  %v268_v60 = vld [vmem:[#allocation2 + $0x70] sm:$0xff]  ;;  %v1440_v46 = vadd.f32 %v1384_v15, %v265_v39  ;;  %1464 = sbr.rel (%p2726_p7) target bundleno = 853 (0x355), region = 52 }
 0x177   : > { %v1405_v51 = vsel %vm1306_vm6, %v4257_v16, %v1404_v18  ;;  %v1412_v45 = vsel %vm1306_vm6, %v4259_v24, %v1411_v55  ;;  %v269_v57 = vld [vmem:[#allocation2 + $0x78] sm:$0xff]  ;;  %v1436_v16 = vadd.f32 %v4398_v21, %v261_v4  ;;  %v1438_v24 = vadd.f32 %v1370_v47, %v263_v28  ;;  %1451 = vst [vmem:[#allocation2 + $0x30] sm:$0xff] %v1435_v5  ;;  %v1498_v0 = vld [vmem:[#allocation6 + $0x8] sm:$0xff] (!%p2726_p7)  ;;  %v1497_v47 = vld [vmem:[#allocation6] sm:$0xff] (!%p2726_p7) }
 0x178   : > { %v1441_v48 = vadd.f32 %v1391_v9, %v266_v38  ;;  %v1442_v41 = vadd.f32 %v1398_v17, %v267_v22  ;;  %v1443_v11 = vadd.f32 %v1405_v51, %v268_v60  ;;  %v1444_v27 = vadd.f32 %v1412_v45, %v269_v57  ;;  %1453 = vst [vmem:[#allocation2 + $0x40] sm:$0xff] %v1437_v35  ;;  %v1500_v44 = vld [vmem:[#allocation6 + $0x18] sm:$0xff] (!%p2726_p7)  ;;  %v1754_v59 = vld [vmem:[#allocation6 + $0x808] sm:$0xff] (!%p2726_p7)  ;;  %v1499_v32 = vld [vmem:[#allocation6 + $0x10] sm:$0xff] (!%p2726_p7) }
 0x179   : > { %1452 = vst [vmem:[#allocation2 + $0x38] sm:$0xff] %v1436_v16  ;;  %1454 = vst [vmem:[#allocation2 + $0x48] sm:$0xff] %v1438_v24  ;;  %v2734_v21 = vpack.c.bf16 (!%p2726_p7), %v1500_v44, %v1498_v0  ;;  %v1756_v25 = vld [vmem:[#allocation6 + $0x818] sm:$0xff] (!%p2726_p7)  ;;  %v2736_v30 = vpack.c.bf16 (!%p2726_p7), %v1499_v32, %v1497_v47  ;;  %v1753_v20 = vld [vmem:[#allocation6 + $0x800] sm:$0xff] (!%p2726_p7) }
 0x17a   : > { %1455 = vst [vmem:[#allocation2 + $0x50] sm:$0xff] %v1439_v10  ;;  %1456 = vst [vmem:[#allocation2 + $0x58] sm:$0xff] %v1440_v46  ;;  %v2990_v15 = vpack.c.bf16 (!%p2726_p7), %v1756_v25, %v1754_v59  ;;  %v1755_v12 = vld [vmem:[#allocation6 + $0x810] sm:$0xff] (!%p2726_p7)  ;;  %v1502_v23 = vld [vmem:[#allocation6 + $0x28] sm:$0xff] (!%p2726_p7) }
 0x17b   : > { %1457 = vst [vmem:[#allocation2 + $0x60] sm:$0xff] %v1441_v48  ;;  %1458 = vst [vmem:[#allocation2 + $0x68] sm:$0xff] %v1442_v41  ;;  %2735 = vmatprep.subr.bf16.mxu1 (!%p2726_p7), %v2734_v21  ;;  %v2992_v19 = vpack.c.bf16 (!%p2726_p7), %v1755_v12, %v1753_v20  ;;  %v1504_v14 = vld [vmem:[#allocation6 + $0x38] sm:$0xff] (!%p2726_p7)  ;;  %v1758_v49 = vld [vmem:[#allocation6 + $0x828] sm:$0xff] (!%p2726_p7) }
 0x17c   : > { %1459 = vst [vmem:[#allocation2 + $0x70] sm:$0xff] %v1443_v11  ;;  %1460 = vst [vmem:[#allocation2 + $0x78] sm:$0xff] %v1444_v27  ;;  %v1760_v56 = vld [vmem:[#allocation6 + $0x838] sm:$0xff] (!%p2726_p7)  ;;  %2991 = vmatprep.subr.bf16.mxu0 (!%p2726_p7), %v2990_v15  ;;  %2737 = vmatpush1.bf16.msra.mxu1 (!%p2726_p7), %v2736_v30  ;;  %v2738_v63 = vpack.c.bf16 (!%p2726_p7), %v1504_v14, %v1502_v23  ;;  %v1501_v8 = vld [vmem:[#allocation6 + $0x20] sm:$0xff] (!%p2726_p7) }
 0x17d   : > { %v2994_v29 = vpack.c.bf16 %v1760_v56, %v1758_v49  ;;  %v1503_v13 = vld [vmem:[#allocation6 + $0x30] sm:$0xff]  ;;  %v1757_v6 = vld [vmem:[#allocation6 + $0x820] sm:$0xff]  ;;  %2993 = vmatpush1.bf16.msra.mxu0 %v2992_v19  ;;  %v1506_v4 = vld [vmem:[#allocation6 + $0x48] sm:$0xff] }
 0x17e   : > { %v2740_v3 = vpack.c.bf16 %v1503_v13, %v1501_v8  ;;  %v1759_v43 = vld [vmem:[#allocation6 + $0x830] sm:$0xff]  ;;  %v1508_v9 = vld [vmem:[#allocation6 + $0x58] sm:$0xff]  ;;  %2739 = vmatprep.subr.bf16.mxu1 %v2738_v63  ;;  %v1762_v42 = vld [vmem:[#allocation6 + $0x848] sm:$0xff] }
 0x17f   : > { %2995 = vmatprep.subr.bf16.mxu0 %v2994_v29  ;;  %v2996_v53 = vpack.c.bf16 %v1759_v43, %v1757_v6  ;;  %v2742_v50 = vpack.c.bf16 %v1508_v9, %v1506_v4  ;;  %v1764_v36 = vld [vmem:[#allocation6 + $0x858] sm:$0xff]  ;;  %v1505_v7 = vld [vmem:[#allocation6 + $0x40] sm:$0xff]  ;;  %v1507_v31 = vld [vmem:[#allocation6 + $0x50] sm:$0xff] }
 0x180   : > { %v2998_v1 = vpack.c.bf16 %v1764_v36, %v1762_v42  ;;  %v1761_v28 = vld [vmem:[#allocation6 + $0x840] sm:$0xff]  ;;  %v1763_v54 = vld [vmem:[#allocation6 + $0x850] sm:$0xff]  ;;  %2741 = vmatpush1.bf16.msra.mxu1 %v2740_v3  ;;  %v2744_v26 = vpack.c.bf16 %v1507_v31, %v1505_v7  ;;  %v1510_v2 = vld [vmem:[#allocation6 + $0x68] sm:$0xff] }
 0x181   : > { %v1512_v40 = vld [vmem:[#allocation6 + $0x78] sm:$0xff]  ;;  %v1766_v18 = vld [vmem:[#allocation6 + $0x868] sm:$0xff]  ;;  %2997 = vmatpush1.bf16.msra.mxu0 %v2996_v53  ;;  %2743 = vmatprep.subr.bf16.mxu1 %v2742_v50  ;;  %v3000_v62 = vpack.c.bf16 %v1763_v54, %v1761_v28  ;;  %v1509_v39 = vld [vmem:[#allocation6 + $0x60] sm:$0xff] }
 0x182   : > { %v2746_v55 = vpack.c.bf16 %v1512_v40, %v1510_v2  ;;  %v1768_v33 = vld [vmem:[#allocation6 + $0x878] sm:$0xff]  ;;  %v1511_v38 = vld [vmem:[#allocation6 + $0x70] sm:$0xff]  ;;  %2999 = vmatprep.subr.bf16.mxu0 %v2998_v1  ;;  %v1765_v17 = vld [vmem:[#allocation6 + $0x860] sm:$0xff] }
 0x183   : > { %v3002_v22 = vpack.c.bf16 %v1768_v33, %v1766_v18  ;;  %v1767_v51 = vld [vmem:[#allocation6 + $0x870] sm:$0xff]  ;;  %v1514_v45 = vld [vmem:[#allocation6 + $0x88] sm:$0xff]  ;;  %v1516_v37 = vld [vmem:[#allocation6 + $0x98] sm:$0xff]  ;;  %v2748_v58 = vpack.c.bf16 %v1511_v38, %v1509_v39 }
 0x184   : > { %v1770_v60 = vld [vmem:[#allocation6 + $0x888] sm:$0xff]  ;;  %v1772_v57 = vld [vmem:[#allocation6 + $0x898] sm:$0xff]  ;;  %2745 = vmatpush1.bf16.msra.mxu1 %v2744_v26  ;;  %v3004_v34 = vpack.c.bf16 %v1767_v51, %v1765_v17  ;;  %v2750_v52 = vpack.c.bf16 %v1516_v37, %v1514_v45  ;;  %v1513_v61 = vld [vmem:[#allocation6 + $0x80] sm:$0xff] }
 0x185   : > { %3001 = vmatpush1.bf16.msra.mxu0 %v3000_v62  ;;  %2747 = vmatprep.subr.bf16.mxu1 %v2746_v55  ;;  %v1515_v5 = vld [vmem:[#allocation6 + $0x90] sm:$0xff]  ;;  %v1769_v16 = vld [vmem:[#allocation6 + $0x880] sm:$0xff]  ;;  %v3006_v35 = vpack.c.bf16 %v1772_v57, %v1770_v60  ;;  %v1518_v10 = vld [vmem:[#allocation6 + $0xa8] sm:$0xff] }
 0x186   : > { %3003 = vmatprep.subr.bf16.mxu0 %v3002_v22  ;;  %v1771_v24 = vld [vmem:[#allocation6 + $0x890] sm:$0xff]  ;;  %v1520_v46 = vld [vmem:[#allocation6 + $0xb8] sm:$0xff]  ;;  %v1774_v48 = vld [vmem:[#allocation6 + $0x8a8] sm:$0xff]  ;;  %v2752_v11 = vpack.c.bf16 %v1515_v5, %v1513_v61 }
 0x187   : > { %v1776_v41 = vld [vmem:[#allocation6 + $0x8b8] sm:$0xff]  ;;  %v3008_v27 = vpack.c.bf16 %v1771_v24, %v1769_v16  ;;  %v2754_v0 = vpack.c.bf16 %v1520_v46, %v1518_v10  ;;  %v1517_v44 = vld [vmem:[#allocation6 + $0xa0] sm:$0xff]  ;;  %v1519_v59 = vld [vmem:[#allocation6 + $0xb0] sm:$0xff] }
 0x188   : > { %2749 = vmatpush1.bf16.msra.mxu1 %v2748_v58  ;;  %v1773_v21 = vld [vmem:[#allocation6 + $0x8a0] sm:$0xff]  ;;  %v3010_v25 = vpack.c.bf16 %v1776_v41, %v1774_v48  ;;  %v1775_v47 = vld [vmem:[#allocation6 + $0x8b0] sm:$0xff]  ;;  %v1522_v32 = vld [vmem:[#allocation6 + $0xc8] sm:$0xff]  ;;  %v2756_v12 = vpack.c.bf16 %v1519_v59, %v1517_v44 }
 0x189   : > { %3005 = vmatpush1.bf16.msra.mxu0 %v3004_v34  ;;  %2751 = vmatprep.subr.bf16.mxu1 %v2750_v52  ;;  %v1524_v15 = vld [vmem:[#allocation6 + $0xd8] sm:$0xff]  ;;  %v1778_v30 = vld [vmem:[#allocation6 + $0x8c8] sm:$0xff]  ;;  %v3012_v23 = vpack.c.bf16 %v1775_v47, %v1773_v21  ;;  %v1521_v14 = vld [vmem:[#allocation6 + $0xc0] sm:$0xff] }
 0x18a   : > { %3007 = vmatprep.subr.bf16.mxu0 %v3006_v35  ;;  %v1780_v20 = vld [vmem:[#allocation6 + $0x8d8] sm:$0xff]  ;;  %v2758_v19 = vpack.c.bf16 %v1524_v15, %v1522_v32  ;;  %v1523_v49 = vld [vmem:[#allocation6 + $0xd0] sm:$0xff]  ;;  %v1777_v56 = vld [vmem:[#allocation6 + $0x8c0] sm:$0xff] }
 0x18b   : > { %v3014_v63 = vpack.c.bf16 %v1780_v20, %v1778_v30  ;;  %v1779_v29 = vld [vmem:[#allocation6 + $0x8d0] sm:$0xff]  ;;  %v1526_v8 = vld [vmem:[#allocation6 + $0xe8] sm:$0xff]  ;;  %v1528_v13 = vld [vmem:[#allocation6 + $0xf8] sm:$0xff]  ;;  %v2760_v43 = vpack.c.bf16 %v1523_v49, %v1521_v14 }
 0x18c   : > { %2753 = vmatpush1.bf16.msra.mxu1 %v2752_v11  ;;  %v1782_v6 = vld [vmem:[#allocation6 + $0x8e8] sm:$0xff]  ;;  %v1784_v3 = vld [vmem:[#allocation6 + $0x8f8] sm:$0xff]  ;;  %v3016_v4 = vpack.c.bf16 %v1779_v29, %v1777_v56  ;;  %v2762_v9 = vpack.c.bf16 %v1528_v13, %v1526_v8  ;;  %v1525_v53 = vld [vmem:[#allocation6 + $0xe0] sm:$0xff] }
 0x18d   : > { %3009 = vmatpush1.bf16.msra.mxu0 %v3008_v27  ;;  %2755 = vmatprep.subr.bf16.mxu1 %v2754_v0  ;;  %v1527_v50 = vld [vmem:[#allocation6 + $0xf0] sm:$0xff]  ;;  %v1781_v42 = vld [vmem:[#allocation6 + $0x8e0] sm:$0xff]  ;;  %v3018_v36 = vpack.c.bf16 %v1784_v3, %v1782_v6  ;;  %v1530_v1 = vld [vmem:[#allocation6 + $0x108] sm:$0xff] }
 0x18e   : > { %3011 = vmatprep.subr.bf16.mxu0 %v3010_v25  ;;  %v1783_v7 = vld [vmem:[#allocation6 + $0x8f0] sm:$0xff]  ;;  %v1532_v31 = vld [vmem:[#allocation6 + $0x118] sm:$0xff]  ;;  %v1786_v28 = vld [vmem:[#allocation6 + $0x908] sm:$0xff]  ;;  %v2764_v26 = vpack.c.bf16 %v1527_v50, %v1525_v53 }
 0x18f   : > { %v1788_v54 = vld [vmem:[#allocation6 + $0x918] sm:$0xff]  ;;  %v3020_v2 = vpack.c.bf16 %v1783_v7, %v1781_v42  ;;  %v2766_v40 = vpack.c.bf16 %v1532_v31, %v1530_v1  ;;  %v1529_v18 = vld [vmem:[#allocation6 + $0x100] sm:$0xff]  ;;  %v1531_v62 = vld [vmem:[#allocation6 + $0x110] sm:$0xff] }
 0x190   : > { %2757 = vmatpush1.bf16.msra.mxu1 %v2756_v12  ;;  %v1785_v55 = vld [vmem:[#allocation6 + $0x900] sm:$0xff]  ;;  %v3022_v33 = vpack.c.bf16 %v1788_v54, %v1786_v28  ;;  %v1787_v39 = vld [vmem:[#allocation6 + $0x910] sm:$0xff]  ;;  %v1534_v38 = vld [vmem:[#allocation6 + $0x128] sm:$0xff]  ;;  %v2768_v45 = vpack.c.bf16 %v1531_v62, %v1529_v18 }
 0x191   : > { %3013 = vmatpush1.bf16.msra.mxu0 %v3012_v23  ;;  %2759 = vmatprep.subr.bf16.mxu1 %v2758_v19  ;;  %v1536_v22 = vld [vmem:[#allocation6 + $0x138] sm:$0xff]  ;;  %v1790_v17 = vld [vmem:[#allocation6 + $0x928] sm:$0xff]  ;;  %v3024_v37 = vpack.c.bf16 %v1787_v39, %v1785_v55  ;;  %v1533_v57 = vld [vmem:[#allocation6 + $0x120] sm:$0xff] }
 0x192   : > { %3015 = vmatprep.subr.bf16.mxu0 %v3014_v63  ;;  %v1792_v51 = vld [vmem:[#allocation6 + $0x938] sm:$0xff]  ;;  %v2770_v60 = vpack.c.bf16 %v1536_v22, %v1534_v38  ;;  %v1535_v58 = vld [vmem:[#allocation6 + $0x130] sm:$0xff]  ;;  %v1789_v34 = vld [vmem:[#allocation6 + $0x920] sm:$0xff] }
 0x193   : > { %v3026_v52 = vpack.c.bf16 %v1792_v51, %v1790_v17  ;;  %v1791_v61 = vld [vmem:[#allocation6 + $0x930] sm:$0xff]  ;;  %v1538_v5 = vld [vmem:[#allocation6 + $0x148] sm:$0xff]  ;;  %v1540_v16 = vld [vmem:[#allocation6 + $0x158] sm:$0xff]  ;;  %v2772_v10 = vpack.c.bf16 %v1535_v58, %v1533_v57 }
 0x194   : > { %2761 = vmatpush1.bf16.msra.mxu1 %v2760_v43  ;;  %v1794_v35 = vld [vmem:[#allocation6 + $0x948] sm:$0xff]  ;;  %v1796_v24 = vld [vmem:[#allocation6 + $0x958] sm:$0xff]  ;;  %v3028_v46 = vpack.c.bf16 %v1791_v61, %v1789_v34  ;;  %v2774_v48 = vpack.c.bf16 %v1540_v16, %v1538_v5  ;;  %v1537_v41 = vld [vmem:[#allocation6 + $0x140] sm:$0xff] }
 0x195   : > { %3017 = vmatpush1.bf16.msra.mxu0 %v3016_v4  ;;  %2763 = vmatprep.subr.bf16.mxu1 %v2762_v9  ;;  %v1539_v11 = vld [vmem:[#allocation6 + $0x150] sm:$0xff]  ;;  %v1793_v27 = vld [vmem:[#allocation6 + $0x940] sm:$0xff]  ;;  %v3030_v0 = vpack.c.bf16 %v1796_v24, %v1794_v35  ;;  %v1542_v59 = vld [vmem:[#allocation6 + $0x168] sm:$0xff] }
 0x196   : > { %3019 = vmatprep.subr.bf16.mxu0 %v3018_v36  ;;  %v1795_v44 = vld [vmem:[#allocation6 + $0x950] sm:$0xff]  ;;  %v1544_v21 = vld [vmem:[#allocation6 + $0x178] sm:$0xff]  ;;  %v1798_v25 = vld [vmem:[#allocation6 + $0x968] sm:$0xff]  ;;  %v2776_v32 = vpack.c.bf16 %v1539_v11, %v1537_v41 }
 0x197   : > { %v1800_v47 = vld [vmem:[#allocation6 + $0x978] sm:$0xff]  ;;  %v1541_v15 = vld [vmem:[#allocation6 + $0x160] sm:$0xff]  ;;  %v3032_v30 = vpack.c.bf16 %v1795_v44, %v1793_v27  ;;  %v2778_v20 = vpack.c.bf16 %v1544_v21, %v1542_v59  ;;  %v1543_v12 = vld [vmem:[#allocation6 + $0x170] sm:$0xff] }
 0x198   : > { %2765 = vmatpush1.bf16.msra.mxu1 %v2764_v26  ;;  %v1797_v23 = vld [vmem:[#allocation6 + $0x960] sm:$0xff]  ;;  %v1799_v19 = vld [vmem:[#allocation6 + $0x970] sm:$0xff]  ;;  %v3034_v14 = vpack.c.bf16 %v1800_v47, %v1798_v25  ;;  %v1546_v49 = vld [vmem:[#allocation6 + $0x188] sm:$0xff]  ;;  %v2780_v3 = vpack.c.bf16 %v1543_v12, %v1541_v15 }
 0x199   : > { %3021 = vmatpush1.bf16.msra.mxu0 %v3020_v2  ;;  %2767 = vmatprep.subr.bf16.mxu1 %v2766_v40  ;;  %v1548_v56 = vld [vmem:[#allocation6 + $0x198] sm:$0xff]  ;;  %v1466_v63 = vld [vmem:[#allocation2 + $0x8] sm:$0xff]  ;;  %v3036_v4 = vpack.c.bf16 %v1799_v19, %v1797_v23  ;;  %v1545_v53 = vld [vmem:[#allocation6 + $0x180] sm:$0xff] }
 0x19a   : > { %3023 = vmatprep.subr.bf16.mxu0 %v3022_v33  ;;  %v1802_v29 = vld [vmem:[#allocation6 + $0x988] sm:$0xff]  ;;  %v1804_v8 = vld [vmem:[#allocation6 + $0x998] sm:$0xff]  ;;  %v1482_v13 = vmul.f32 0.0625, %v1466_v63  ;;  %v2782_v9 = vpack.c.bf16 %v1548_v56, %v1546_v49  ;;  %v1547_v50 = vld [vmem:[#allocation6 + $0x190] sm:$0xff] }
 0x19b   : > { %v1474_v6 = vld [vmem:[#allocation2 + $0x48] sm:$0xff]  ;;  %v1801_v42 = vld [vmem:[#allocation6 + $0x980] sm:$0xff]  ;;  %v3038_v36 = vpack.c.bf16 %v1804_v8, %v1802_v29  ;;  %v1803_v7 = vld [vmem:[#allocation6 + $0x990] sm:$0xff]  ;;  %v2784_v26 = vpack.c.bf16 %v1547_v50, %v1545_v53 }
 0x19c   : > { %2769 = vmatpush1.bf16.msra.mxu1 %v2768_v45  ;;  %v1490_v43 = vmul.f32 0.0625, %v1474_v6  ;;  %v1550_v1 = vld [vmem:[#allocation6 + $0x1a8] sm:$0xff]  ;;  %v1552_v31 = vld [vmem:[#allocation6 + $0x1b8] sm:$0xff]  ;;  %2085 = vmatprep.mubr.f32.mxu1 %v1482_v13  ;;  %v3040_v2 = vpack.c.bf16 %v1803_v7, %v1801_v42  ;;  %v1549_v18 = vld [vmem:[#allocation6 + $0x1a0] sm:$0xff] }
 0x19d   : > { %3025 = vmatpush1.bf16.msra.mxu0 %v3024_v37  ;;  %2771 = vmatprep.subr.bf16.mxu1 %v2770_v60  ;;  %v1806_v28 = vld [vmem:[#allocation6 + $0x9a8] sm:$0xff]  ;;  %v1808_v54 = vld [vmem:[#allocation6 + $0x9b8] sm:$0xff]  ;;  %v2786_v40 = vpack.c.bf16 %v1552_v31, %v1550_v1  ;;  %v1551_v62 = vld [vmem:[#allocation6 + $0x1b0] sm:$0xff] }
 0x19e   : > { %3027 = vmatprep.subr.bf16.mxu0 %v3026_v52  ;;  %2369 = vmatprep.mubr.f32.mxu0 %v1490_v43  ;;  %v1805_v55 = vld [vmem:[#allocation6 + $0x9a0] sm:$0xff]  ;;  %v3042_v33 = vpack.c.bf16 %v1808_v54, %v1806_v28  ;;  %v1807_v39 = vld [vmem:[#allocation6 + $0x9b0] sm:$0xff]  ;;  %v1554_v38 = vld [vmem:[#allocation6 + $0x1c8] sm:$0xff]  ;;  %v2788_v45 = vpack.c.bf16 %v1551_v62, %v1549_v18 }
 0x19f   : > { %v1556_v22 = vld [vmem:[#allocation6 + $0x1d8] sm:$0xff]  ;;  %v1810_v17 = vld [vmem:[#allocation6 + $0x9c8] sm:$0xff]  ;;  %v3044_v37 = vpack.c.bf16 %v1807_v39, %v1805_v55  ;;  %v1553_v57 = vld [vmem:[#allocation6 + $0x1c0] sm:$0xff] }
 0x1a0   : > { %2773 = vmatpush1.bf16.msra.mxu1 %v2772_v10  ;;  %v1812_v51 = vld [vmem:[#allocation6 + $0x9d8] sm:$0xff]  ;;  %v2790_v60 = vpack.c.bf16 %v1556_v22, %v1554_v38  ;;  %v1555_v58 = vld [vmem:[#allocation6 + $0x1d0] sm:$0xff]  ;;  %v1809_v34 = vld [vmem:[#allocation6 + $0x9c0] sm:$0xff] }
 0x1a1   : > { %3029 = vmatpush1.bf16.msra.mxu0 %v3028_v46  ;;  %2775 = vmatprep.subr.bf16.mxu1 %v2774_v48  ;;  %v3046_v52 = vpack.c.bf16 %v1812_v51, %v1810_v17  ;;  %v1811_v61 = vld [vmem:[#allocation6 + $0x9d0] sm:$0xff]  ;;  %v1558_v5 = vld [vmem:[#allocation6 + $0x1e8] sm:$0xff]  ;;  %v1560_v16 = vld [vmem:[#allocation6 + $0x1f8] sm:$0xff]  ;;  %v2792_v10 = vpack.c.bf16 %v1555_v58, %v1553_v57 }
 0x1a2   : > { %3031 = vmatprep.subr.bf16.mxu0 %v3030_v0  ;;  %v1814_v35 = vld [vmem:[#allocation6 + $0x9e8] sm:$0xff]  ;;  %v1816_v24 = vld [vmem:[#allocation6 + $0x9f8] sm:$0xff]  ;;  %v3048_v46 = vpack.c.bf16 %v1811_v61, %v1809_v34  ;;  %v2794_v48 = vpack.c.bf16 %v1560_v16, %v1558_v5  ;;  %v1557_v41 = vld [vmem:[#allocation6 + $0x1e0] sm:$0xff] }
 0x1a3   : > { %v1559_v11 = vld [vmem:[#allocation6 + $0x1f0] sm:$0xff]  ;;  %v1813_v27 = vld [vmem:[#allocation6 + $0x9e0] sm:$0xff]  ;;  %v3050_v0 = vpack.c.bf16 %v1816_v24, %v1814_v35  ;;  %v1562_v59 = vld [vmem:[#allocation6 + $0x208] sm:$0xff] }
 0x1a4   : > { %2777 = vmatpush1.bf16.msra.mxu1 %v2776_v32  ;;  %v1815_v44 = vld [vmem:[#allocation6 + $0x9f0] sm:$0xff]  ;;  %v1564_v21 = vld [vmem:[#allocation6 + $0x218] sm:$0xff]  ;;  %v1818_v25 = vld [vmem:[#allocation6 + $0xa08] sm:$0xff]  ;;  %v2796_v32 = vpack.c.bf16 %v1559_v11, %v1557_v41 }
 0x1a5   : > { %3033 = vmatpush1.bf16.msra.mxu0 %v3032_v30  ;;  %2779 = vmatprep.subr.bf16.mxu1 %v2778_v20  ;;  %v1820_v47 = vld [vmem:[#allocation6 + $0xa18] sm:$0xff]  ;;  %v1465_v15 = vld [vmem:[#allocation2] sm:$0xff]  ;;  %v3052_v20 = vpack.c.bf16 %v1815_v44, %v1813_v27  ;;  %v2798_v12 = vpack.c.bf16 %v1564_v21, %v1562_v59  ;;  %v1563_v23 = vld [vmem:[#allocation6 + $0x210] sm:$0xff] }
 0x1a6   : > { %3035 = vmatprep.subr.bf16.mxu0 %v3034_v14  ;;  %v1561_v30 = vld [vmem:[#allocation6 + $0x200] sm:$0xff]  ;;  %v3054_v49 = vpack.c.bf16 %v1820_v47, %v1818_v25  ;;  %v1819_v56 = vld [vmem:[#allocation6 + $0xa10] sm:$0xff]  ;;  %v1566_v63 = vld [vmem:[#allocation6 + $0x228] sm:$0xff]  ;;  %v1481_v8 = vmul.f32 0.0625, %v1465_v15 }
 0x1a7   : > { %v1473_v19 = vld [vmem:[#allocation2 + $0x40] sm:$0xff]  ;;  %v1568_v29 = vld [vmem:[#allocation6 + $0x238] sm:$0xff]  ;;  %v1822_v13 = vld [vmem:[#allocation6 + $0xa28] sm:$0xff] }
 0x1a8   : > { %2781 = vmatpush1.bf16.msra.mxu1 %v2780_v3  ;;  %v1817_v14 = vld [vmem:[#allocation6 + $0xa00] sm:$0xff]  ;;  %v1824_v6 = vld [vmem:[#allocation6 + $0xa38] sm:$0xff]  ;;  %v2800_v3 = vpack.c.bf16 %v1563_v23, %v1561_v30  ;;  %v1489_v43 = vmul.f32 0.0625, %v1473_v19  ;;  %v1567_v50 = vld [vmem:[#allocation6 + $0x230] sm:$0xff] }
 0x1a9   : > { %3037 = vmatpush1.bf16.msra.mxu0 %v3036_v4  ;;  %2783 = vmatprep.subr.bf16.mxu1 %v2782_v9  ;;  %v3056_v4 = vpack.c.bf16 %v1819_v56, %v1817_v14  ;;  %v2802_v9 = vpack.c.bf16 %v1568_v29, %v1566_v63  ;;  %v1565_v53 = vld [vmem:[#allocation6 + $0x220] sm:$0xff]  ;;  %v1823_v7 = vld [vmem:[#allocation6 + $0xa30] sm:$0xff]  ;;  %v1570_v1 = vld [vmem:[#allocation6 + $0x248] sm:$0xff] }
 0x1aa   : > { %3039 = vmatprep.subr.bf16.mxu0 %v3038_v36  ;;  %v1821_v42 = vld [vmem:[#allocation6 + $0xa20] sm:$0xff]  ;;  %v3058_v36 = vpack.c.bf16 %v1824_v6, %v1822_v13  ;;  %v1572_v31 = vld [vmem:[#allocation6 + $0x258] sm:$0xff]  ;;  %v1826_v28 = vld [vmem:[#allocation6 + $0xa48] sm:$0xff] }
 0x1ab   : > { %v1828_v54 = vld [vmem:[#allocation6 + $0xa58] sm:$0xff]  ;;  %v1569_v18 = vld [vmem:[#allocation6 + $0x240] sm:$0xff]  ;;  %v1571_v62 = vld [vmem:[#allocation6 + $0x250] sm:$0xff] }
 0x1ac   : > { %2785 = vmatpush1.bf16.msra.mxu1 %v2784_v26  ;;  %v2804_v26 = vpack.c.bf16 %v1567_v50, %v1565_v53  ;;  %v1825_v55 = vld [vmem:[#allocation6 + $0xa40] sm:$0xff]  ;;  %v1827_v39 = vld [vmem:[#allocation6 + $0xa50] sm:$0xff]  ;;  %v1574_v38 = vld [vmem:[#allocation6 + $0x268] sm:$0xff] }
 0x1ad   : > { %3041 = vmatpush1.bf16.msra.mxu0 %v3040_v2  ;;  %2787 = vmatprep.subr.bf16.mxu1 %v2786_v40  ;;  %v3060_v2 = vpack.c.bf16 %v1823_v7, %v1821_v42  ;;  %v2806_v40 = vpack.c.bf16 %v1572_v31, %v1570_v1  ;;  %v1576_v22 = vld [vmem:[#allocation6 + $0x278] sm:$0xff]  ;;  %v1830_v17 = vld [vmem:[#allocation6 + $0xa68] sm:$0xff]  ;;  %v1573_v57 = vld [vmem:[#allocation6 + $0x260] sm:$0xff] }
 0x1ae   : > { %3043 = vmatprep.subr.bf16.mxu0 %v3042_v33  ;;  %v3062_v33 = vpack.c.bf16 %v1828_v54, %v1826_v28  ;;  %v1832_v51 = vld [vmem:[#allocation6 + $0xa78] sm:$0xff]  ;;  %v1575_v58 = vld [vmem:[#allocation6 + $0x270] sm:$0xff]  ;;  %v1829_v34 = vld [vmem:[#allocation6 + $0xa60] sm:$0xff] }
 0x1af   : > { %v1831_v61 = vld [vmem:[#allocation6 + $0xa70] sm:$0xff]  ;;  %v1578_v5 = vld [vmem:[#allocation6 + $0x288] sm:$0xff]  ;;  %v1580_v16 = vld [vmem:[#allocation6 + $0x298] sm:$0xff] }
 0x1b0   : > { %2789 = vmatpush1.bf16.msra.mxu1 %v2788_v45  ;;  %v2808_v45 = vpack.c.bf16 %v1571_v62, %v1569_v18  ;;  %v1834_v35 = vld [vmem:[#allocation6 + $0xa88] sm:$0xff]  ;;  %v1836_v24 = vld [vmem:[#allocation6 + $0xa98] sm:$0xff]  ;;  %v1577_v41 = vld [vmem:[#allocation6 + $0x280] sm:$0xff] }
 0x1b1   : > { %3045 = vmatpush1.bf16.msra.mxu0 %v3044_v37  ;;  %2791 = vmatprep.subr.bf16.mxu1 %v2790_v60  ;;  %v3064_v37 = vpack.c.bf16 %v1827_v39, %v1825_v55  ;;  %v2810_v60 = vpack.c.bf16 %v1576_v22, %v1574_v38  ;;  %v1579_v11 = vld [vmem:[#allocation6 + $0x290] sm:$0xff]  ;;  %v1833_v27 = vld [vmem:[#allocation6 + $0xa80] sm:$0xff]  ;;  %v1582_v59 = vld [vmem:[#allocation6 + $0x2a8] sm:$0xff] }
 0x1b2   : > { %3047 = vmatprep.subr.bf16.mxu0 %v3046_v52  ;;  %v3066_v52 = vpack.c.bf16 %v1832_v51, %v1830_v17  ;;  %v1835_v44 = vld [vmem:[#allocation6 + $0xa90] sm:$0xff]  ;;  %v1584_v21 = vld [vmem:[#allocation6 + $0x2b8] sm:$0xff]  ;;  %v1838_v25 = vld [vmem:[#allocation6 + $0xaa8] sm:$0xff] }
 0x1b3   : > { %v1840_v47 = vld [vmem:[#allocation6 + $0xab8] sm:$0xff]  ;;  %v3072_v15 = vpack.c.bf16 %v1835_v44, %v1833_v27  ;;  %v2818_v30 = vpack.c.bf16 %v1584_v21, %v1582_v59  ;;  %v1837_v23 = vld [vmem:[#allocation6 + $0xaa0] sm:$0xff]  ;;  %v1839_v14 = vld [vmem:[#allocation6 + $0xab0] sm:$0xff] }
 0x1b4   : > { %2793 = vmatpush1.bf16.msra.mxu1 %v2792_v10  ;;  %v2812_v10 = vpack.c.bf16 %v1575_v58, %v1573_v57  ;;  %v3074_v19 = vpack.c.bf16 %v1840_v47, %v1838_v25  ;;  %v1588_v56 = vld [vmem:[#allocation6 + $0x2d8] sm:$0xff]  ;;  %v1842_v63 = vld [vmem:[#allocation6 + $0xac8] sm:$0xff]  ;;  %v1585_v13 = vld [vmem:[#allocation6 + $0x2c0] sm:$0xff]  ;;  %v3076_v6 = vpack.c.bf16 %v1839_v14, %v1837_v23 }
 0x1b5   : > { %3049 = vmatpush1.bf16.msra.mxu0 %v3048_v46  ;;  %2795 = vmatprep.subr.bf16.mxu1 %v2794_v48  ;;  %v3068_v46 = vpack.c.bf16 %v1831_v61, %v1829_v34  ;;  %v2814_v48 = vpack.c.bf16 %v1580_v16, %v1578_v5  ;;  %v1844_v29 = vld [vmem:[#allocation6 + $0xad8] sm:$0xff]  ;;  %v1590_v50 = vld [vmem:[#allocation6 + $0x2e8] sm:$0xff]  ;;  %v1589_v18 = vld [vmem:[#allocation6 + $0x2e0] sm:$0xff] }
 0x1b6   : > { %3051 = vmatprep.subr.bf16.mxu0 %v3050_v0  ;;  %v3070_v0 = vpack.c.bf16 %v1836_v24, %v1834_v35  ;;  %v3078_v53 = vpack.c.bf16 %v1844_v29, %v1842_v63  ;;  %v1592_v42 = vld [vmem:[#allocation6 + $0x2f8] sm:$0xff]  ;;  %v1846_v7 = vld [vmem:[#allocation6 + $0xae8] sm:$0xff]  ;;  %v1591_v62 = vld [vmem:[#allocation6 + $0x2f0] sm:$0xff] }
 0x1b7   : > { %v1848_v1 = vld [vmem:[#allocation6 + $0xaf8] sm:$0xff]  ;;  %v1845_v55 = vld [vmem:[#allocation6 + $0xae0] sm:$0xff]  ;;  %v1847_v39 = vld [vmem:[#allocation6 + $0xaf0] sm:$0xff] }
 0x1b8   : > { %2797 = vmatpush1.bf16.msra.mxu1 %v2796_v32  ;;  %v2816_v32 = vpack.c.bf16 %v1579_v11, %v1577_v41  ;;  %v1476_v28 = vld [vmem:[#allocation2 + $0x58] sm:$0xff]  ;;  %v1594_v38 = vld [vmem:[#allocation6 + $0x308] sm:$0xff]  ;;  %v1593_v57 = vld [vmem:[#allocation6 + $0x300] sm:$0xff] }
 0x1b9   : > { %3053 = vmatpush1.bf16.msra.mxu0 %v3052_v20  ;;  %2799 = vmatprep.subr.bf16.mxu1 %v2798_v12  ;;  %v1581_v20 = vld [vmem:[#allocation6 + $0x2a0] sm:$0xff]  ;;  %v1583_v12 = vld [vmem:[#allocation6 + $0x2b0] sm:$0xff]  ;;  %v1596_v22 = vld [vmem:[#allocation6 + $0x318] sm:$0xff] }
 0x1ba   : > { %3055 = vmatprep.subr.bf16.mxu0 %v3054_v49  ;;  %v1586_v49 = vld [vmem:[#allocation6 + $0x2c8] sm:$0xff]  ;;  %v1852_v51 = vld [vmem:[#allocation6 + $0xb18] sm:$0xff]  ;;  %v1595_v58 = vld [vmem:[#allocation6 + $0x310] sm:$0xff] }
 0x1bb   : > { %2086 = vmatmul.mubr.f32.vlgmr.msra.gmra.mrb[0].mxu1 %v1481_v8  ;;  %v2820_v8 = vpack.c.bf16 %v1583_v12, %v1581_v20  ;;  %v1850_v17 = vld [vmem:[#allocation6 + $0xb08] sm:$0xff]  ;;  %v1849_v34 = vld [vmem:[#allocation6 + $0xb00] sm:$0xff]  ;;  %v1851_v61 = vld [vmem:[#allocation6 + $0xb10] sm:$0xff] }
 0x1bc   : > { %2801 = vmatpush1.bf16.msra.mxu1 %v2800_v3  ;;  %2370 = vmatmul.mubr.f32.vlgmr.msra.gmra.mrb[0].mxu0 %v1489_v43  ;;  %v2822_v3 = vpack.c.bf16 %v1588_v56, %v1586_v49  ;;  %v1587_v43 = vld [vmem:[#allocation6 + $0x2d0] sm:$0xff]  ;;  %v1598_v5 = vld [vmem:[#allocation6 + $0x328] sm:$0xff]  ;;  %v1600_v16 = vld [vmem:[#allocation6 + $0x338] sm:$0xff] }
 0x1bd   : > { %3057 = vmatpush1.bf16.msra.mxu0 %v3056_v4  ;;  %2803 = vmatprep.subr.bf16.mxu1 %v2802_v9  ;;  %v1841_v4 = vld [vmem:[#allocation6 + $0xac0] sm:$0xff]  ;;  %v1843_v9 = vld [vmem:[#allocation6 + $0xad0] sm:$0xff]  ;;  %v2824_v54 = vpack.c.bf16 %v1587_v43, %v1585_v13  ;;  %v1854_v35 = vld [vmem:[#allocation6 + $0xb28] sm:$0xff] }
 0x1be   : > { %3059 = vmatprep.subr.bf16.mxu0 %v3058_v36  ;;  %v1468_v36 = vld [vmem:[#allocation2 + $0x18] sm:$0xff]  ;;  %v1597_v41 = vld [vmem:[#allocation6 + $0x320] sm:$0xff]  ;;  %v1599_v11 = vld [vmem:[#allocation6 + $0x330] sm:$0xff] }
 0x1bf   : > { %v1484_v31 = vmul.f32 0.0625, %v1468_v36  ;;  %v1856_v24 = vld [vmem:[#allocation6 + $0xb38] sm:$0xff]  ;;  %v1853_v27 = vld [vmem:[#allocation6 + $0xb20] sm:$0xff]  ;;  %v1855_v44 = vld [vmem:[#allocation6 + $0xb30] sm:$0xff] }
 0x1c0   : > { %2805 = vmatpush1.bf16.msra.mxu1 %v2804_v26  ;;  %v1492_v26 = vmul.f32 0.0625, %v1476_v28  ;;  %v1602_v59 = vld [vmem:[#allocation6 + $0x348] sm:$0xff]  ;;  %v1604_v21 = vld [vmem:[#allocation6 + $0x358] sm:$0xff]  ;;  %v1601_v20 = vld [vmem:[#allocation6 + $0x340] sm:$0xff] }
 0x1c1   : > { %3061 = vmatpush1.bf16.msra.mxu0 %v3060_v2  ;;  %2807 = vmatprep.subr.bf16.mxu1 %v2806_v40  ;;  %v3080_v2 = vpack.c.bf16 %v1843_v9, %v1841_v4  ;;  %v2826_v40 = vpack.c.bf16 %v1592_v42, %v1590_v50  ;;  %v1858_v25 = vld [vmem:[#allocation6 + $0xb48] sm:$0xff]  ;;  %v1860_v47 = vld [vmem:[#allocation6 + $0xb58] sm:$0xff]  ;;  %v1603_v12 = vld [vmem:[#allocation6 + $0x350] sm:$0xff] }
 0x1c2   : > { %3063 = vmatprep.subr.bf16.mxu0 %v3062_v33  ;;  %v3082_v33 = vpack.c.bf16 %v1848_v1, %v1846_v7  ;;  %2156 = vmatprep.mubr.f32.mxu1 %v1484_v31  ;;  %v1857_v23 = vld [vmem:[#allocation6 + $0xb40] sm:$0xff]  ;;  %v1859_v14 = vld [vmem:[#allocation6 + $0xb50] sm:$0xff]  ;;  %v1606_v49 = vld [vmem:[#allocation6 + $0x368] sm:$0xff] }
 0x1c3   : > { %2440 = vmatprep.mubr.f32.mxu0 %v1492_v26  ;;  %v1608_v56 = vld [vmem:[#allocation6 + $0x378] sm:$0xff]  ;;  %v1862_v63 = vld [vmem:[#allocation6 + $0xb68] sm:$0xff]  ;;  %v3096_v13 = vpack.c.bf16 %v1859_v14, %v1857_v23  ;;  %v1607_v43 = vld [vmem:[#allocation6 + $0x370] sm:$0xff] }
 0x1c4   : > { %2809 = vmatpush1.bf16.msra.mxu1 %v2808_v45  ;;  %v2828_v45 = vpack.c.bf16 %v1591_v62, %v1589_v18  ;;  %v1864_v29 = vld [vmem:[#allocation6 + $0xb78] sm:$0xff]  ;;  %v1861_v4 = vld [vmem:[#allocation6 + $0xb60] sm:$0xff]  ;;  %v1610_v50 = vld [vmem:[#allocation6 + $0x388] sm:$0xff] }
 0x1c5   : > { %3065 = vmatpush1.bf16.msra.mxu0 %v3064_v37  ;;  %2811 = vmatprep.subr.bf16.mxu1 %v2810_v60  ;;  %v3084_v37 = vpack.c.bf16 %v1847_v39, %v1845_v55  ;;  %v2830_v60 = vpack.c.bf16 %v1596_v22, %v1594_v38  ;;  %v3098_v9 = vpack.c.bf16 %v1864_v29, %v1862_v63  ;;  %v1612_v42 = vld [vmem:[#allocation6 + $0x398] sm:$0xff]  ;;  %v1866_v36 = vld [vmem:[#allocation6 + $0xb88] sm:$0xff]  ;;  %v1611_v26 = vld [vmem:[#allocation6 + $0x390] sm:$0xff] }
 0x1c6   : > { %3067 = vmatprep.subr.bf16.mxu0 %v3066_v52  ;;  %v3086_v52 = vpack.c.bf16 %v1852_v51, %v1850_v17  ;;  %v1868_v7 = vld [vmem:[#allocation6 + $0xb98] sm:$0xff]  ;;  %v2846_v28 = vpack.c.bf16 %v1612_v42, %v1610_v50  ;;  %v1867_v18 = vld [vmem:[#allocation6 + $0xb90] sm:$0xff]  ;;  %v1614_v62 = vld [vmem:[#allocation6 + $0x3a8] sm:$0xff] }
 0x1c7   : > { %v1616_v55 = vld [vmem:[#allocation6 + $0x3b8] sm:$0xff]  ;;  %v1613_v51 = vld [vmem:[#allocation6 + $0x3a0] sm:$0xff]  ;;  %v1886_v42 = vld [vmem:[#allocation6 + $0xc28] sm:$0xff] }
 0x1c8   : > { %2813 = vmatpush1.bf16.msra.mxu1 %v2812_v10  ;;  %v2832_v10 = vpack.c.bf16 %v1595_v58, %v1593_v57  ;;  %v1872_v39 = vld [vmem:[#allocation6 + $0xbb8] sm:$0xff]  ;;  %v2850_v17 = vpack.c.bf16 %v1616_v55, %v1614_v62  ;;  %v1871_v57 = vld [vmem:[#allocation6 + $0xbb0] sm:$0xff]  ;;  %v1618_v58 = vld [vmem:[#allocation6 + $0x3c8] sm:$0xff] }
 0x1c9   : > { %3069 = vmatpush1.bf16.msra.mxu0 %v3068_v46  ;;  %2815 = vmatprep.subr.bf16.mxu1 %v2814_v48  ;;  %v3088_v46 = vpack.c.bf16 %v1851_v61, %v1849_v34  ;;  %v2834_v48 = vpack.c.bf16 %v1600_v16, %v1598_v5  ;;  %v1620_v34 = vld [vmem:[#allocation6 + $0x3d8] sm:$0xff]  ;;  %v1625_v63 = vld [vmem:[#allocation6 + $0x400] sm:$0xff]  ;;  %v1634_v62 = vld [vmem:[#allocation6 + $0x448] sm:$0xff] }
 0x1ca   : > { %3071 = vmatprep.subr.bf16.mxu0 %v3070_v0  ;;  %v3090_v0 = vpack.c.bf16 %v1856_v24, %v1854_v35  ;;  %v1876_v61 = vld [vmem:[#allocation6 + $0xbd8] sm:$0xff]  ;;  %v2854_v35 = vpack.c.bf16 %v1620_v34, %v1618_v58  ;;  %v1617_v24 = vld [vmem:[#allocation6 + $0x3c0] sm:$0xff]  ;;  %v1635_v58 = vld [vmem:[#allocation6 + $0x450] sm:$0xff] }
 0x1cb   : > { %v1628_v23 = vld [vmem:[#allocation6 + $0x418] sm:$0xff]  ;;  %v1889_v34 = vld [vmem:[#allocation6 + $0xc40] sm:$0xff] }
 0x1cc   : > { %2817 = vmatpush1.bf16.msra.mxu1 %v2816_v32  ;;  %v2836_v32 = vpack.c.bf16 %v1599_v11, %v1597_v41  ;;  %v1875_v41 = vld [vmem:[#allocation6 + $0xbd0] sm:$0xff]  ;;  %v1622_v11 = vld [vmem:[#allocation6 + $0x3e8] sm:$0xff]  ;;  %v1884_v14 = vld [vmem:[#allocation6 + $0xc18] sm:$0xff] }
 0x1cd   : > { %3073 = vmatpush1.bf16.msra.mxu0 %v3072_v15  ;;  %2819 = vmatprep.subr.bf16.mxu1 %v2818_v30  ;;  %v3092_v15 = vpack.c.bf16 %v1855_v44, %v1853_v27  ;;  %v2838_v30 = vpack.c.bf16 %v1604_v21, %v1602_v59  ;;  %v1624_v27 = vld [vmem:[#allocation6 + $0x3f8] sm:$0xff] }
 0x1ce   : > { %3075 = vmatprep.subr.bf16.mxu0 %v3074_v19  ;;  %v3094_v19 = vpack.c.bf16 %v1860_v47, %v1858_v25  ;;  %v1880_v44 = vld [vmem:[#allocation6 + $0xbf8] sm:$0xff]  ;;  %v2858_v25 = vpack.c.bf16 %v1624_v27, %v1622_v11  ;;  %v1621_v47 = vld [vmem:[#allocation6 + $0x3e0] sm:$0xff]  ;;  %v1639_v11 = vld [vmem:[#allocation6 + $0x470] sm:$0xff] }
 0x1cf   : > { %v1636_v55 = vld [vmem:[#allocation6 + $0x458] sm:$0xff]  ;;  %v1893_v27 = vld [vmem:[#allocation6 + $0xc60] sm:$0xff] }
 0x1d0   : > { %2821 = vmatpush1.bf16.msra.mxu1 %v2820_v8  ;;  %v2840_v8 = vpack.c.bf16 %v1603_v12, %v1601_v20  ;;  %v1879_v20 = vld [vmem:[#allocation6 + $0xbf0] sm:$0xff]  ;;  %v1626_v12 = vld [vmem:[#allocation6 + $0x408] sm:$0xff] }
 0x1d1   : > { %3077 = vmatpush1.bf16.msra.mxu0 %v3076_v6  ;;  %2823 = vmatprep.subr.bf16.mxu1 %v2822_v3  ;;  %v2842_v6 = vpack.c.bf16 %v1608_v56, %v1606_v49  ;;  %v1605_v3 = vld [vmem:[#allocation6 + $0x360] sm:$0xff]  ;;  %v1467_v56 = vld [vmem:[#allocation2 + $0x10] sm:$0xff] }
 0x1d2   : > { %3079 = vmatprep.subr.bf16.mxu0 %v3078_v53  ;;  %v1863_v53 = vld [vmem:[#allocation6 + $0xb70] sm:$0xff]  ;;  %v2844_v1 = vpack.c.bf16 %v1607_v43, %v1605_v3  ;;  %v1881_v3 = vld [vmem:[#allocation6 + $0xc00] sm:$0xff]  ;;  %v1483_v50 = vmul.f32 0.0625, %v1467_v56  ;;  %v1648_v56 = vld [vmem:[#allocation6 + $0x4b8] sm:$0xff] }
 0x1d3   : > { %v3100_v31 = vpack.c.bf16 %v1863_v53, %v1861_v4  ;;  %v1883_v4 = vld [vmem:[#allocation6 + $0xc10] sm:$0xff]  ;;  %v1632_v53 = vld [vmem:[#allocation6 + $0x438] sm:$0xff] }
 0x1d4   : > { %2825 = vmatpush1.bf16.msra.mxu1 %v2824_v54  ;;  %v1609_v54 = vld [vmem:[#allocation6 + $0x380] sm:$0xff] }
 0x1d5   : > { %3081 = vmatpush1.bf16.msra.mxu0 %v3080_v2  ;;  %2827 = vmatprep.subr.bf16.mxu1 %v2826_v40  ;;  %v1865_v2 = vld [vmem:[#allocation6 + $0xb80] sm:$0xff]  ;;  %v3102_v40 = vpack.c.bf16 %v1868_v7, %v1866_v36  ;;  %v2848_v38 = vpack.c.bf16 %v1611_v26, %v1609_v54  ;;  %v1888_v36 = vld [vmem:[#allocation6 + $0xc38] sm:$0xff]  ;;  %v1631_v26 = vld [vmem:[#allocation6 + $0x430] sm:$0xff] }
 0x1d6   : > { %3083 = vmatprep.subr.bf16.mxu0 %v3082_v33  ;;  %v1870_v33 = vld [vmem:[#allocation6 + $0xba8] sm:$0xff]  ;;  %v3104_v22 = vpack.c.bf16 %v1867_v18, %v1865_v2  ;;  %v1885_v2 = vld [vmem:[#allocation6 + $0xc20] sm:$0xff]  ;;  %v3122_v18 = vpack.c.bf16 %v1888_v36, %v1886_v42  ;;  %v1652_v42 = vld [vmem:[#allocation6 + $0x4d8] sm:$0xff] }
 0x1d7   : > { %v1906_v36 = vld [vmem:[#allocation6 + $0xcc8] sm:$0xff] }
 0x1d8   : > { %2829 = vmatpush1.bf16.msra.mxu1 %v2828_v45  ;;  %v1615_v45 = vld [vmem:[#allocation6 + $0x3b0] sm:$0xff] }
 0x1d9   : > { %3085 = vmatpush1.bf16.msra.mxu0 %v3084_v37  ;;  %2831 = vmatprep.subr.bf16.mxu1 %v2830_v60  ;;  %v1869_v37 = vld [vmem:[#allocation6 + $0xba0] sm:$0xff]  ;;  %v3106_v60 = vpack.c.bf16 %v1872_v39, %v1870_v33  ;;  %v2852_v5 = vpack.c.bf16 %v1615_v45, %v1613_v51  ;;  %v1470_v33 = vld [vmem:[#allocation2 + $0x28] sm:$0xff] }
 0x1da   : > { %3087 = vmatprep.subr.bf16.mxu0 %v3086_v52  ;;  %v1874_v52 = vld [vmem:[#allocation6 + $0xbc8] sm:$0xff]  ;;  %v3108_v16 = vpack.c.bf16 %v1871_v57, %v1869_v37  ;;  %v1633_v57 = vld [vmem:[#allocation6 + $0x440] sm:$0xff] }
 0x1db   : > { %v1890_v39 = vld [vmem:[#allocation6 + $0xc48] sm:$0xff] }
 0x1dc   : > { %2833 = vmatpush1.bf16.msra.mxu1 %v2832_v10  ;;  %v1619_v10 = vld [vmem:[#allocation6 + $0x3d0] sm:$0xff] }
 0x1dd   : > { %3089 = vmatpush1.bf16.msra.mxu0 %v3088_v46  ;;  %2835 = vmatprep.subr.bf16.mxu1 %v2834_v48  ;;  %v1873_v46 = vld [vmem:[#allocation6 + $0xbc0] sm:$0xff]  ;;  %v3110_v48 = vpack.c.bf16 %v1876_v61, %v1874_v52  ;;  %v2856_v59 = vpack.c.bf16 %v1619_v10, %v1617_v24  ;;  %v1891_v61 = vld [vmem:[#allocation6 + $0xc50] sm:$0xff]  ;;  %v1896_v24 = vld [vmem:[#allocation6 + $0xc78] sm:$0xff]  ;;  %v2872_v10 = vpack.c.bf16 %v1635_v58, %v1633_v57 }
 0x1de   : > { %3091 = vmatprep.subr.bf16.mxu0 %v3090_v0  ;;  %v1878_v0 = vld [vmem:[#allocation6 + $0xbe8] sm:$0xff]  ;;  %v3112_v21 = vpack.c.bf16 %v1875_v41, %v1873_v46  ;;  %v3128_v46 = vpack.c.bf16 %v1891_v61, %v1889_v34  ;;  %v1637_v41 = vld [vmem:[#allocation6 + $0x460] sm:$0xff]  ;;  %v1911_v57 = vld [vmem:[#allocation6 + $0xcf0] sm:$0xff] }
 0x1df   : > { %v1658_v58 = vld [vmem:[#allocation6 + $0x508] sm:$0xff]  ;;  %v1660_v34 = vld [vmem:[#allocation6 + $0x518] sm:$0xff] }
 0x1e0   : > { %2837 = vmatpush1.bf16.msra.mxu1 %v2836_v32  ;;  %v1623_v32 = vld [vmem:[#allocation6 + $0x3f0] sm:$0xff]  ;;  %v1916_v61 = vld [vmem:[#allocation6 + $0xd18] sm:$0xff] }
 0x1e1   : > { %3093 = vmatpush1.bf16.msra.mxu0 %v3092_v15  ;;  %2839 = vmatprep.subr.bf16.mxu1 %v2838_v30  ;;  %v1877_v15 = vld [vmem:[#allocation6 + $0xbe0] sm:$0xff]  ;;  %v3114_v30 = vpack.c.bf16 %v1880_v44, %v1878_v0  ;;  %v2860_v49 = vpack.c.bf16 %v1623_v32, %v1621_v47  ;;  %v1895_v44 = vld [vmem:[#allocation6 + $0xc70] sm:$0xff]  ;;  %v1900_v47 = vld [vmem:[#allocation6 + $0xc98] sm:$0xff]  ;;  %v2876_v32 = vpack.c.bf16 %v1639_v11, %v1637_v41 }
 0x1e2   : > { %3095 = vmatprep.subr.bf16.mxu0 %v3094_v19  ;;  %v1882_v19 = vld [vmem:[#allocation6 + $0xc08] sm:$0xff]  ;;  %v3116_v29 = vpack.c.bf16 %v1879_v20, %v1877_v15  ;;  %v3132_v15 = vpack.c.bf16 %v1895_v44, %v1893_v27  ;;  %v1641_v20 = vld [vmem:[#allocation6 + $0x480] sm:$0xff]  ;;  %v1915_v41 = vld [vmem:[#allocation6 + $0xd10] sm:$0xff] }
 0x1e3   : > { %v3118_v43 = vpack.c.bf16 %v1884_v14, %v1882_v19  ;;  %v1899_v14 = vld [vmem:[#allocation6 + $0xc90] sm:$0xff]  ;;  %v1662_v11 = vld [vmem:[#allocation6 + $0x528] sm:$0xff]  ;;  %v1664_v27 = vld [vmem:[#allocation6 + $0x538] sm:$0xff] }
 0x1e4   : > { %2841 = vmatpush1.bf16.msra.mxu1 %v2840_v8  ;;  %v2862_v8 = vpack.c.bf16 %v1628_v23, %v1626_v12  ;;  %v1643_v12 = vld [vmem:[#allocation6 + $0x490] sm:$0xff]  ;;  %v1897_v23 = vld [vmem:[#allocation6 + $0xc80] sm:$0xff]  ;;  %v1920_v44 = vld [vmem:[#allocation6 + $0xd38] sm:$0xff] }
 0x1e5   : > { %3097 = vmatpush1.bf16.msra.mxu0 %v3096_v13  ;;  %2843 = vmatprep.subr.bf16.mxu1 %v2842_v6  ;;  %v1627_v13 = vld [vmem:[#allocation6 + $0x410] sm:$0xff] }
 0x1e6   : > { %3099 = vmatprep.subr.bf16.mxu0 %v3098_v9  ;;  %v1475_v6 = vld [vmem:[#allocation2 + $0x50] sm:$0xff]  ;;  %v1630_v9 = vld [vmem:[#allocation6 + $0x428] sm:$0xff]  ;;  %v2864_v7 = vpack.c.bf16 %v1627_v13, %v1625_v63  ;;  %v3136_v13 = vpack.c.bf16 %v1899_v14, %v1897_v23  ;;  %v1668_v23 = vld [vmem:[#allocation6 + $0x558] sm:$0xff] }
 0x1e7   : > { %v2866_v54 = vpack.c.bf16 %v1632_v53, %v1630_v9  ;;  %v1902_v63 = vld [vmem:[#allocation6 + $0xca8] sm:$0xff]  ;;  %v1903_v53 = vld [vmem:[#allocation6 + $0xcb0] sm:$0xff]  ;;  %v1924_v14 = vld [vmem:[#allocation6 + $0xd58] sm:$0xff] }
 0x1e8   : > { %2845 = vmatpush1.bf16.msra.mxu1 %v2844_v1  ;;  %v1491_v1 = vmul.f32 0.0625, %v1475_v6 }
 0x1e9   : > { %3101 = vmatpush1.bf16.msra.mxu0 %v3100_v31  ;;  %2847 = vmatprep.subr.bf16.mxu1 %v2846_v28  ;;  %v1629_v31 = vld [vmem:[#allocation6 + $0x420] sm:$0xff]  ;;  %v3120_v28 = vpack.c.bf16 %v1883_v4, %v1881_v3 }
 0x1ea   : > { %3103 = vmatprep.subr.bf16.mxu0 %v3102_v40  ;;  %v1887_v40 = vld [vmem:[#allocation6 + $0xc30] sm:$0xff]  ;;  %v2868_v51 = vpack.c.bf16 %v1631_v26, %v1629_v31  ;;  %v1645_v3 = vld [vmem:[#allocation6 + $0x4a0] sm:$0xff] }
 0x1eb   : > { %v3124_v37 = vpack.c.bf16 %v1887_v40, %v1885_v2  ;;  %v1901_v4 = vld [vmem:[#allocation6 + $0xca0] sm:$0xff]  ;;  %v1651_v26 = vld [vmem:[#allocation6 + $0x4d0] sm:$0xff] }
 0x1ec   : > { %2849 = vmatpush1.bf16.msra.mxu1 %v2848_v38  ;;  %v1892_v38 = vld [vmem:[#allocation6 + $0xc58] sm:$0xff]  ;;  %v3140_v31 = vpack.c.bf16 %v1903_v53, %v1901_v4  ;;  %v1905_v2 = vld [vmem:[#allocation6 + $0xcc0] sm:$0xff] }
 0x1ed   : > { %3105 = vmatpush1.bf16.msra.mxu0 %v3104_v22  ;;  %2851 = vmatprep.subr.bf16.mxu1 %v2850_v17  ;;  %v1486_v22 = vmul.f32 0.0625, %v1470_v33  ;;  %v1478_v17 = vld [vmem:[#allocation2 + $0x68] sm:$0xff]  ;;  %v3126_v52 = vpack.c.bf16 %v1892_v38, %v1890_v39  ;;  %v1912_v39 = vld [vmem:[#allocation6 + $0xcf8] sm:$0xff] }
 0x1ee   : > { %3107 = vmatprep.subr.bf16.mxu0 %v3106_v60  ;;  %v1494_v45 = vmul.f32 0.0625, %v1478_v17  ;;  %v2870_v60 = vpack.c.bf16 %v1636_v55, %v1634_v62  ;;  %v1654_v62 = vld [vmem:[#allocation6 + $0x4e8] sm:$0xff]  ;;  %v1656_v55 = vld [vmem:[#allocation6 + $0x4f8] sm:$0xff] }
 0x1ef   : > { %v1910_v33 = vld [vmem:[#allocation6 + $0xce8] sm:$0xff]  ;;  %v2890_v17 = vpack.c.bf16 %v1656_v55, %v1654_v62  ;;  %v1672_v4 = vld [vmem:[#allocation6 + $0x578] sm:$0xff] }
 0x1f0   : > { %2853 = vmatpush1.bf16.msra.mxu1 %v2852_v5  ;;  %v1638_v5 = vld [vmem:[#allocation6 + $0x468] sm:$0xff]  ;;  %v1928_v53 = vld [vmem:[#allocation6 + $0xd78] sm:$0xff] }
 0x1f1   : > { %3109 = vmatpush1.bf16.msra.mxu0 %v3108_v16  ;;  %2855 = vmatprep.subr.bf16.mxu1 %v2854_v35  ;;  %v1640_v16 = vld [vmem:[#allocation6 + $0x478] sm:$0xff]  ;;  %v1894_v35 = vld [vmem:[#allocation6 + $0xc68] sm:$0xff] }
 0x1f2   : > { %3111 = vmatprep.subr.bf16.mxu0 %v3110_v48  ;;  %v2874_v48 = vpack.c.bf16 %v1640_v16, %v1638_v5  ;;  %v3130_v0 = vpack.c.bf16 %v1896_v24, %v1894_v35  ;;  %v2894_v35 = vpack.c.bf16 %v1660_v34, %v1658_v58  ;;  %v1657_v24 = vld [vmem:[#allocation6 + $0x500] sm:$0xff] }
 0x1f4   : > { %2857 = vmatpush1.bf16.msra.mxu1 %v2856_v59  ;;  %v1642_v59 = vld [vmem:[#allocation6 + $0x488] sm:$0xff] }
 0x1f5   : > { %3113 = vmatpush1.bf16.msra.mxu0 %v3112_v21  ;;  %2859 = vmatprep.subr.bf16.mxu1 %v2858_v25  ;;  %v1644_v21 = vld [vmem:[#allocation6 + $0x498] sm:$0xff]  ;;  %v1898_v25 = vld [vmem:[#allocation6 + $0xc88] sm:$0xff] }
 0x1f6   : > { %3115 = vmatprep.subr.bf16.mxu0 %v3114_v30  ;;  %v2878_v30 = vpack.c.bf16 %v1644_v21, %v1642_v59  ;;  %v3134_v19 = vpack.c.bf16 %v1900_v47, %v1898_v25  ;;  %v2898_v25 = vpack.c.bf16 %v1664_v27, %v1662_v11  ;;  %v1661_v47 = vld [vmem:[#allocation6 + $0x520] sm:$0xff] }
 0x1f8   : > { %2861 = vmatpush1.bf16.msra.mxu1 %v2860_v49  ;;  %v1646_v49 = vld [vmem:[#allocation6 + $0x4a8] sm:$0xff] }
 0x1f9   : > { %3117 = vmatpush1.bf16.msra.mxu0 %v3116_v29  ;;  %2863 = vmatprep.subr.bf16.mxu1 %v2862_v8  ;;  %v1904_v29 = vld [vmem:[#allocation6 + $0xcb8] sm:$0xff]  ;;  %v2880_v8 = vpack.c.bf16 %v1643_v12, %v1641_v20  ;;  %v2882_v6 = vpack.c.bf16 %v1648_v56, %v1646_v49  ;;  %v1919_v20 = vld [vmem:[#allocation6 + $0xd30] sm:$0xff]  ;;  %v1666_v12 = vld [vmem:[#allocation6 + $0x548] sm:$0xff] }
 0x1fa   : > { %3119 = vmatprep.subr.bf16.mxu0 %v3118_v43  ;;  %v1647_v43 = vld [vmem:[#allocation6 + $0x4b0] sm:$0xff]  ;;  %v3138_v9 = vpack.c.bf16 %v1904_v29, %v1902_v63  ;;  %v2902_v63 = vpack.c.bf16 %v1668_v23, %v1666_v12  ;;  %v1665_v29 = vld [vmem:[#allocation6 + $0x540] sm:$0xff] }
 0x1fb   : > { %2157 = vmatmul.mubr.f32.vlgmr.msra.gmra.mrb[0].mxu1 %v1483_v50  ;;  %v1650_v50 = vld [vmem:[#allocation6 + $0x4c8] sm:$0xff] }
 0x1fc   : > { %2865 = vmatpush1.bf16.msra.mxu1 %v2864_v7  ;;  %2441 = vmatmul.mubr.f32.vlgmr.msra.gmra.mrb[0].mxu0 %v1491_v1  ;;  %v1908_v7 = vld [vmem:[#allocation6 + $0xcd8] sm:$0xff]  ;;  %v2884_v1 = vpack.c.bf16 %v1647_v43, %v1645_v3  ;;  %v1923_v3 = vld [vmem:[#allocation6 + $0xd50] sm:$0xff]  ;;  %v1670_v43 = vld [vmem:[#allocation6 + $0x568] sm:$0xff] }
 0x1fd   : > { %3121 = vmatpush1.bf16.msra.mxu0 %v3120_v28  ;;  %2867 = vmatprep.subr.bf16.mxu1 %v2866_v54  ;;  %v2886_v28 = vpack.c.bf16 %v1652_v42, %v1650_v50  ;;  %v1649_v54 = vld [vmem:[#allocation6 + $0x4c0] sm:$0xff]  ;;  %v3142_v40 = vpack.c.bf16 %v1908_v7, %v1906_v36  ;;  %v2906_v36 = vpack.c.bf16 %v1672_v4, %v1670_v43 }
 0x1fe   : > { %3123 = vmatprep.subr.bf16.mxu0 %v3122_v18  ;;  %2227 = vmatprep.mubr.f32.mxu1 %v1486_v22  ;;  %v1907_v18 = vld [vmem:[#allocation6 + $0xcd0] sm:$0xff]  ;;  %v2888_v38 = vpack.c.bf16 %v1651_v26, %v1649_v54  ;;  %v1669_v7 = vld [vmem:[#allocation6 + $0x560] sm:$0xff]  ;;  %v1674_v26 = vld [vmem:[#allocation6 + $0x588] sm:$0xff] }
 0x1ff   : > { %2511 = vmatprep.mubr.f32.mxu0 %v1494_v45  ;;  %v3144_v22 = vpack.c.bf16 %v1907_v18, %v1905_v2  ;;  %v1655_v45 = vld [vmem:[#allocation6 + $0x4f0] sm:$0xff]  ;;  %v1676_v2 = vld [vmem:[#allocation6 + $0x598] sm:$0xff]  ;;  %v1469_v4 = vld [vmem:[#allocation2 + $0x20] sm:$0xff] }
 0x200   : > { %2869 = vmatpush1.bf16.msra.mxu1 %v2868_v51  ;;  %v1653_v51 = vld [vmem:[#allocation6 + $0x4e0] sm:$0xff]  ;;  %v1927_v54 = vld [vmem:[#allocation6 + $0xd70] sm:$0xff]  ;;  %v1932_v18 = vld [vmem:[#allocation6 + $0xd98] sm:$0xff] }
 0x201   : > { %3125 = vmatpush1.bf16.msra.mxu0 %v3124_v37  ;;  %2871 = vmatprep.subr.bf16.mxu1 %v2870_v60  ;;  %v1909_v37 = vld [vmem:[#allocation6 + $0xce0] sm:$0xff]  ;;  %v3146_v60 = vpack.c.bf16 %v1912_v39, %v1910_v33  ;;  %v2892_v5 = vpack.c.bf16 %v1655_v45, %v1653_v51  ;;  %v2910_v33 = vpack.c.bf16 %v1676_v2, %v1674_v26  ;;  %v1931_v51 = vld [vmem:[#allocation6 + $0xd90] sm:$0xff]  ;;  %v1678_v45 = vld [vmem:[#allocation6 + $0x5a8] sm:$0xff]  ;;  %v1485_v26 = vmul.f32 0.0625, %v1469_v4 }
 0x202   : > { %3127 = vmatprep.subr.bf16.mxu0 %v3126_v52  ;;  %v1914_v52 = vld [vmem:[#allocation6 + $0xd08] sm:$0xff]  ;;  %v3148_v16 = vpack.c.bf16 %v1911_v57, %v1909_v37  ;;  %v1673_v39 = vld [vmem:[#allocation6 + $0x580] sm:$0xff]  ;;  %v1680_v37 = vld [vmem:[#allocation6 + $0x5b8] sm:$0xff] }
 0x203   : > { %v1936_v57 = vld [vmem:[#allocation6 + $0xdb8] sm:$0xff]  ;;  %v1950_v2 = vld [vmem:[#allocation6 + $0xe28] sm:$0xff] }
 0x204   : > { %2873 = vmatpush1.bf16.msra.mxu1 %v2872_v10  ;;  %v1659_v10 = vld [vmem:[#allocation6 + $0x510] sm:$0xff]  ;;  %v1712_v4 = vld [vmem:[#allocation6 + $0x6b8] sm:$0xff] }
 0x205   : > { %3129 = vmatpush1.bf16.msra.mxu0 %v3128_v46  ;;  %2875 = vmatprep.subr.bf16.mxu1 %v2874_v48  ;;  %v1913_v46 = vld [vmem:[#allocation6 + $0xd00] sm:$0xff]  ;;  %v3150_v48 = vpack.c.bf16 %v1916_v61, %v1914_v52  ;;  %v2896_v59 = vpack.c.bf16 %v1659_v10, %v1657_v24  ;;  %v2914_v52 = vpack.c.bf16 %v1680_v37, %v1678_v45  ;;  %v1935_v24 = vld [vmem:[#allocation6 + $0xdb0] sm:$0xff]  ;;  %v1682_v10 = vld [vmem:[#allocation6 + $0x5c8] sm:$0xff] }
 0x206   : > { %3131 = vmatprep.subr.bf16.mxu0 %v3130_v0  ;;  %v1918_v0 = vld [vmem:[#allocation6 + $0xd28] sm:$0xff]  ;;  %v3152_v21 = vpack.c.bf16 %v1915_v41, %v1913_v46  ;;  %v1677_v61 = vld [vmem:[#allocation6 + $0x5a0] sm:$0xff]  ;;  %v1684_v46 = vld [vmem:[#allocation6 + $0x5d8] sm:$0xff] }
 0x207   : > { %v1940_v41 = vld [vmem:[#allocation6 + $0xdd8] sm:$0xff]  ;;  %v1951_v37 = vld [vmem:[#allocation6 + $0xe30] sm:$0xff] }
 0x208   : > { %2877 = vmatpush1.bf16.msra.mxu1 %v2876_v32  ;;  %v1663_v32 = vld [vmem:[#allocation6 + $0x530] sm:$0xff] }
 0x209   : > { %3133 = vmatpush1.bf16.msra.mxu0 %v3132_v15  ;;  %2879 = vmatprep.subr.bf16.mxu1 %v2878_v30  ;;  %v1917_v15 = vld [vmem:[#allocation6 + $0xd20] sm:$0xff]  ;;  %v3154_v30 = vpack.c.bf16 %v1920_v44, %v1918_v0  ;;  %v2900_v49 = vpack.c.bf16 %v1663_v32, %v1661_v47  ;;  %v2918_v0 = vpack.c.bf16 %v1684_v46, %v1682_v10  ;;  %v1939_v47 = vld [vmem:[#allocation6 + $0xdd0] sm:$0xff]  ;;  %v1686_v32 = vld [vmem:[#allocation6 + $0x5e8] sm:$0xff] }
 0x20a   : > { %3135 = vmatprep.subr.bf16.mxu0 %v3134_v19  ;;  %v1922_v19 = vld [vmem:[#allocation6 + $0xd48] sm:$0xff]  ;;  %v3156_v56 = vpack.c.bf16 %v1919_v20, %v1917_v15  ;;  %v1681_v44 = vld [vmem:[#allocation6 + $0x5c0] sm:$0xff]  ;;  %v1688_v15 = vld [vmem:[#allocation6 + $0x5f8] sm:$0xff] }
 0x20b   : > { %v1944_v20 = vld [vmem:[#allocation6 + $0xdf8] sm:$0xff]  ;;  %v1699_v10 = vld [vmem:[#allocation6 + $0x650] sm:$0xff]  ;;  %v1953_v46 = vld [vmem:[#allocation6 + $0xe40] sm:$0xff] }
 0x20c   : > { %2881 = vmatpush1.bf16.msra.mxu1 %v2880_v8  ;;  %v1667_v8 = vld [vmem:[#allocation6 + $0x550] sm:$0xff] }
 0x20d   : > { %3137 = vmatpush1.bf16.msra.mxu0 %v3136_v13  ;;  %2883 = vmatprep.subr.bf16.mxu1 %v2882_v6  ;;  %v1921_v13 = vld [vmem:[#allocation6 + $0xd40] sm:$0xff]  ;;  %v3158_v6 = vpack.c.bf16 %v1924_v14, %v1922_v19  ;;  %v2904_v50 = vpack.c.bf16 %v1667_v8, %v1665_v29  ;;  %v2922_v19 = vpack.c.bf16 %v1688_v15, %v1686_v32  ;;  %v1943_v29 = vld [vmem:[#allocation6 + $0xdf0] sm:$0xff]  ;;  %v1690_v8 = vld [vmem:[#allocation6 + $0x608] sm:$0xff] }
 0x20e   : > { %3139 = vmatprep.subr.bf16.mxu0 %v3138_v9  ;;  %v1926_v9 = vld [vmem:[#allocation6 + $0xd68] sm:$0xff]  ;;  %v3160_v42 = vpack.c.bf16 %v1923_v3, %v1921_v13  ;;  %v1685_v14 = vld [vmem:[#allocation6 + $0x5e0] sm:$0xff]  ;;  %v1692_v13 = vld [vmem:[#allocation6 + $0x618] sm:$0xff] }
 0x20f   : > { %v1948_v3 = vld [vmem:[#allocation6 + $0xe18] sm:$0xff]  ;;  %v1703_v32 = vld [vmem:[#allocation6 + $0x670] sm:$0xff]  ;;  %v1957_v15 = vld [vmem:[#allocation6 + $0xe60] sm:$0xff] }
 0x210   : > { %2885 = vmatpush1.bf16.msra.mxu1 %v2884_v1  ;;  %v1671_v1 = vld [vmem:[#allocation6 + $0x570] sm:$0xff] }
 0x211   : > { %3141 = vmatpush1.bf16.msra.mxu0 %v3140_v31  ;;  %2887 = vmatprep.subr.bf16.mxu1 %v2886_v28  ;;  %v1925_v31 = vld [vmem:[#allocation6 + $0xd60] sm:$0xff]  ;;  %v3162_v28 = vpack.c.bf16 %v1928_v53, %v1926_v9  ;;  %v2908_v62 = vpack.c.bf16 %v1671_v1, %v1669_v7 }
 0x212   : > { %3143 = vmatprep.subr.bf16.mxu0 %v3142_v40  ;;  %v1930_v40 = vld [vmem:[#allocation6 + $0xd88] sm:$0xff]  ;;  %v3164_v55 = vpack.c.bf16 %v1927_v54, %v1925_v31  ;;  %v1689_v9 = vld [vmem:[#allocation6 + $0x600] sm:$0xff]  ;;  %v1947_v31 = vld [vmem:[#allocation6 + $0xe10] sm:$0xff] }
 0x213   : > { %v1945_v7 = vld [vmem:[#allocation6 + $0xe00] sm:$0xff]  ;;  %v1696_v54 = vld [vmem:[#allocation6 + $0x638] sm:$0xff] }
 0x214   : > { %2889 = vmatpush1.bf16.msra.mxu1 %v2888_v38  ;;  %v1675_v38 = vld [vmem:[#allocation6 + $0x590] sm:$0xff] }
 0x215   : > { %3145 = vmatpush1.bf16.msra.mxu0 %v3144_v22  ;;  %2891 = vmatprep.subr.bf16.mxu1 %v2890_v17  ;;  %v1929_v22 = vld [vmem:[#allocation6 + $0xd80] sm:$0xff]  ;;  %v3166_v17 = vpack.c.bf16 %v1932_v18, %v1930_v40  ;;  %v2912_v58 = vpack.c.bf16 %v1675_v38, %v1673_v39  ;;  %v1952_v40 = vld [vmem:[#allocation6 + $0xe38] sm:$0xff]  ;;  %v3184_v39 = vpack.c.bf16 %v1947_v31, %v1945_v7 }
 0x216   : > { %3147 = vmatprep.subr.bf16.mxu0 %v3146_v60  ;;  %v1934_v60 = vld [vmem:[#allocation6 + $0xda8] sm:$0xff]  ;;  %v3168_v34 = vpack.c.bf16 %v1931_v51, %v1929_v22  ;;  %v1472_v18 = vld [vmem:[#allocation2 + $0x38] sm:$0xff]  ;;  %v1693_v22 = vld [vmem:[#allocation6 + $0x620] sm:$0xff]  ;;  %v3186_v45 = vpack.c.bf16 %v1952_v40, %v1950_v2 }
 0x217   : > { %v1949_v51 = vld [vmem:[#allocation6 + $0xe20] sm:$0xff]  ;;  %v1716_v2 = vld [vmem:[#allocation6 + $0x6d8] sm:$0xff]  ;;  %v1970_v40 = vld [vmem:[#allocation6 + $0xec8] sm:$0xff] }
 0x218   : > { %2893 = vmatpush1.bf16.msra.mxu1 %v2892_v5  ;;  %v1679_v5 = vld [vmem:[#allocation6 + $0x5b0] sm:$0xff]  ;;  %v1709_v7 = vld [vmem:[#allocation6 + $0x6a0] sm:$0xff] }
 0x219   : > { %3149 = vmatpush1.bf16.msra.mxu0 %v3148_v16  ;;  %2895 = vmatprep.subr.bf16.mxu1 %v2894_v35  ;;  %v1933_v16 = vld [vmem:[#allocation6 + $0xda0] sm:$0xff]  ;;  %v3170_v35 = vpack.c.bf16 %v1936_v57, %v1934_v60  ;;  %v2916_v11 = vpack.c.bf16 %v1679_v5, %v1677_v61  ;;  %v1698_v60 = vld [vmem:[#allocation6 + $0x648] sm:$0xff]  ;;  %v1700_v57 = vld [vmem:[#allocation6 + $0x658] sm:$0xff] }
 0x21a   : > { %3151 = vmatprep.subr.bf16.mxu0 %v3150_v48  ;;  %v1938_v48 = vld [vmem:[#allocation6 + $0xdc8] sm:$0xff]  ;;  %v3172_v27 = vpack.c.bf16 %v1935_v24, %v1933_v16  ;;  %v3188_v16 = vpack.c.bf16 %v1951_v37, %v1949_v51  ;;  %v1697_v24 = vld [vmem:[#allocation6 + $0x640] sm:$0xff]  ;;  %v1971_v51 = vld [vmem:[#allocation6 + $0xed0] sm:$0xff] }
 0x21b   : > { %v1965_v31 = vld [vmem:[#allocation6 + $0xea0] sm:$0xff]  ;;  %v1720_v37 = vld [vmem:[#allocation6 + $0x6f8] sm:$0xff] }
 0x21c   : > { %2897 = vmatpush1.bf16.msra.mxu1 %v2896_v59  ;;  %v1683_v59 = vld [vmem:[#allocation6 + $0x5d0] sm:$0xff] }
 0x21d   : > { %3153 = vmatpush1.bf16.msra.mxu0 %v3152_v21  ;;  %2899 = vmatprep.subr.bf16.mxu1 %v2898_v25  ;;  %v1937_v21 = vld [vmem:[#allocation6 + $0xdc0] sm:$0xff]  ;;  %v3174_v25 = vpack.c.bf16 %v1940_v41, %v1938_v48  ;;  %v2920_v12 = vpack.c.bf16 %v1683_v59, %v1681_v44  ;;  %v1955_v41 = vld [vmem:[#allocation6 + $0xe50] sm:$0xff]  ;;  %v1960_v44 = vld [vmem:[#allocation6 + $0xe78] sm:$0xff]  ;;  %v2936_v59 = vpack.c.bf16 %v1699_v10, %v1697_v24 }
 0x21e   : > { %3155 = vmatprep.subr.bf16.mxu0 %v3154_v30  ;;  %v1942_v30 = vld [vmem:[#allocation6 + $0xde8] sm:$0xff]  ;;  %v3176_v23 = vpack.c.bf16 %v1939_v47, %v1937_v21  ;;  %v3192_v21 = vpack.c.bf16 %v1955_v41, %v1953_v46  ;;  %v1701_v47 = vld [vmem:[#allocation6 + $0x660] sm:$0xff]  ;;  %v1975_v24 = vld [vmem:[#allocation6 + $0xef0] sm:$0xff] }
 0x21f   : > { %v1722_v10 = vld [vmem:[#allocation6 + $0x708] sm:$0xff]  ;;  %v1724_v46 = vld [vmem:[#allocation6 + $0x718] sm:$0xff] }
 0x220   : > { %2901 = vmatpush1.bf16.msra.mxu1 %v2900_v49  ;;  %v1687_v49 = vld [vmem:[#allocation6 + $0x5f0] sm:$0xff]  ;;  %v1980_v41 = vld [vmem:[#allocation6 + $0xf18] sm:$0xff] }
 0x221   : > { %3157 = vmatpush1.bf16.msra.mxu0 %v3156_v56  ;;  %2903 = vmatprep.subr.bf16.mxu1 %v2902_v63  ;;  %v1941_v56 = vld [vmem:[#allocation6 + $0xde0] sm:$0xff]  ;;  %v3178_v63 = vpack.c.bf16 %v1944_v20, %v1942_v30  ;;  %v2924_v43 = vpack.c.bf16 %v1687_v49, %v1685_v14  ;;  %v1959_v20 = vld [vmem:[#allocation6 + $0xe70] sm:$0xff]  ;;  %v1964_v14 = vld [vmem:[#allocation6 + $0xe98] sm:$0xff]  ;;  %v2940_v49 = vpack.c.bf16 %v1703_v32, %v1701_v47 }
 0x222   : > { %3159 = vmatprep.subr.bf16.mxu0 %v3158_v6  ;;  %v1946_v6 = vld [vmem:[#allocation6 + $0xe08] sm:$0xff]  ;;  %v3180_v53 = vpack.c.bf16 %v1943_v29, %v1941_v56  ;;  %v3196_v56 = vpack.c.bf16 %v1959_v20, %v1957_v15  ;;  %v1705_v29 = vld [vmem:[#allocation6 + $0x680] sm:$0xff]  ;;  %v1979_v47 = vld [vmem:[#allocation6 + $0xf10] sm:$0xff] }
 0x223   : > { %v3182_v1 = vpack.c.bf16 %v1948_v3, %v1946_v6  ;;  %v1963_v3 = vld [vmem:[#allocation6 + $0xe90] sm:$0xff]  ;;  %v1726_v32 = vld [vmem:[#allocation6 + $0x728] sm:$0xff]  ;;  %v1728_v15 = vld [vmem:[#allocation6 + $0x738] sm:$0xff] }
 0x224   : > { %2905 = vmatpush1.bf16.msra.mxu1 %v2904_v50  ;;  %v2926_v50 = vpack.c.bf16 %v1692_v13, %v1690_v8  ;;  %v1707_v8 = vld [vmem:[#allocation6 + $0x690] sm:$0xff]  ;;  %v1961_v13 = vld [vmem:[#allocation6 + $0xe80] sm:$0xff]  ;;  %v1984_v20 = vld [vmem:[#allocation6 + $0xf38] sm:$0xff] }
 0x225   : > { %3161 = vmatpush1.bf16.msra.mxu0 %v3160_v42  ;;  %2907 = vmatprep.subr.bf16.mxu1 %v2906_v36  ;;  %v1691_v42 = vld [vmem:[#allocation6 + $0x610] sm:$0xff]  ;;  %v1477_v36 = vld [vmem:[#allocation2 + $0x60] sm:$0xff] }
 0x226   : > { %3163 = vmatprep.subr.bf16.mxu0 %v3162_v28  ;;  %v1694_v28 = vld [vmem:[#allocation6 + $0x628] sm:$0xff] }
 0x227   : > { %v2930_v38 = vpack.c.bf16 %v1696_v54, %v1694_v28  ;;  %v1967_v54 = vld [vmem:[#allocation6 + $0xeb0] sm:$0xff] }
 0x228   : > { %2909 = vmatpush1.bf16.msra.mxu1 %v2908_v62  ;;  %v2928_v62 = vpack.c.bf16 %v1691_v42, %v1689_v9  ;;  %v1966_v9 = vld [vmem:[#allocation6 + $0xea8] sm:$0xff]  ;;  %v3200_v42 = vpack.c.bf16 %v1963_v3, %v1961_v13  ;;  %v1732_v13 = vld [vmem:[#allocation6 + $0x758] sm:$0xff] }
 0x229   : > { %3165 = vmatpush1.bf16.msra.mxu0 %v3164_v55  ;;  %2911 = vmatprep.subr.bf16.mxu1 %v2910_v33  ;;  %v1493_v55 = vmul.f32 0.0625, %v1477_v36  ;;  %v1480_v33 = vld [vmem:[#allocation2 + $0x78] sm:$0xff] }
 0x22a   : > { %3167 = vmatprep.subr.bf16.mxu0 %v3166_v17  ;;  %v1695_v17 = vld [vmem:[#allocation6 + $0x630] sm:$0xff]  ;;  %v1496_v61 = vmul.f32 0.0625, %v1480_v33  ;;  %v1988_v3 = vld [vmem:[#allocation6 + $0xf58] sm:$0xff] }
 0x22b   : > { %v2932_v5 = vpack.c.bf16 %v1695_v17, %v1693_v22  ;;  %v1969_v22 = vld [vmem:[#allocation6 + $0xec0] sm:$0xff] }
 0x22c   : > { %2913 = vmatpush1.bf16.msra.mxu1 %v2912_v58  ;;  %v1488_v58 = vmul.f32 0.0625, %v1472_v18  ;;  %v1972_v18 = vld [vmem:[#allocation6 + $0xed8] sm:$0xff] }
 0x22d   : > { %3169 = vmatpush1.bf16.msra.mxu0 %v3168_v34  ;;  %2915 = vmatprep.subr.bf16.mxu1 %v2914_v52  ;;  %v1954_v34 = vld [vmem:[#allocation6 + $0xe48] sm:$0xff]  ;;  %v1956_v52 = vld [vmem:[#allocation6 + $0xe58] sm:$0xff]  ;;  %v3206_v17 = vpack.c.bf16 %v1972_v18, %v1970_v40  ;;  %v1733_v18 = vld [vmem:[#allocation6 + $0x760] sm:$0xff] }
 0x22e   : > { %3171 = vmatprep.subr.bf16.mxu0 %v3170_v35  ;;  %v2934_v35 = vpack.c.bf16 %v1700_v57, %v1698_v60  ;;  %v3190_v48 = vpack.c.bf16 %v1956_v52, %v1954_v34  ;;  %v1974_v60 = vld [vmem:[#allocation6 + $0xee8] sm:$0xff]  ;;  %v1976_v57 = vld [vmem:[#allocation6 + $0xef8] sm:$0xff]  ;;  %v3208_v34 = vpack.c.bf16 %v1971_v51, %v1969_v22 }
 0x22f   : > { %v1740_v22 = vld [vmem:[#allocation6 + $0x798] sm:$0xff] }
 0x230   : > { %2917 = vmatpush1.bf16.msra.mxu1 %v2916_v11  ;;  %v1702_v11 = vld [vmem:[#allocation6 + $0x668] sm:$0xff]  ;;  %v1996_v51 = vld [vmem:[#allocation6 + $0xf98] sm:$0xff] }
 0x231   : > { %3173 = vmatpush1.bf16.msra.mxu0 %v3172_v27  ;;  %2919 = vmatprep.subr.bf16.mxu1 %v2918_v0  ;;  %v1704_v27 = vld [vmem:[#allocation6 + $0x678] sm:$0xff]  ;;  %v1958_v0 = vld [vmem:[#allocation6 + $0xe68] sm:$0xff] }
 0x232   : > { %3175 = vmatprep.subr.bf16.mxu0 %v3174_v25  ;;  %v2938_v25 = vpack.c.bf16 %v1704_v27, %v1702_v11  ;;  %v3194_v30 = vpack.c.bf16 %v1960_v44, %v1958_v0  ;;  %v2958_v0 = vpack.c.bf16 %v1724_v46, %v1722_v10  ;;  %v1721_v44 = vld [vmem:[#allocation6 + $0x700] sm:$0xff] }
 0x234   : > { %2921 = vmatpush1.bf16.msra.mxu1 %v2920_v12  ;;  %v1706_v12 = vld [vmem:[#allocation6 + $0x688] sm:$0xff] }
 0x235   : > { %3177 = vmatpush1.bf16.msra.mxu0 %v3176_v23  ;;  %2923 = vmatprep.subr.bf16.mxu1 %v2922_v19  ;;  %v1708_v23 = vld [vmem:[#allocation6 + $0x698] sm:$0xff]  ;;  %v1962_v19 = vld [vmem:[#allocation6 + $0xe88] sm:$0xff] }
 0x236   : > { %3179 = vmatprep.subr.bf16.mxu0 %v3178_v63  ;;  %v2942_v63 = vpack.c.bf16 %v1708_v23, %v1706_v12  ;;  %v3198_v6 = vpack.c.bf16 %v1964_v14, %v1962_v19  ;;  %v2962_v19 = vpack.c.bf16 %v1728_v15, %v1726_v32  ;;  %v1725_v14 = vld [vmem:[#allocation6 + $0x720] sm:$0xff] }
 0x238   : > { %2925 = vmatpush1.bf16.msra.mxu1 %v2924_v43  ;;  %v1710_v43 = vld [vmem:[#allocation6 + $0x6a8] sm:$0xff] }
 0x239   : > { %3181 = vmatpush1.bf16.msra.mxu0 %v3180_v53  ;;  %2927 = vmatprep.subr.bf16.mxu1 %v2926_v50  ;;  %v1968_v53 = vld [vmem:[#allocation6 + $0xeb8] sm:$0xff]  ;;  %v2944_v50 = vpack.c.bf16 %v1707_v8, %v1705_v29  ;;  %v2946_v36 = vpack.c.bf16 %v1712_v4, %v1710_v43  ;;  %v1983_v29 = vld [vmem:[#allocation6 + $0xf30] sm:$0xff]  ;;  %v1730_v8 = vld [vmem:[#allocation6 + $0x748] sm:$0xff] }
 0x23a   : > { %3183 = vmatprep.subr.bf16.mxu0 %v3182_v1  ;;  %v1711_v1 = vld [vmem:[#allocation6 + $0x6b0] sm:$0xff]  ;;  %v3202_v28 = vpack.c.bf16 %v1968_v53, %v1966_v9  ;;  %v2966_v9 = vpack.c.bf16 %v1732_v13, %v1730_v8  ;;  %v1729_v53 = vld [vmem:[#allocation6 + $0x740] sm:$0xff] }
 0x23b   : > { %2228 = vmatmul.mubr.f32.vlgmr.msra.gmra.mrb[0].mxu1 %v1485_v26  ;;  %v1714_v26 = vld [vmem:[#allocation6 + $0x6c8] sm:$0xff] }
 0x23c   : > { %2929 = vmatpush1.bf16.msra.mxu1 %v2928_v62  ;;  %2512 = vmatmul.mubr.f32.vlgmr.msra.gmra.mrb[0].mxu0 %v1493_v55  ;;  %v2948_v62 = vpack.c.bf16 %v1711_v1, %v1709_v7  ;;  %v3204_v55 = vpack.c.bf16 %v1967_v54, %v1965_v31  ;;  %v2950_v33 = vpack.c.bf16 %v1716_v2, %v1714_v26  ;;  %v1987_v7 = vld [vmem:[#allocation6 + $0xf50] sm:$0xff]  ;;  %v1734_v1 = vld [vmem:[#allocation6 + $0x768] sm:$0xff]  ;;  %v1736_v31 = vld [vmem:[#allocation6 + $0x778] sm:$0xff] }
 0x23d   : > { %3185 = vmatpush1.bf16.msra.mxu0 %v3184_v39  ;;  %2931 = vmatprep.subr.bf16.mxu1 %v2930_v38  ;;  %v1713_v39 = vld [vmem:[#allocation6 + $0x6c0] sm:$0xff]  ;;  %v1715_v38 = vld [vmem:[#allocation6 + $0x6d0] sm:$0xff]  ;;  %v1992_v54 = vld [vmem:[#allocation6 + $0xf78] sm:$0xff]  ;;  %v2970_v40 = vpack.c.bf16 %v1736_v31, %v1734_v1 }
 0x23e   : > { %3187 = vmatprep.subr.bf16.mxu0 %v3186_v45  ;;  %2298 = vmatprep.mubr.f32.mxu1 %v1488_v58  ;;  %v1718_v45 = vld [vmem:[#allocation6 + $0x6e8] sm:$0xff]  ;;  %v2952_v58 = vpack.c.bf16 %v1715_v38, %v1713_v39  ;;  %v1991_v39 = vld [vmem:[#allocation6 + $0xf70] sm:$0xff] }
 0x23f   : > { %2582 = vmatprep.mubr.f32.mxu0 %v1496_v61  ;;  %v2954_v52 = vpack.c.bf16 %v1720_v37, %v1718_v45  ;;  %v1717_v61 = vld [vmem:[#allocation6 + $0x6e0] sm:$0xff]  ;;  %v1738_v38 = vld [vmem:[#allocation6 + $0x788] sm:$0xff] }
 0x240   : > { %2933 = vmatpush1.bf16.msra.mxu1 %v2932_v5  ;;  %v1719_v5 = vld [vmem:[#allocation6 + $0x6f0] sm:$0xff] }
 0x241   : > { %3189 = vmatpush1.bf16.msra.mxu0 %v3188_v16  ;;  %2935 = vmatprep.subr.bf16.mxu1 %v2934_v35  ;;  %v1973_v16 = vld [vmem:[#allocation6 + $0xee0] sm:$0xff]  ;;  %v3210_v35 = vpack.c.bf16 %v1976_v57, %v1974_v60  ;;  %v2956_v11 = vpack.c.bf16 %v1719_v5, %v1717_v61  ;;  %v2974_v60 = vpack.c.bf16 %v1740_v22, %v1738_v38  ;;  %v1995_v61 = vld [vmem:[#allocation6 + $0xf90] sm:$0xff]  ;;  %v1742_v5 = vld [vmem:[#allocation6 + $0x7a8] sm:$0xff] }
 0x242   : > { %3191 = vmatprep.subr.bf16.mxu0 %v3190_v48  ;;  %v1978_v48 = vld [vmem:[#allocation6 + $0xf08] sm:$0xff]  ;;  %v3212_v27 = vpack.c.bf16 %v1975_v24, %v1973_v16  ;;  %v1737_v57 = vld [vmem:[#allocation6 + $0x780] sm:$0xff]  ;;  %v1744_v16 = vld [vmem:[#allocation6 + $0x7b8] sm:$0xff] }
 0x243   : > { %v2000_v24 = vld [vmem:[#allocation6 + $0xfb8] sm:$0xff] }
 0x244   : > { %2937 = vmatpush1.bf16.msra.mxu1 %v2936_v59  ;;  %v1723_v59 = vld [vmem:[#allocation6 + $0x710] sm:$0xff] }
 0x245   : > { %3193 = vmatpush1.bf16.msra.mxu0 %v3192_v21  ;;  %2939 = vmatprep.subr.bf16.mxu1 %v2938_v25  ;;  %v1977_v21 = vld [vmem:[#allocation6 + $0xf00] sm:$0xff]  ;;  %v3214_v25 = vpack.c.bf16 %v1980_v41, %v1978_v48  ;;  %v2960_v12 = vpack.c.bf16 %v1723_v59, %v1721_v44  ;;  %v2978_v48 = vpack.c.bf16 %v1744_v16, %v1742_v5  ;;  %v1999_v44 = vld [vmem:[#allocation6 + $0xfb0] sm:$0xff]  ;;  %v1746_v59 = vld [vmem:[#allocation6 + $0x7c8] sm:$0xff] }
 0x246   : > { %3195 = vmatprep.subr.bf16.mxu0 %v3194_v30  ;;  %v1982_v30 = vld [vmem:[#allocation6 + $0xf28] sm:$0xff]  ;;  %v3216_v23 = vpack.c.bf16 %v1979_v47, %v1977_v21  ;;  %v1741_v41 = vld [vmem:[#allocation6 + $0x7a0] sm:$0xff]  ;;  %v1748_v21 = vld [vmem:[#allocation6 + $0x7d8] sm:$0xff] }
 0x247   : > { %v2004_v47 = vld [vmem:[#allocation6 + $0xfd8] sm:$0xff] }
 0x248   : > { %2941 = vmatpush1.bf16.msra.mxu1 %v2940_v49  ;;  %v1727_v49 = vld [vmem:[#allocation6 + $0x730] sm:$0xff] }
 0x249   : > { %3197 = vmatpush1.bf16.msra.mxu0 %v3196_v56  ;;  %2943 = vmatprep.subr.bf16.mxu1 %v2942_v63  ;;  %v1981_v56 = vld [vmem:[#allocation6 + $0xf20] sm:$0xff]  ;;  %v3218_v63 = vpack.c.bf16 %v1984_v20, %v1982_v30  ;;  %v2964_v43 = vpack.c.bf16 %v1727_v49, %v1725_v14  ;;  %v2982_v30 = vpack.c.bf16 %v1748_v21, %v1746_v59  ;;  %v2003_v14 = vld [vmem:[#allocation6 + $0xfd0] sm:$0xff]  ;;  %v1750_v49 = vld [vmem:[#allocation6 + $0x7e8] sm:$0xff] }
 0x24a   : > { %3199 = vmatprep.subr.bf16.mxu0 %v3198_v6  ;;  %v1986_v6 = vld [vmem:[#allocation6 + $0xf48] sm:$0xff]  ;;  %v3220_v4 = vpack.c.bf16 %v1983_v29, %v1981_v56  ;;  %v1745_v20 = vld [vmem:[#allocation6 + $0x7c0] sm:$0xff]  ;;  %v1752_v56 = vld [vmem:[#allocation6 + $0x7f8] sm:$0xff] }
 0x24b   : > { %v2008_v29 = vld [vmem:[#allocation6 + $0xff8] sm:$0xff] }
 0x24c   : > { %2945 = vmatpush1.bf16.msra.mxu1 %v2944_v50  ;;  %v1731_v50 = vld [vmem:[#allocation6 + $0x750] sm:$0xff] }
 0x24d   : > { %3201 = vmatpush1.bf16.msra.mxu0 %v3200_v42  ;;  %2947 = vmatprep.subr.bf16.mxu1 %v2946_v36  ;;  %v1985_v42 = vld [vmem:[#allocation6 + $0xf40] sm:$0xff]  ;;  %v3222_v36 = vpack.c.bf16 %v1988_v3, %v1986_v6  ;;  %v2968_v26 = vpack.c.bf16 %v1731_v50, %v1729_v53  ;;  %v2986_v6 = vpack.c.bf16 %v1752_v56, %v1750_v49  ;;  %v2007_v53 = vld [vmem:[#allocation6 + $0xff0] sm:$0xff] }
 0x24e   : > { %3203 = vmatprep.subr.bf16.mxu0 %v3202_v28  ;;  %v1990_v28 = vld [vmem:[#allocation6 + $0xf68] sm:$0xff]  ;;  %v3224_v2 = vpack.c.bf16 %v1987_v7, %v1985_v42  ;;  %v1749_v3 = vld [vmem:[#allocation6 + $0x7e0] sm:$0xff]  ;;  %v1471_v42 = vld [vmem:[#allocation2 + $0x30] sm:$0xff] }
 0x24f   : > { %v1479_v7 = vld [vmem:[#allocation2 + $0x70] sm:$0xff]  ;;  %v1487_v1 = vmul.f32 0.0625, %v1471_v42 }
 0x250   : > { %2949 = vmatpush1.bf16.msra.mxu1 %v2948_v62  ;;  %v1735_v62 = vld [vmem:[#allocation6 + $0x770] sm:$0xff]  ;;  %v1495_v31 = vmul.f32 0.0625, %v1479_v7 }
 0x251   : > { %3205 = vmatpush1.bf16.msra.mxu0 %v3204_v55  ;;  %2951 = vmatprep.subr.bf16.mxu1 %v2950_v33  ;;  %v1989_v55 = vld [vmem:[#allocation6 + $0xf60] sm:$0xff]  ;;  %v3226_v33 = vpack.c.bf16 %v1992_v54, %v1990_v28  ;;  %v2972_v45 = vpack.c.bf16 %v1735_v62, %v1733_v18  ;;  %v2011_v28 = vlaneseq }
 0x252   : > { %3207 = vmatprep.subr.bf16.mxu0 %v3206_v17  ;;  %v1994_v17 = vld [vmem:[#allocation6 + $0xf88] sm:$0xff]  ;;  %v3228_v37 = vpack.c.bf16 %v1991_v39, %v1989_v55 }
 0x253   : > { %v2012_v54 = vshrl.u32 %v2011_v28, 7 }
 0x254   : > { %2953 = vmatpush1.bf16.msra.mxu1 %v2952_v58  ;;  %v1739_v58 = vld [vmem:[#allocation6 + $0x790] sm:$0xff] }
 0x255   : > { %3209 = vmatpush1.bf16.msra.mxu0 %v3208_v34  ;;  %2955 = vmatprep.subr.bf16.mxu1 %v2954_v52  ;;  %v1993_v34 = vld [vmem:[#allocation6 + $0xf80] sm:$0xff]  ;;  %v3230_v52 = vpack.c.bf16 %v1996_v51, %v1994_v17  ;;  %v2976_v10 = vpack.c.bf16 %v1739_v58, %v1737_v57 }
 0x256   : > { %3211 = vmatprep.subr.bf16.mxu0 %v3210_v35  ;;  %v1998_v35 = vld [vmem:[#allocation6 + $0xfa8] sm:$0xff]  ;;  %v3232_v46 = vpack.c.bf16 %v1995_v61, %v1993_v34 }
 0x258   : > { %2957 = vmatpush1.bf16.msra.mxu1 %v2956_v11  ;;  %v1743_v11 = vld [vmem:[#allocation6 + $0x7b0] sm:$0xff] }
 0x259   : > { %3213 = vmatpush1.bf16.msra.mxu0 %v3212_v27  ;;  %2959 = vmatprep.subr.bf16.mxu1 %v2958_v0  ;;  %v1997_v27 = vld [vmem:[#allocation6 + $0xfa0] sm:$0xff]  ;;  %v3234_v0 = vpack.c.bf16 %v2000_v24, %v1998_v35  ;;  %v2980_v32 = vpack.c.bf16 %v1743_v11, %v1741_v41 }
 0x25a   : > { %3215 = vmatprep.subr.bf16.mxu0 %v3214_v25  ;;  %v2002_v25 = vld [vmem:[#allocation6 + $0xfc8] sm:$0xff]  ;;  %v3236_v15 = vpack.c.bf16 %v1999_v44, %v1997_v27 }
 0x25c   : > { %2961 = vmatpush1.bf16.msra.mxu1 %v2960_v12  ;;  %v1747_v12 = vld [vmem:[#allocation6 + $0x7d0] sm:$0xff] }
 0x25d   : > { %3217 = vmatpush1.bf16.msra.mxu0 %v3216_v23  ;;  %2963 = vmatprep.subr.bf16.mxu1 %v2962_v19  ;;  %v2001_v23 = vld [vmem:[#allocation6 + $0xfc0] sm:$0xff]  ;;  %v3238_v19 = vpack.c.bf16 %v2004_v47, %v2002_v25  ;;  %v2984_v8 = vpack.c.bf16 %v1747_v12, %v1745_v20 }
 0x25e   : > { %3219 = vmatprep.subr.bf16.mxu0 %v3218_v63  ;;  %v2006_v63 = vld [vmem:[#allocation6 + $0xfe8] sm:$0xff]  ;;  %v3240_v13 = vpack.c.bf16 %v2003_v14, %v2001_v23 }
 0x260   : > { %2965 = vmatpush1.bf16.msra.mxu1 %v2964_v43  ;;  %v1751_v43 = vld [vmem:[#allocation6 + $0x7f0] sm:$0xff] }
 0x261   : > { %3221 = vmatpush1.bf16.msra.mxu0 %v3220_v4  ;;  %2967 = vmatprep.subr.bf16.mxu1 %v2966_v9  ;;  %v3242_v4 = vpack.c.bf16 %v2008_v29, %v2006_v63  ;;  %v2005_v9 = vld [vmem:[#allocation6 + $0xfe0] sm:$0xff]  ;;  %v2988_v50 = vpack.c.bf16 %v1751_v43, %v1749_v3 }
 0x262   : > { %3223 = vmatprep.subr.bf16.mxu0 %v3222_v36  ;;  %v3244_v36 = vpack.c.bf16 %v2007_v53, %v2005_v9 }
 0x264   : > { %2969 = vmatpush1.bf16.msra.mxu1 %v2968_v26  ;;  %v2013_v26 = vsub.s32 0, %v2012_v54 }
 0x265   : > { %3225 = vmatpush1.bf16.msra.mxu0 %v3224_v2  ;;  %2971 = vmatprep.subr.bf16.mxu1 %v2970_v40  ;;  %v2009_v2 = vld [vmem:[#allocation8] sm:$0x3]  ;;  %v2017_v40 = vsub.s32 1, %v2012_v54 }
 0x266   : > { %3227 = vmatprep.subr.bf16.mxu0 %v3226_v33  ;;  %v2014_v18 = vrot.slane %v2009_v2, %v2013_v26 }
 0x267   : > { %v2018_v62 = vrot.slane %v2009_v2, %v2017_v40 }
 0x268   : > { %2973 = vmatpush1.bf16.msra.mxu1 %v2972_v45 }
 0x269   : > { %3229 = vmatpush1.bf16.msra.mxu0 %v3228_v37  ;;  %2975 = vmatprep.subr.bf16.mxu1 %v2974_v60 }
 0x26a   : > { %3231 = vmatprep.subr.bf16.mxu0 %v3230_v52 }
 0x26c   : > { %2977 = vmatpush1.bf16.msra.mxu1 %v2976_v10 }
 0x26d   : > { %3233 = vmatpush1.bf16.msra.mxu0 %v3232_v46  ;;  %2979 = vmatprep.subr.bf16.mxu1 %v2978_v48 }
 0x26e   : > { %3235 = vmatprep.subr.bf16.mxu0 %v3234_v0 }
 0x270   : > { %2981 = vmatpush1.bf16.msra.mxu1 %v2980_v32 }
 0x271   : > { %3237 = vmatpush1.bf16.msra.mxu0 %v3236_v15  ;;  %2983 = vmatprep.subr.bf16.mxu1 %v2982_v30 }
 0x272   : > { %3239 = vmatprep.subr.bf16.mxu0 %v3238_v19 }
 0x274   : > { %2985 = vmatpush1.bf16.msra.mxu1 %v2984_v8 }
 0x275   : > { %3241 = vmatpush1.bf16.msra.mxu0 %v3240_v13  ;;  %2987 = vmatprep.subr.bf16.mxu1 %v2986_v6 }
 0x276   : > { %3243 = vmatprep.subr.bf16.mxu0 %v3242_v4 }
 0x278   : > { %2989 = vmatpush1.bf16.msra.mxu1 %v2988_v50 }
 0x279   : > { %3245 = vmatpush1.bf16.msra.mxu0 %v3244_v36 }
 0x27b   : > { %2299 = vmatmul.mubr.f32.vlgmr.msra.gmra.mrb[0].mxu1 %v1487_v1 }
 0x27c   : > { %2583 = vmatmul.mubr.f32.vlgmr.msra.gmra.mrb[0].mxu0 %v1495_v31 }
 0x34e   : > { %v2300_v55 = vpop.f32.mrb[0].mxu1 }
 0x34f   : > { %v3246_v33 = vadd.f32 %v2300_v55, %v2014_v18  ;;  %v2584_v39 = vpop.f32.mrb[0].mxu0  ;;  %v2302_v38 = vpop.f32.mrb[1].mxu1 }
 0x350   : > { %v3248_v22 = vadd.f32 %v2302_v38, %v2018_v62  ;;  %v2586_v17 = vpop.f32.mrb[1].mxu0 }
 0x351   : > { %v3247_v51 = vadd.f32 %v3246_v33, %v2584_v39 }
 0x352   : > { %v3249_v45 = vadd.f32 %v3248_v22, %v2586_v17 }
 0x353   : > { %2589 = vst [vmem:[%s3874_s9] sm:$0xff] %v3247_v51 }
 0x354   : > { %2590 = vst [vmem:[%s3874_s9 + $0x8] sm:$0xff] %v3249_v45 }
 0x355 PF: > { %s2733_s18 = sshll.u32 %s3591_s19, 8  ;;  %s2606_s8 = sshll.u32 %s3874_s9, 4  ;;  %s2607_s8 = int_to_ptr.vmem [resolvable:$true] %s2606_s8 }
 0x356   : > { %s4535_s28 = scalar_lea.hbm %s4597_s3, %s2733_s18  ;;  %s2592_s27 = scalar_lea.sflag [#allocation5], %s230_s2 }
 0x357   : > { %s3477_s7 = scalar_lea.vmem %s2607_s8, 256  ;;  %p4807_p9 = scmp.ne.s32.totalorder %s4616_s30, 0 }
 0x358   : > { %p3478_p6 = scmp.ne.s32.totalorder %s2607_s8, %s3477_s7  ;;  %s3614_s12 = smov [#allocation9]  }
 0x359   : > { %s3481_s22 = sshll.u32 %s3614_s12, 4  ;;  %s3482_s22 = int_to_ptr.vmem [resolvable:$false] %s3481_s22 }
 0x35a   : > { %p3479_p10 = pnand %p3478_p6, %p4807_p9  ;;  %s3483_s15 = scalar_lea.vmem %s3482_s22, 512 }
 0x35b   : > { %p3484_p12 = scmp.lt.s32.totalorder %s2607_s8, %s3482_s22  ;;  %p3485_p11 = scmp.lt.s32.totalorder %s3483_s15, %s3477_s7 }
 0x35c   : > { %p3480_p5 = pneg %p3479_p10 }
 0x35d   : > { %p3486_p1 = por %p3485_p11, %p3484_p12 }
 0x35f   : > { %p3487_p8 = pnand %p3486_p1, %p3480_p5 }
 0x361   : > { %3490 = shalt.err (!%p3487_p8)
}
 0x362   : > { %s3491_s19 = scalar_lea.hbm %s4535_s28, 256  ;;  %s3495_s11 = scalar_lea.hbm %s4597_s3, 512 }
 0x363   : > { %p3492_p4 = scmp.ne.s32.totalorder %s4535_s28, %s3491_s19  ;;  %p3496_p2 = scmp.lt.u32.totalorder %s4535_s28, %s4597_s3 }
 0x364   : > { %p3497_p0 = scmp.lt.u32.totalorder %s3495_s11, %s3491_s19  ;;  %p3499_p6 = scmp.lt.u32.totalorder %s3491_s19, %s4535_s28 }
 0x365   : > { %p3493_p3 = pnand %p3492_p4, %p4807_p9 }
 0x366   : > { %p3498_p7 = por %p3497_p0, %p3496_p2 }
 0x367   : > { %p3494_p13 = pneg %p3493_p3 }
 0x368   : > { %p3500_p10 = por %p3499_p6, %p3498_p7 }
 0x36a   : > { %p3501_p5 = pnand %p3500_p10, %p3494_p13 }
 0x36c   : > { %3504 = shalt.err (!%p3501_p5)
}
 0x36d   : > { %3272 = dma.vmem_to_hbm [thread:$0]  (%p4807_p9), %s2607_s8, 256, %s4535_s28, %s2592_s27  }
 0x36e PF: > { %s4808_s10 = sld [smem:[#allocation15_spill]]  ;;  %s4809_s2 = sld [smem:[#allocation13_spill]] }
 0x36f   : > { %s4810_s5 = sld [smem:[#allocation16_spill]] }
 0x374   : > { %p3294_p12 = scmp.ge.s32.totalorder %s4808_s10, 2  ;;  %s2618_s9 = sand.u32 1, %s4809_s2  }
 0x375   : > { %p4811_p11 = scmp.ne.s32.totalorder %s4810_s5, 0  ;;  %s2619_s18 = scalar_lea.sflag [#allocation5], %s2618_s9 }
 0x377   : > { %p3286_p1 = pnand %p3294_p12, %p4811_p11 }
 0x379   : > { %3558 = dma.done.wait (!%p3286_p1), %s2619_s18, 256  }
 0x37a   : > { %3560 = vsyncadd (!%p3286_p1), %s2619_s18, 4294967040  ;;  %s20_s22 = sadd.s32 1, %s4808_s10   ;;  %s4812_s18 = sld [smem:[#allocation14_spill]] }
 0x37b   : > { %p17_p8 = scmp.ge.s32.totalorder %s20_s22, 6   ;;  %s4813_s30 = sld [smem:[#allocation17_spill]] }
 0x37c   : > { %s4814_s12 = smov %s3567_s13  ;;  %s4815_s13 = smov %s3571_s14 }
 0x37d   : > { %s4816_s14 = smov %s3821_s20  ;;  %s4817_s15 = smov %s3579_s16 }
 0x37e   : > { %s4818_s16 = smov %s3583_s17  ;;  %s4819_s17 = smov %s3826_s23 }
 0x37f   : > { %s4820_s19 = smov %s3599_s21  ;;  %s4822_s21 = smov %s4828_s25 }
 0x380   :  { %19 = sbr.rel (!%p17_p8) target bundleno = 13 (0xd), region = 93 }
 0x381   : > { %s4821_s20 = smov %s4813_s30 }
 0x387   :  { %2624 = vsyncpa [#allocation4], 1 }
 0x388   :  { %2626 = vsyncpa [#allocation4 + $0x1], 1 }
 0x389   :  { %2627 = vsyncpa [#allocation7], 1 }
 0x38a   :  { %2628 = vsyncpa [#allocation5], 1 }
 0x38b   :  { %2630 = vsyncpa [#allocation5 + $0x1], 1 }

</bundles_post_ra>
